<compile_context>
chip_gen: v7x
topology: tpu7x:2x2x1
jax: 0.10.0
libtpu: 0.0.40
codegen_flags: <defaults>
</compile_context>

<pallas_src>
import jax
import jax.numpy as jnp
from jax.experimental import pallas as pl
from jax.experimental.pallas import tpu as pltpu

LEAK = 0.01            # nn.LeakyReLU default negative_slope
OFF = 128              # lane-aligned interior offset inside the padded scratch
HALO = 32              # zeroed halo strip width (>= max pad = 25)

KERNEL_SIZES = (3, 7, 11)
DILATIONS = ((1, 1), (3, 1), (5, 1))


def _lrelu(h):
    return jnp.where(h > 0, h, LEAK * h)


def mrf_kernel(x_ref, w3_ref, b3_ref, w7_ref, b7_ref, w11_ref, b11_ref,
               out_ref, pad_ref, col_ref):
    # x_ref: (1, C, L) block for one batch element.
    C = x_ref.shape[1]
    L = x_ref.shape[2]

    # Zero only the halo strips that the shifted taps can read. Done every grid
    # step (cheap: 2*C*HALO elements) so correctness does not depend on scratch
    # state from another core when the batch axis is megacore-sharded.
    pad_ref[:, OFF - HALO:OFF] = jnp.zeros((C, HALO), dtype=pad_ref.dtype)
    pad_ref[:, OFF + L:OFF + L + HALO] = jnp.zeros((C, HALO), dtype=pad_ref.dtype)

    def conv(h, w_ref, b_ref, wi, dil):
        # dilated "same" Conv1d as one fused matmul:
        #   out[co, l] = b[co] + sum_{t, ci} W[co, t*C+ci] * h_pad[ci, l + t*dil - p]
        k = w_ref.shape[2] // C
        p = (k - 1) * dil // 2
        # write interior (bf16) -- halo stays zero, nothing writes outside [OFF, OFF+L)
        pad_ref[:, OFF:OFF + L] = h.astype(pad_ref.dtype)
        # stack the k time-shifted slices into the im2col slab (bf16)
        for t in range(k):
            start = OFF + t * dil - p                      # static Python int
            col_ref[t * C:(t + 1) * C, :] = pad_ref[:, start:start + L]
        acc = jnp.dot(w_ref[wi], col_ref[0:k * C, :],
                      preferred_element_type=jnp.float32)
        return acc + b_ref[wi]                              # (C,1) bias broadcasts once

    def res_stack(x0, w_ref, b_ref, dils):
        h = x0
        for i in range(3):
            y = conv(_lrelu(h), w_ref, b_ref, 2 * i, dils[0])
            y = conv(_lrelu(y), w_ref, b_ref, 2 * i + 1, dils[1])
            h = h + y
        return h

    x = x_ref[0].astype(jnp.float32)
    out = (res_stack(x, w3_ref, b3_ref, DILATIONS[0])
           + res_stack(x, w7_ref, b7_ref, DILATIONS[1])
           + res_stack(x, w11_ref, b11_ref, DILATIONS[2]))
    out_ref[0] = out.astype(out_ref.dtype)


def mrf_pallas(x, params):
    """x: (N, C, L) float32. params: list of 3 (w, b) per ResStack with
    w: (6, C, C, k) in PyTorch (Cout, Cin, k) order, b: (6, C)."""
    N, C, L = x.shape
    assert C % 16 == 0, "C must be a multiple of 16 (bf16 sublane packing)"
    assert L % 128 == 0, "L must be a multiple of 128 (lane tiling)"

    max_pad = max((k - 1) * d[0] // 2 for k, d in zip(KERNEL_SIZES, DILATIONS))
    assert max_pad <= HALO <= OFF
    kmax = max(KERNEL_SIZES)

    kernel_args = []
    in_specs = [pl.BlockSpec((1, C, L), lambda n: (n, 0, 0))]
    for (w, b) in params:
        nlayer, co, ci, k = w.shape
        # im2col-fused weight: (6, Cout, Cin, k) -> (6, Cout, k*Cin), bf16 for the MXU
        wt = jnp.transpose(w, (0, 1, 3, 2)).reshape(nlayer, co, k * ci)
        wt = wt.astype(jnp.bfloat16)
        bt = b[:, :, None].astype(jnp.float32)        # (6, C, 1), bias stays f32
        kernel_args += [wt, bt]
        in_specs += [
            pl.BlockSpec(wt.shape, lambda n: (0, 0, 0)),   # constant index: DMA'd once
            pl.BlockSpec(bt.shape, lambda n: (0, 0, 0)),
        ]

    return pl.pallas_call(
        mrf_kernel,
        out_shape=jax.ShapeDtypeStruct((N, C, L), x.dtype),
        grid=(N,),
        in_specs=in_specs,
        out_specs=pl.BlockSpec((1, C, L), lambda n: (n, 0, 0)),
        scratch_shapes=[
            pltpu.VMEM((C, L + 2 * OFF), jnp.bfloat16),    # zero-halo padded activation
            pltpu.VMEM((kmax * C, L), jnp.bfloat16),       # im2col stacked-tap slab
        ],
        compiler_params=pltpu.CompilerParams(
            dimension_semantics=("parallel",),   # shard batch across TCs on v7x
            vmem_limit_bytes=32 * 1024 * 1024,   # explicit; re-derive when scaling C/L
        ),
    )(x, *kernel_args)


# ----------------------- pure-JAX references (for validation) ----------------------

def _conv1d_f32_ref(x, w, b, dil):
    pad = (w.shape[-1] - 1) * dil // 2
    y = jax.lax.conv_general_dilated(
        x, w, window_strides=(1,), padding=[(pad, pad)],
        rhs_dilation=(dil,), dimension_numbers=("NCH", "OIH", "NCH"),
        precision=jax.lax.Precision.HIGHEST)
    return y + b[None, :, None]


def _conv1d_bf16_ref(x, w, b, dil):
    # numerics-matched reference: bf16 conv inputs, f32 accumulation, f32 bias
    pad = (w.shape[-1] - 1) * dil // 2
    y = jax.lax.conv_general_dilated(
        x.astype(jnp.bfloat16), w.astype(jnp.bfloat16),
        window_strides=(1,), padding=[(pad, pad)],
        rhs_dilation=(dil,), dimension_numbers=("NCH", "OIH", "NCH"),
        preferred_element_type=jnp.float32)
    return y + b[None, :, None]


def _res_stack_ref(x, w, b, dils, conv_fn):
    h = x
    for i in range(3):
        y = conv_fn(_lrelu(h), w[2 * i], b[2 * i], dils[0])
        y = conv_fn(_lrelu(y), w[2 * i + 1], b[2 * i + 1], dils[1])
        h = h + y
    return h


def mrf_ref(x, params, conv_fn):
    out = jnp.zeros_like(x)
    for (w, b), dils in zip(params, DILATIONS):
        out = out + _res_stack_ref(x, w, b, dils, conv_fn)
    return out


# ----------------------------------- main ------------------------------------------

if __name__ == "__main__":
    N, C, L = 2, 16, 256   # batch, channels, sequence length (Conv1d is over L)

    key = jax.random.PRNGKey(0)
    params = []
    for k in KERNEL_SIZES:
        key, kw, kb = jax.random.split(key, 3)
        w = jax.random.normal(kw, (6, C, C, k), jnp.float32) * 0.1
        b = jax.random.normal(kb, (6, C), jnp.float32) * 0.1
        params.append((w, b))

    key, kx = jax.random.split(key)
    x = jax.random.normal(kx, (N, C, L), jnp.float32)

    out = jax.block_until_ready(mrf_pallas(x, params))
    assert out.shape == (N, C, L)

    # Tight check against a reference that mirrors the kernel's bf16-input /
    # f32-accumulate numerics.
    ref_bf16 = jax.block_until_ready(mrf_ref(x, params, _conv1d_bf16_ref))
    err_bf16 = float(jnp.max(jnp.abs(out - ref_bf16)))
    assert err_bf16 < 5e-3, "bf16-consistent max abs err: %g" % err_bf16

    # Loose sanity check against the full-f32 PyTorch-semantics reference
    # (catches layout / padding / weight-reshape bugs; slack covers bf16 rounding).
    ref_f32 = jax.block_until_ready(mrf_ref(x, params, _conv1d_f32_ref))
    err_f32 = float(jnp.max(jnp.abs(out - ref_f32)))
    assert err_f32 < 0.5, "f32 max abs err: %g" % err_f32

    print("KERNEL_OK")
</pallas_src>

<mosaic_0001>
module attributes {stable_mosaic.version = 11 : i64} {
  func.func @mrf_kernel(%arg0: i32, %arg1: memref<1x16x256xf32, #tpu.memory_space<vmem>>, %arg2: memref<6x16x48xbf16, #tpu.memory_space<vmem>>, %arg3: memref<6x16x1xf32, #tpu.memory_space<vmem>>, %arg4: memref<6x16x112xbf16, #tpu.memory_space<vmem>>, %arg5: memref<6x16x1xf32, #tpu.memory_space<vmem>>, %arg6: memref<6x16x176xbf16, #tpu.memory_space<vmem>>, %arg7: memref<6x16x1xf32, #tpu.memory_space<vmem>>, %arg8: memref<1x16x256xf32, #tpu.memory_space<vmem>>, %arg9: memref<16x512xbf16, #tpu.memory_space<vmem>>, %arg10: memref<176x256xbf16, #tpu.memory_space<vmem>>) attributes {dimension_semantics = [#tpu.dimension_semantics<parallel>], iteration_bounds = array<i64: 2>, scalar_prefetch = 0 : i64, scratch_operands = 2 : i64, tpu.core_type = #tpu.core_type<tc>, window_params = [{transform_indices = @transform_0, window_bounds = array<i64: 1, 16, 256>}, {pipeline_mode = #tpu.pipeline_mode<synchronous>, transform_indices = @transform_1, window_bounds = array<i64: 6, 16, 48>}, {pipeline_mode = #tpu.pipeline_mode<synchronous>, transform_indices = @transform_2, window_bounds = array<i64: 6, 16, 1>}, {pipeline_mode = #tpu.pipeline_mode<synchronous>, transform_indices = @transform_3, window_bounds = array<i64: 6, 16, 112>}, {pipeline_mode = #tpu.pipeline_mode<synchronous>, transform_indices = @transform_4, window_bounds = array<i64: 6, 16, 1>}, {pipeline_mode = #tpu.pipeline_mode<synchronous>, transform_indices = @transform_5, window_bounds = array<i64: 6, 16, 176>}, {pipeline_mode = #tpu.pipeline_mode<synchronous>, transform_indices = @transform_6, window_bounds = array<i64: 6, 16, 1>}, {transform_indices = @transform_7, window_bounds = array<i64: 1, 16, 256>}]} {
    %cst = arith.constant 0.000000e+00 : bf16
    %0 = vector.broadcast %cst : bf16 to vector<16x32xbf16>
    %c0 = arith.constant 0 : index
    %c96 = arith.constant 96 : index
    %1 = vector.load %arg9[%c0, %c96] : memref<16x512xbf16, #tpu.memory_space<vmem>>, vector<16x32xbf16>
    tpu.vector_store %arg9[%c0, %c96], %0 {strides = array<i32>} : memref<16x512xbf16, #tpu.memory_space<vmem>>, vector<16x32xbf16>,
    %cst_0 = arith.constant 0.000000e+00 : bf16
    %2 = vector.broadcast %cst_0 : bf16 to vector<16x32xbf16>
    %c0_1 = arith.constant 0 : index
    %c384 = arith.constant 384 : index
    %3 = vector.load %arg9[%c0_1, %c384] : memref<16x512xbf16, #tpu.memory_space<vmem>>, vector<16x32xbf16>
    tpu.vector_store %arg9[%c0_1, %c384], %2 {strides = array<i32>} : memref<16x512xbf16, #tpu.memory_space<vmem>>, vector<16x32xbf16>,
    %c0_2 = arith.constant 0 : index
    %c0_3 = arith.constant 0 : index
    %c0_4 = arith.constant 0 : index
    %4 = vector.load %arg1[%c0_2, %c0_3, %c0_4] : memref<1x16x256xf32, #tpu.memory_space<vmem>>, vector<1x16x256xf32>
    %5 = vector.shape_cast %4 : vector<1x16x256xf32> to vector<16x256xf32>
    %cst_5 = arith.constant 0.000000e+00 : f32
    %6 = vector.broadcast %cst_5 : f32 to vector<16x256xf32>
    %7 = arith.cmpf ogt, %5, %6 : vector<16x256xf32>
    %cst_6 = arith.constant 0.00999999977 : f32
    %8 = vector.broadcast %cst_6 : f32 to vector<16x256xf32>
    %9 = arith.mulf %8, %5 : vector<16x256xf32>
    %10 = arith.select %7, %5, %9 : vector<16x256xi1>, vector<16x256xf32>
    %11 = arith.truncf %10 : vector<16x256xf32> to vector<16x256xbf16>
    %c0_7 = arith.constant 0 : index
    %c128 = arith.constant 128 : index
    %12 = vector.load %arg9[%c0_7, %c128] : memref<16x512xbf16, #tpu.memory_space<vmem>>, vector<16x256xbf16>
    tpu.vector_store %arg9[%c0_7, %c128], %11 {strides = array<i32>} : memref<16x512xbf16, #tpu.memory_space<vmem>>, vector<16x256xbf16>,
    %c0_8 = arith.constant 0 : index
    %c127 = arith.constant 127 : index
    %13 = vector.load %arg9[%c0_8, %c127] : memref<16x512xbf16, #tpu.memory_space<vmem>>, vector<16x256xbf16>
    %c0_9 = arith.constant 0 : index
    %c0_10 = arith.constant 0 : index
    %14 = vector.load %arg10[%c0_9, %c0_10] : memref<176x256xbf16, #tpu.memory_space<vmem>>, vector<16x256xbf16>
    tpu.vector_store %arg10[%c0_9, %c0_10], %13 {strides = array<i32>} : memref<176x256xbf16, #tpu.memory_space<vmem>>, vector<16x256xbf16>,
    %c0_11 = arith.constant 0 : index
    %c128_12 = arith.constant 128 : index
    %15 = vector.load %arg9[%c0_11, %c128_12] : memref<16x512xbf16, #tpu.memory_space<vmem>>, vector<16x256xbf16>
    %c16 = arith.constant 16 : index
    %c0_13 = arith.constant 0 : index
    %16 = vector.load %arg10[%c16, %c0_13] : memref<176x256xbf16, #tpu.memory_space<vmem>>, vector<16x256xbf16>
    tpu.vector_store %arg10[%c16, %c0_13], %15 {strides = array<i32>} : memref<176x256xbf16, #tpu.memory_space<vmem>>, vector<16x256xbf16>,
    %c0_14 = arith.constant 0 : index
    %c129 = arith.constant 129 : index
    %17 = vector.load %arg9[%c0_14, %c129] : memref<16x512xbf16, #tpu.memory_space<vmem>>, vector<16x256xbf16>
    %c32 = arith.constant 32 : index
    %c0_15 = arith.constant 0 : index
    %18 = vector.load %arg10[%c32, %c0_15] : memref<176x256xbf16, #tpu.memory_space<vmem>>, vector<16x256xbf16>
    tpu.vector_store %arg10[%c32, %c0_15], %17 {strides = array<i32>} : memref<176x256xbf16, #tpu.memory_space<vmem>>, vector<16x256xbf16>,
    %c0_16 = arith.constant 0 : index
    %c0_17 = arith.constant 0 : index
    %c0_18 = arith.constant 0 : index
    %19 = vector.load %arg2[%c0_16, %c0_17, %c0_18] : memref<6x16x48xbf16, #tpu.memory_space<vmem>>, vector<1x16x48xbf16>
    %20 = vector.shape_cast %19 : vector<1x16x48xbf16> to vector<16x48xbf16>
    %c0_19 = arith.constant 0 : index
    %c0_20 = arith.constant 0 : index
    %21 = vector.load %arg10[%c0_19, %c0_20] : memref<176x256xbf16, #tpu.memory_space<vmem>>, vector<48x256xbf16>
    %cst_21 = arith.constant dense<0.000000e+00> : vector<16x256xf32>
    %22 = tpu.matmul %20, %21, %cst_21 {dimension_numbers = #tpu.dot_dimension_numbers<[1], [0], [0], [1], [0, 0, 1, 1], [], []>} : vector<16x48xbf16>, vector<48x256xbf16>, vector<16x256xf32> -> vector<16x256xf32>
    %c0_22 = arith.constant 0 : index
    %c0_23 = arith.constant 0 : index
    %c0_24 = arith.constant 0 : index
    %23 = vector.load %arg3[%c0_22, %c0_23, %c0_24] : memref<6x16x1xf32, #tpu.memory_space<vmem>>, vector<1x16x1xf32>
    %24 = vector.shape_cast %23 : vector<1x16x1xf32> to vector<16x1xf32>
    %25 = vector.broadcast %24 : vector<16x1xf32> to vector<16x256xf32>
    %26 = arith.addf %22, %25 : vector<16x256xf32>
    %cst_25 = arith.constant 0.000000e+00 : f32
    %27 = vector.broadcast %cst_25 : f32 to vector<16x256xf32>
    %28 = arith.cmpf ogt, %26, %27 : vector<16x256xf32>
    %cst_26 = arith.constant 0.00999999977 : f32
    %29 = vector.broadcast %cst_26 : f32 to vector<16x256xf32>
    %30 = arith.mulf %29, %26 : vector<16x256xf32>
    %31 = arith.select %28, %26, %30 : vector<16x256xi1>, vector<16x256xf32>
    %32 = arith.truncf %31 : vector<16x256xf32> to vector<16x256xbf16>
    %c0_27 = arith.constant 0 : index
    %c128_28 = arith.constant 128 : index
    %33 = vector.load %arg9[%c0_27, %c128_28] : memref<16x512xbf16, #tpu.memory_space<vmem>>, vector<16x256xbf16>
    tpu.vector_store %arg9[%c0_27, %c128_28], %32 {strides = array<i32>} : memref<16x512xbf16, #tpu.memory_space<vmem>>, vector<16x256xbf16>,
    %c0_29 = arith.constant 0 : index
    %c127_30 = arith.constant 127 : index
    %34 = vector.load %arg9[%c0_29, %c127_30] : memref<16x512xbf16, #tpu.memory_space<vmem>>, vector<16x256xbf16>
    %c0_31 = arith.constant 0 : index
    %c0_32 = arith.constant 0 : index
    %35 = vector.load %arg10[%c0_31, %c0_32] : memref<176x256xbf16, #tpu.memory_space<vmem>>, vector<16x256xbf16>
    tpu.vector_store %arg10[%c0_31, %c0_32], %34 {strides = array<i32>} : memref<176x256xbf16, #tpu.memory_space<vmem>>, vector<16x256xbf16>,
    %c0_33 = arith.constant 0 : index
    %c128_34 = arith.constant 128 : index
    %36 = vector.load %arg9[%c0_33, %c128_34] : memref<16x512xbf16, #tpu.memory_space<vmem>>, vector<16x256xbf16>
    %c16_35 = arith.constant 16 : index
    %c0_36 = arith.constant 0 : index
    %37 = vector.load %arg10[%c16_35, %c0_36] : memref<176x256xbf16, #tpu.memory_space<vmem>>, vector<16x256xbf16>
    tpu.vector_store %arg10[%c16_35, %c0_36], %36 {strides = array<i32>} : memref<176x256xbf16, #tpu.memory_space<vmem>>, vector<16x256xbf16>,
    %c0_37 = arith.constant 0 : index
    %c129_38 = arith.constant 129 : index
    %38 = vector.load %arg9[%c0_37, %c129_38] : memref<16x512xbf16, #tpu.memory_space<vmem>>, vector<16x256xbf16>
    %c32_39 = arith.constant 32 : index
    %c0_40 = arith.constant 0 : index
    %39 = vector.load %arg10[%c32_39, %c0_40] : memref<176x256xbf16, #tpu.memory_space<vmem>>, vector<16x256xbf16>
    tpu.vector_store %arg10[%c32_39, %c0_40], %38 {strides = array<i32>} : memref<176x256xbf16, #tpu.memory_space<vmem>>, vector<16x256xbf16>,
    %c1 = arith.constant 1 : index
    %c0_41 = arith.constant 0 : index
    %c0_42 = arith.constant 0 : index
    %40 = vector.load %arg2[%c1, %c0_41, %c0_42] : memref<6x16x48xbf16, #tpu.memory_space<vmem>>, vector<1x16x48xbf16>
    %41 = vector.shape_cast %40 : vector<1x16x48xbf16> to vector<16x48xbf16>
    %c0_43 = arith.constant 0 : index
    %c0_44 = arith.constant 0 : index
    %42 = vector.load %arg10[%c0_43, %c0_44] : memref<176x256xbf16, #tpu.memory_space<vmem>>, vector<48x256xbf16>
    %cst_45 = arith.constant dense<0.000000e+00> : vector<16x256xf32>
    %43 = tpu.matmul %41, %42, %cst_45 {dimension_numbers = #tpu.dot_dimension_numbers<[1], [0], [0], [1], [0, 0, 1, 1], [], []>} : vector<16x48xbf16>, vector<48x256xbf16>, vector<16x256xf32> -> vector<16x256xf32>
    %c1_46 = arith.constant 1 : index
    %c0_47 = arith.constant 0 : index
    %c0_48 = arith.constant 0 : index
    %44 = vector.load %arg3[%c1_46, %c0_47, %c0_48] : memref<6x16x1xf32, #tpu.memory_space<vmem>>, vector<1x16x1xf32>
    %45 = vector.shape_cast %44 : vector<1x16x1xf32> to vector<16x1xf32>
    %46 = vector.broadcast %45 : vector<16x1xf32> to vector<16x256xf32>
    %47 = arith.addf %43, %46 : vector<16x256xf32>
    %48 = arith.addf %5, %47 : vector<16x256xf32>
    %cst_49 = arith.constant 0.000000e+00 : f32
    %49 = vector.broadcast %cst_49 : f32 to vector<16x256xf32>
    %50 = arith.cmpf ogt, %48, %49 : vector<16x256xf32>
    %cst_50 = arith.constant 0.00999999977 : f32
    %51 = vector.broadcast %cst_50 : f32 to vector<16x256xf32>
    %52 = arith.mulf %51, %48 : vector<16x256xf32>
    %53 = arith.select %50, %48, %52 : vector<16x256xi1>, vector<16x256xf32>
    %54 = arith.truncf %53 : vector<16x256xf32> to vector<16x256xbf16>
    %c0_51 = arith.constant 0 : index
    %c128_52 = arith.constant 128 : index
    %55 = vector.load %arg9[%c0_51, %c128_52] : memref<16x512xbf16, #tpu.memory_space<vmem>>, vector<16x256xbf16>
    tpu.vector_store %arg9[%c0_51, %c128_52], %54 {strides = array<i32>} : memref<16x512xbf16, #tpu.memory_space<vmem>>, vector<16x256xbf16>,
    %c0_53 = arith.constant 0 : index
    %c127_54 = arith.constant 127 : index
    %56 = vector.load %arg9[%c0_53, %c127_54] : memref<16x512xbf16, #tpu.memory_space<vmem>>, vector<16x256xbf16>
    %c0_55 = arith.constant 0 : index
    %c0_56 = arith.constant 0 : index
    %57 = vector.load %arg10[%c0_55, %c0_56] : memref<176x256xbf16, #tpu.memory_space<vmem>>, vector<16x256xbf16>
    tpu.vector_store %arg10[%c0_55, %c0_56], %56 {strides = array<i32>} : memref<176x256xbf16, #tpu.memory_space<vmem>>, vector<16x256xbf16>,
    %c0_57 = arith.constant 0 : index
    %c128_58 = arith.constant 128 : index
    %58 = vector.load %arg9[%c0_57, %c128_58] : memref<16x512xbf16, #tpu.memory_space<vmem>>, vector<16x256xbf16>
    %c16_59 = arith.constant 16 : index
    %c0_60 = arith.constant 0 : index
    %59 = vector.load %arg10[%c16_59, %c0_60] : memref<176x256xbf16, #tpu.memory_space<vmem>>, vector<16x256xbf16>
    tpu.vector_store %arg10[%c16_59, %c0_60], %58 {strides = array<i32>} : memref<176x256xbf16, #tpu.memory_space<vmem>>, vector<16x256xbf16>,
    %c0_61 = arith.constant 0 : index
    %c129_62 = arith.constant 129 : index
    %60 = vector.load %arg9[%c0_61, %c129_62] : memref<16x512xbf16, #tpu.memory_space<vmem>>, vector<16x256xbf16>
    %c32_63 = arith.constant 32 : index
    %c0_64 = arith.constant 0 : index
    %61 = vector.load %arg10[%c32_63, %c0_64] : memref<176x256xbf16, #tpu.memory_space<vmem>>, vector<16x256xbf16>
    tpu.vector_store %arg10[%c32_63, %c0_64], %60 {strides = array<i32>} : memref<176x256xbf16, #tpu.memory_space<vmem>>, vector<16x256xbf16>,
    %c2 = arith.constant 2 : index
    %c0_65 = arith.constant 0 : index
    %c0_66 = arith.constant 0 : index
    %62 = vector.load %arg2[%c2, %c0_65, %c0_66] : memref<6x16x48xbf16, #tpu.memory_space<vmem>>, vector<1x16x48xbf16>
    %63 = vector.shape_cast %62 : vector<1x16x48xbf16> to vector<16x48xbf16>
    %c0_67 = arith.constant 0 : index
    %c0_68 = arith.constant 0 : index
    %64 = vector.load %arg10[%c0_67, %c0_68] : memref<176x256xbf16, #tpu.memory_space<vmem>>, vector<48x256xbf16>
    %cst_69 = arith.constant dense<0.000000e+00> : vector<16x256xf32>
    %65 = tpu.matmul %63, %64, %cst_69 {dimension_numbers = #tpu.dot_dimension_numbers<[1], [0], [0], [1], [0, 0, 1, 1], [], []>} : vector<16x48xbf16>, vector<48x256xbf16>, vector<16x256xf32> -> vector<16x256xf32>
    %c2_70 = arith.constant 2 : index
    %c0_71 = arith.constant 0 : index
    %c0_72 = arith.constant 0 : index
    %66 = vector.load %arg3[%c2_70, %c0_71, %c0_72] : memref<6x16x1xf32, #tpu.memory_space<vmem>>, vector<1x16x1xf32>
    %67 = vector.shape_cast %66 : vector<1x16x1xf32> to vector<16x1xf32>
    %68 = vector.broadcast %67 : vector<16x1xf32> to vector<16x256xf32>
    %69 = arith.addf %65, %68 : vector<16x256xf32>
    %cst_73 = arith.constant 0.000000e+00 : f32
    %70 = vector.broadcast %cst_73 : f32 to vector<16x256xf32>
    %71 = arith.cmpf ogt, %69, %70 : vector<16x256xf32>
    %cst_74 = arith.constant 0.00999999977 : f32
    %72 = vector.broadcast %cst_74 : f32 to vector<16x256xf32>
    %73 = arith.mulf %72, %69 : vector<16x256xf32>
    %74 = arith.select %71, %69, %73 : vector<16x256xi1>, vector<16x256xf32>
    %75 = arith.truncf %74 : vector<16x256xf32> to vector<16x256xbf16>
    %c0_75 = arith.constant 0 : index
    %c128_76 = arith.constant 128 : index
    %76 = vector.load %arg9[%c0_75, %c128_76] : memref<16x512xbf16, #tpu.memory_space<vmem>>, vector<16x256xbf16>
    tpu.vector_store %arg9[%c0_75, %c128_76], %75 {strides = array<i32>} : memref<16x512xbf16, #tpu.memory_space<vmem>>, vector<16x256xbf16>,
    %c0_77 = arith.constant 0 : index
    %c127_78 = arith.constant 127 : index
    %77 = vector.load %arg9[%c0_77, %c127_78] : memref<16x512xbf16, #tpu.memory_space<vmem>>, vector<16x256xbf16>
    %c0_79 = arith.constant 0 : index
    %c0_80 = arith.constant 0 : index
    %78 = vector.load %arg10[%c0_79, %c0_80] : memref<176x256xbf16, #tpu.memory_space<vmem>>, vector<16x256xbf16>
    tpu.vector_store %arg10[%c0_79, %c0_80], %77 {strides = array<i32>} : memref<176x256xbf16, #tpu.memory_space<vmem>>, vector<16x256xbf16>,
    %c0_81 = arith.constant 0 : index
    %c128_82 = arith.constant 128 : index
    %79 = vector.load %arg9[%c0_81, %c128_82] : memref<16x512xbf16, #tpu.memory_space<vmem>>, vector<16x256xbf16>
    %c16_83 = arith.constant 16 : index
    %c0_84 = arith.constant 0 : index
    %80 = vector.load %arg10[%c16_83, %c0_84] : memref<176x256xbf16, #tpu.memory_space<vmem>>, vector<16x256xbf16>
    tpu.vector_store %arg10[%c16_83, %c0_84], %79 {strides = array<i32>} : memref<176x256xbf16, #tpu.memory_space<vmem>>, vector<16x256xbf16>,
    %c0_85 = arith.constant 0 : index
    %c129_86 = arith.constant 129 : index
    %81 = vector.load %arg9[%c0_85, %c129_86] : memref<16x512xbf16, #tpu.memory_space<vmem>>, vector<16x256xbf16>
    %c32_87 = arith.constant 32 : index
    %c0_88 = arith.constant 0 : index
    %82 = vector.load %arg10[%c32_87, %c0_88] : memref<176x256xbf16, #tpu.memory_space<vmem>>, vector<16x256xbf16>
    tpu.vector_store %arg10[%c32_87, %c0_88], %81 {strides = array<i32>} : memref<176x256xbf16, #tpu.memory_space<vmem>>, vector<16x256xbf16>,
    %c3 = arith.constant 3 : index
    %c0_89 = arith.constant 0 : index
    %c0_90 = arith.constant 0 : index
    %83 = vector.load %arg2[%c3, %c0_89, %c0_90] : memref<6x16x48xbf16, #tpu.memory_space<vmem>>, vector<1x16x48xbf16>
    %84 = vector.shape_cast %83 : vector<1x16x48xbf16> to vector<16x48xbf16>
    %c0_91 = arith.constant 0 : index
    %c0_92 = arith.constant 0 : index
    %85 = vector.load %arg10[%c0_91, %c0_92] : memref<176x256xbf16, #tpu.memory_space<vmem>>, vector<48x256xbf16>
    %cst_93 = arith.constant dense<0.000000e+00> : vector<16x256xf32>
    %86 = tpu.matmul %84, %85, %cst_93 {dimension_numbers = #tpu.dot_dimension_numbers<[1], [0], [0], [1], [0, 0, 1, 1], [], []>} : vector<16x48xbf16>, vector<48x256xbf16>, vector<16x256xf32> -> vector<16x256xf32>
    %c3_94 = arith.constant 3 : index
    %c0_95 = arith.constant 0 : index
    %c0_96 = arith.constant 0 : index
    %87 = vector.load %arg3[%c3_94, %c0_95, %c0_96] : memref<6x16x1xf32, #tpu.memory_space<vmem>>, vector<1x16x1xf32>
    %88 = vector.shape_cast %87 : vector<1x16x1xf32> to vector<16x1xf32>
    %89 = vector.broadcast %88 : vector<16x1xf32> to vector<16x256xf32>
    %90 = arith.addf %86, %89 : vector<16x256xf32>
    %91 = arith.addf %48, %90 : vector<16x256xf32>
    %cst_97 = arith.constant 0.000000e+00 : f32
    %92 = vector.broadcast %cst_97 : f32 to vector<16x256xf32>
    %93 = arith.cmpf ogt, %91, %92 : vector<16x256xf32>
    %cst_98 = arith.constant 0.00999999977 : f32
    %94 = vector.broadcast %cst_98 : f32 to vector<16x256xf32>
    %95 = arith.mulf %94, %91 : vector<16x256xf32>
    %96 = arith.select %93, %91, %95 : vector<16x256xi1>, vector<16x256xf32>
    %97 = arith.truncf %96 : vector<16x256xf32> to vector<16x256xbf16>
    %c0_99 = arith.constant 0 : index
    %c128_100 = arith.constant 128 : index
    %98 = vector.load %arg9[%c0_99, %c128_100] : memref<16x512xbf16, #tpu.memory_space<vmem>>, vector<16x256xbf16>
    tpu.vector_store %arg9[%c0_99, %c128_100], %97 {strides = array<i32>} : memref<16x512xbf16, #tpu.memory_space<vmem>>, vector<16x256xbf16>,
    %c0_101 = arith.constant 0 : index
    %c127_102 = arith.constant 127 : index
    %99 = vector.load %arg9[%c0_101, %c127_102] : memref<16x512xbf16, #tpu.memory_space<vmem>>, vector<16x256xbf16>
    %c0_103 = arith.constant 0 : index
    %c0_104 = arith.constant 0 : index
    %100 = vector.load %arg10[%c0_103, %c0_104] : memref<176x256xbf16, #tpu.memory_space<vmem>>, vector<16x256xbf16>
    tpu.vector_store %arg10[%c0_103, %c0_104], %99 {strides = array<i32>} : memref<176x256xbf16, #tpu.memory_space<vmem>>, vector<16x256xbf16>,
    %c0_105 = arith.constant 0 : index
    %c128_106 = arith.constant 128 : index
    %101 = vector.load %arg9[%c0_105, %c128_106] : memref<16x512xbf16, #tpu.memory_space<vmem>>, vector<16x256xbf16>
    %c16_107 = arith.constant 16 : index
    %c0_108 = arith.constant 0 : index
    %102 = vector.load %arg10[%c16_107, %c0_108] : memref<176x256xbf16, #tpu.memory_space<vmem>>, vector<16x256xbf16>
    tpu.vector_store %arg10[%c16_107, %c0_108], %101 {strides = array<i32>} : memref<176x256xbf16, #tpu.memory_space<vmem>>, vector<16x256xbf16>,
    %c0_109 = arith.constant 0 : index
    %c129_110 = arith.constant 129 : index
    %103 = vector.load %arg9[%c0_109, %c129_110] : memref<16x512xbf16, #tpu.memory_space<vmem>>, vector<16x256xbf16>
    %c32_111 = arith.constant 32 : index
    %c0_112 = arith.constant 0 : index
    %104 = vector.load %arg10[%c32_111, %c0_112] : memref<176x256xbf16, #tpu.memory_space<vmem>>, vector<16x256xbf16>
    tpu.vector_store %arg10[%c32_111, %c0_112], %103 {strides = array<i32>} : memref<176x256xbf16, #tpu.memory_space<vmem>>, vector<16x256xbf16>,
    %c4 = arith.constant 4 : index
    %c0_113 = arith.constant 0 : index
    %c0_114 = arith.constant 0 : index
    %105 = vector.load %arg2[%c4, %c0_113, %c0_114] : memref<6x16x48xbf16, #tpu.memory_space<vmem>>, vector<1x16x48xbf16>
    %106 = vector.shape_cast %105 : vector<1x16x48xbf16> to vector<16x48xbf16>
    %c0_115 = arith.constant 0 : index
    %c0_116 = arith.constant 0 : index
    %107 = vector.load %arg10[%c0_115, %c0_116] : memref<176x256xbf16, #tpu.memory_space<vmem>>, vector<48x256xbf16>
    %cst_117 = arith.constant dense<0.000000e+00> : vector<16x256xf32>
    %108 = tpu.matmul %106, %107, %cst_117 {dimension_numbers = #tpu.dot_dimension_numbers<[1], [0], [0], [1], [0, 0, 1, 1], [], []>} : vector<16x48xbf16>, vector<48x256xbf16>, vector<16x256xf32> -> vector<16x256xf32>
    %c4_118 = arith.constant 4 : index
    %c0_119 = arith.constant 0 : index
    %c0_120 = arith.constant 0 : index
    %109 = vector.load %arg3[%c4_118, %c0_119, %c0_120] : memref<6x16x1xf32, #tpu.memory_space<vmem>>, vector<1x16x1xf32>
    %110 = vector.shape_cast %109 : vector<1x16x1xf32> to vector<16x1xf32>
    %111 = vector.broadcast %110 : vector<16x1xf32> to vector<16x256xf32>
    %112 = arith.addf %108, %111 : vector<16x256xf32>
    %cst_121 = arith.constant 0.000000e+00 : f32
    %113 = vector.broadcast %cst_121 : f32 to vector<16x256xf32>
    %114 = arith.cmpf ogt, %112, %113 : vector<16x256xf32>
    %cst_122 = arith.constant 0.00999999977 : f32
    %115 = vector.broadcast %cst_122 : f32 to vector<16x256xf32>
    %116 = arith.mulf %115, %112 : vector<16x256xf32>
    %117 = arith.select %114, %112, %116 : vector<16x256xi1>, vector<16x256xf32>
    %118 = arith.truncf %117 : vector<16x256xf32> to vector<16x256xbf16>
    %c0_123 = arith.constant 0 : index
    %c128_124 = arith.constant 128 : index
    %119 = vector.load %arg9[%c0_123, %c128_124] : memref<16x512xbf16, #tpu.memory_space<vmem>>, vector<16x256xbf16>
    tpu.vector_store %arg9[%c0_123, %c128_124], %118 {strides = array<i32>} : memref<16x512xbf16, #tpu.memory_space<vmem>>, vector<16x256xbf16>,
    %c0_125 = arith.constant 0 : index
    %c127_126 = arith.constant 127 : index
    %120 = vector.load %arg9[%c0_125, %c127_126] : memref<16x512xbf16, #tpu.memory_space<vmem>>, vector<16x256xbf16>
    %c0_127 = arith.constant 0 : index
    %c0_128 = arith.constant 0 : index
    %121 = vector.load %arg10[%c0_127, %c0_128] : memref<176x256xbf16, #tpu.memory_space<vmem>>, vector<16x256xbf16>
    tpu.vector_store %arg10[%c0_127, %c0_128], %120 {strides = array<i32>} : memref<176x256xbf16, #tpu.memory_space<vmem>>, vector<16x256xbf16>,
    %c0_129 = arith.constant 0 : index
    %c128_130 = arith.constant 128 : index
    %122 = vector.load %arg9[%c0_129, %c128_130] : memref<16x512xbf16, #tpu.memory_space<vmem>>, vector<16x256xbf16>
    %c16_131 = arith.constant 16 : index
    %c0_132 = arith.constant 0 : index
    %123 = vector.load %arg10[%c16_131, %c0_132] : memref<176x256xbf16, #tpu.memory_space<vmem>>, vector<16x256xbf16>
    tpu.vector_store %arg10[%c16_131, %c0_132], %122 {strides = array<i32>} : memref<176x256xbf16, #tpu.memory_space<vmem>>, vector<16x256xbf16>,
    %c0_133 = arith.constant 0 : index
    %c129_134 = arith.constant 129 : index
    %124 = vector.load %arg9[%c0_133, %c129_134] : memref<16x512xbf16, #tpu.memory_space<vmem>>, vector<16x256xbf16>
    %c32_135 = arith.constant 32 : index
    %c0_136 = arith.constant 0 : index
    %125 = vector.load %arg10[%c32_135, %c0_136] : memref<176x256xbf16, #tpu.memory_space<vmem>>, vector<16x256xbf16>
    tpu.vector_store %arg10[%c32_135, %c0_136], %124 {strides = array<i32>} : memref<176x256xbf16, #tpu.memory_space<vmem>>, vector<16x256xbf16>,
    %c5 = arith.constant 5 : index
    %c0_137 = arith.constant 0 : index
    %c0_138 = arith.constant 0 : index
    %126 = vector.load %arg2[%c5, %c0_137, %c0_138] : memref<6x16x48xbf16, #tpu.memory_space<vmem>>, vector<1x16x48xbf16>
    %127 = vector.shape_cast %126 : vector<1x16x48xbf16> to vector<16x48xbf16>
    %c0_139 = arith.constant 0 : index
    %c0_140 = arith.constant 0 : index
    %128 = vector.load %arg10[%c0_139, %c0_140] : memref<176x256xbf16, #tpu.memory_space<vmem>>, vector<48x256xbf16>
    %cst_141 = arith.constant dense<0.000000e+00> : vector<16x256xf32>
    %129 = tpu.matmul %127, %128, %cst_141 {dimension_numbers = #tpu.dot_dimension_numbers<[1], [0], [0], [1], [0, 0, 1, 1], [], []>} : vector<16x48xbf16>, vector<48x256xbf16>, vector<16x256xf32> -> vector<16x256xf32>
    %c5_142 = arith.constant 5 : index
    %c0_143 = arith.constant 0 : index
    %c0_144 = arith.constant 0 : index
    %130 = vector.load %arg3[%c5_142, %c0_143, %c0_144] : memref<6x16x1xf32, #tpu.memory_space<vmem>>, vector<1x16x1xf32>
    %131 = vector.shape_cast %130 : vector<1x16x1xf32> to vector<16x1xf32>
    %132 = vector.broadcast %131 : vector<16x1xf32> to vector<16x256xf32>
    %133 = arith.addf %129, %132 : vector<16x256xf32>
    %134 = arith.addf %91, %133 : vector<16x256xf32>
    %cst_145 = arith.constant 0.000000e+00 : f32
    %135 = vector.broadcast %cst_145 : f32 to vector<16x256xf32>
    %136 = arith.cmpf ogt, %5, %135 : vector<16x256xf32>
    %cst_146 = arith.constant 0.00999999977 : f32
    %137 = vector.broadcast %cst_146 : f32 to vector<16x256xf32>
    %138 = arith.mulf %137, %5 : vector<16x256xf32>
    %139 = arith.select %136, %5, %138 : vector<16x256xi1>, vector<16x256xf32>
    %140 = arith.truncf %139 : vector<16x256xf32> to vector<16x256xbf16>
    %c0_147 = arith.constant 0 : index
    %c128_148 = arith.constant 128 : index
    %141 = vector.load %arg9[%c0_147, %c128_148] : memref<16x512xbf16, #tpu.memory_space<vmem>>, vector<16x256xbf16>
    tpu.vector_store %arg9[%c0_147, %c128_148], %140 {strides = array<i32>} : memref<16x512xbf16, #tpu.memory_space<vmem>>, vector<16x256xbf16>,
    %c0_149 = arith.constant 0 : index
    %c119 = arith.constant 119 : index
    %142 = vector.load %arg9[%c0_149, %c119] : memref<16x512xbf16, #tpu.memory_space<vmem>>, vector<16x256xbf16>
    %c0_150 = arith.constant 0 : index
    %c0_151 = arith.constant 0 : index
    %143 = vector.load %arg10[%c0_150, %c0_151] : memref<176x256xbf16, #tpu.memory_space<vmem>>, vector<16x256xbf16>
    tpu.vector_store %arg10[%c0_150, %c0_151], %142 {strides = array<i32>} : memref<176x256xbf16, #tpu.memory_space<vmem>>, vector<16x256xbf16>,
    %c0_152 = arith.constant 0 : index
    %c122 = arith.constant 122 : index
    %144 = vector.load %arg9[%c0_152, %c122] : memref<16x512xbf16, #tpu.memory_space<vmem>>, vector<16x256xbf16>
    %c16_153 = arith.constant 16 : index
    %c0_154 = arith.constant 0 : index
    %145 = vector.load %arg10[%c16_153, %c0_154] : memref<176x256xbf16, #tpu.memory_space<vmem>>, vector<16x256xbf16>
    tpu.vector_store %arg10[%c16_153, %c0_154], %144 {strides = array<i32>} : memref<176x256xbf16, #tpu.memory_space<vmem>>, vector<16x256xbf16>,
    %c0_155 = arith.constant 0 : index
    %c125 = arith.constant 125 : index
    %146 = vector.load %arg9[%c0_155, %c125] : memref<16x512xbf16, #tpu.memory_space<vmem>>, vector<16x256xbf16>
    %c32_156 = arith.constant 32 : index
    %c0_157 = arith.constant 0 : index
    %147 = vector.load %arg10[%c32_156, %c0_157] : memref<176x256xbf16, #tpu.memory_space<vmem>>, vector<16x256xbf16>
    tpu.vector_store %arg10[%c32_156, %c0_157], %146 {strides = array<i32>} : memref<176x256xbf16, #tpu.memory_space<vmem>>, vector<16x256xbf16>,
    %c0_158 = arith.constant 0 : index
    %c128_159 = arith.constant 128 : index
    %148 = vector.load %arg9[%c0_158, %c128_159] : memref<16x512xbf16, #tpu.memory_space<vmem>>, vector<16x256xbf16>
    %c48 = arith.constant 48 : index
    %c0_160 = arith.constant 0 : index
    %149 = vector.load %arg10[%c48, %c0_160] : memref<176x256xbf16, #tpu.memory_space<vmem>>, vector<16x256xbf16>
    tpu.vector_store %arg10[%c48, %c0_160], %148 {strides = array<i32>} : memref<176x256xbf16, #tpu.memory_space<vmem>>, vector<16x256xbf16>,
    %c0_161 = arith.constant 0 : index
    %c131 = arith.constant 131 : index
    %150 = vector.load %arg9[%c0_161, %c131] : memref<16x512xbf16, #tpu.memory_space<vmem>>, vector<16x256xbf16>
    %c64 = arith.constant 64 : index
    %c0_162 = arith.constant 0 : index
    %151 = vector.load %arg10[%c64, %c0_162] : memref<176x256xbf16, #tpu.memory_space<vmem>>, vector<16x256xbf16>
    tpu.vector_store %arg10[%c64, %c0_162], %150 {strides = array<i32>} : memref<176x256xbf16, #tpu.memory_space<vmem>>, vector<16x256xbf16>,
    %c0_163 = arith.constant 0 : index
    %c134 = arith.constant 134 : index
    %152 = vector.load %arg9[%c0_163, %c134] : memref<16x512xbf16, #tpu.memory_space<vmem>>, vector<16x256xbf16>
    %c80 = arith.constant 80 : index
    %c0_164 = arith.constant 0 : index
    %153 = vector.load %arg10[%c80, %c0_164] : memref<176x256xbf16, #tpu.memory_space<vmem>>, vector<16x256xbf16>
    tpu.vector_store %arg10[%c80, %c0_164], %152 {strides = array<i32>} : memref<176x256xbf16, #tpu.memory_space<vmem>>, vector<16x256xbf16>,
    %c0_165 = arith.constant 0 : index
    %c137 = arith.constant 137 : index
    %154 = vector.load %arg9[%c0_165, %c137] : memref<16x512xbf16, #tpu.memory_space<vmem>>, vector<16x256xbf16>
    %c96_166 = arith.constant 96 : index
    %c0_167 = arith.constant 0 : index
    %155 = vector.load %arg10[%c96_166, %c0_167] : memref<176x256xbf16, #tpu.memory_space<vmem>>, vector<16x256xbf16>
    tpu.vector_store %arg10[%c96_166, %c0_167], %154 {strides = array<i32>} : memref<176x256xbf16, #tpu.memory_space<vmem>>, vector<16x256xbf16>,
    %c0_168 = arith.constant 0 : index
    %c0_169 = arith.constant 0 : index
    %c0_170 = arith.constant 0 : index
    %156 = vector.load %arg4[%c0_168, %c0_169, %c0_170] : memref<6x16x112xbf16, #tpu.memory_space<vmem>>, vector<1x16x112xbf16>
    %157 = vector.shape_cast %156 : vector<1x16x112xbf16> to vector<16x112xbf16>
    %c0_171 = arith.constant 0 : index
    %c0_172 = arith.constant 0 : index
    %158 = vector.load %arg10[%c0_171, %c0_172] : memref<176x256xbf16, #tpu.memory_space<vmem>>, vector<112x256xbf16>
    %cst_173 = arith.constant dense<0.000000e+00> : vector<16x256xf32>
    %159 = tpu.matmul %157, %158, %cst_173 {dimension_numbers = #tpu.dot_dimension_numbers<[1], [0], [0], [1], [0, 0, 1, 1], [], []>} : vector<16x112xbf16>, vector<112x256xbf16>, vector<16x256xf32> -> vector<16x256xf32>
    %c0_174 = arith.constant 0 : index
    %c0_175 = arith.constant 0 : index
    %c0_176 = arith.constant 0 : index
    %160 = vector.load %arg5[%c0_174, %c0_175, %c0_176] : memref<6x16x1xf32, #tpu.memory_space<vmem>>, vector<1x16x1xf32>
    %161 = vector.shape_cast %160 : vector<1x16x1xf32> to vector<16x1xf32>
    %162 = vector.broadcast %161 : vector<16x1xf32> to vector<16x256xf32>
    %163 = arith.addf %159, %162 : vector<16x256xf32>
    %cst_177 = arith.constant 0.000000e+00 : f32
    %164 = vector.broadcast %cst_177 : f32 to vector<16x256xf32>
    %165 = arith.cmpf ogt, %163, %164 : vector<16x256xf32>
    %cst_178 = arith.constant 0.00999999977 : f32
    %166 = vector.broadcast %cst_178 : f32 to vector<16x256xf32>
    %167 = arith.mulf %166, %163 : vector<16x256xf32>
    %168 = arith.select %165, %163, %167 : vector<16x256xi1>, vector<16x256xf32>
    %169 = arith.truncf %168 : vector<16x256xf32> to vector<16x256xbf16>
    %c0_179 = arith.constant 0 : index
    %c128_180 = arith.constant 128 : index
    %170 = vector.load %arg9[%c0_179, %c128_180] : memref<16x512xbf16, #tpu.memory_space<vmem>>, vector<16x256xbf16>
    tpu.vector_store %arg9[%c0_179, %c128_180], %169 {strides = array<i32>} : memref<16x512xbf16, #tpu.memory_space<vmem>>, vector<16x256xbf16>,
    %c0_181 = arith.constant 0 : index
    %c125_182 = arith.constant 125 : index
    %171 = vector.load %arg9[%c0_181, %c125_182] : memref<16x512xbf16, #tpu.memory_space<vmem>>, vector<16x256xbf16>
    %c0_183 = arith.constant 0 : index
    %c0_184 = arith.constant 0 : index
    %172 = vector.load %arg10[%c0_183, %c0_184] : memref<176x256xbf16, #tpu.memory_space<vmem>>, vector<16x256xbf16>
    tpu.vector_store %arg10[%c0_183, %c0_184], %171 {strides = array<i32>} : memref<176x256xbf16, #tpu.memory_space<vmem>>, vector<16x256xbf16>,
    %c0_185 = arith.constant 0 : index
    %c126 = arith.constant 126 : index
    %173 = vector.load %arg9[%c0_185, %c126] : memref<16x512xbf16, #tpu.memory_space<vmem>>, vector<16x256xbf16>
    %c16_186 = arith.constant 16 : index
    %c0_187 = arith.constant 0 : index
    %174 = vector.load %arg10[%c16_186, %c0_187] : memref<176x256xbf16, #tpu.memory_space<vmem>>, vector<16x256xbf16>
    tpu.vector_store %arg10[%c16_186, %c0_187], %173 {strides = array<i32>} : memref<176x256xbf16, #tpu.memory_space<vmem>>, vector<16x256xbf16>,
    %c0_188 = arith.constant 0 : index
    %c127_189 = arith.constant 127 : index
    %175 = vector.load %arg9[%c0_188, %c127_189] : memref<16x512xbf16, #tpu.memory_space<vmem>>, vector<16x256xbf16>
    %c32_190 = arith.constant 32 : index
    %c0_191 = arith.constant 0 : index
    %176 = vector.load %arg10[%c32_190, %c0_191] : memref<176x256xbf16, #tpu.memory_space<vmem>>, vector<16x256xbf16>
    tpu.vector_store %arg10[%c32_190, %c0_191], %175 {strides = array<i32>} : memref<176x256xbf16, #tpu.memory_space<vmem>>, vector<16x256xbf16>,
    %c0_192 = arith.constant 0 : index
    %c128_193 = arith.constant 128 : index
    %177 = vector.load %arg9[%c0_192, %c128_193] : memref<16x512xbf16, #tpu.memory_space<vmem>>, vector<16x256xbf16>
    %c48_194 = arith.constant 48 : index
    %c0_195 = arith.constant 0 : index
    %178 = vector.load %arg10[%c48_194, %c0_195] : memref<176x256xbf16, #tpu.memory_space<vmem>>, vector<16x256xbf16>
    tpu.vector_store %arg10[%c48_194, %c0_195], %177 {strides = array<i32>} : memref<176x256xbf16, #tpu.memory_space<vmem>>, vector<16x256xbf16>,
    %c0_196 = arith.constant 0 : index
    %c129_197 = arith.constant 129 : index
    %179 = vector.load %arg9[%c0_196, %c129_197] : memref<16x512xbf16, #tpu.memory_space<vmem>>, vector<16x256xbf16>
    %c64_198 = arith.constant 64 : index
    %c0_199 = arith.constant 0 : index
    %180 = vector.load %arg10[%c64_198, %c0_199] : memref<176x256xbf16, #tpu.memory_space<vmem>>, vector<16x256xbf16>
    tpu.vector_store %arg10[%c64_198, %c0_199], %179 {strides = array<i32>} : memref<176x256xbf16, #tpu.memory_space<vmem>>, vector<16x256xbf16>,
    %c0_200 = arith.constant 0 : index
    %c130 = arith.constant 130 : index
    %181 = vector.load %arg9[%c0_200, %c130] : memref<16x512xbf16, #tpu.memory_space<vmem>>, vector<16x256xbf16>
    %c80_201 = arith.constant 80 : index
    %c0_202 = arith.constant 0 : index
    %182 = vector.load %arg10[%c80_201, %c0_202] : memref<176x256xbf16, #tpu.memory_space<vmem>>, vector<16x256xbf16>
    tpu.vector_store %arg10[%c80_201, %c0_202], %181 {strides = array<i32>} : memref<176x256xbf16, #tpu.memory_space<vmem>>, vector<16x256xbf16>,
    %c0_203 = arith.constant 0 : index
    %c131_204 = arith.constant 131 : index
    %183 = vector.load %arg9[%c0_203, %c131_204] : memref<16x512xbf16, #tpu.memory_space<vmem>>, vector<16x256xbf16>
    %c96_205 = arith.constant 96 : index
    %c0_206 = arith.constant 0 : index
    %184 = vector.load %arg10[%c96_205, %c0_206] : memref<176x256xbf16, #tpu.memory_space<vmem>>, vector<16x256xbf16>
    tpu.vector_store %arg10[%c96_205, %c0_206], %183 {strides = array<i32>} : memref<176x256xbf16, #tpu.memory_space<vmem>>, vector<16x256xbf16>,
    %c1_207 = arith.constant 1 : index
    %c0_208 = arith.constant 0 : index
    %c0_209 = arith.constant 0 : index
    %185 = vector.load %arg4[%c1_207, %c0_208, %c0_209] : memref<6x16x112xbf16, #tpu.memory_space<vmem>>, vector<1x16x112xbf16>
    %186 = vector.shape_cast %185 : vector<1x16x112xbf16> to vector<16x112xbf16>
    %c0_210 = arith.constant 0 : index
    %c0_211 = arith.constant 0 : index
    %187 = vector.load %arg10[%c0_210, %c0_211] : memref<176x256xbf16, #tpu.memory_space<vmem>>, vector<112x256xbf16>
    %cst_212 = arith.constant dense<0.000000e+00> : vector<16x256xf32>
    %188 = tpu.matmul %186, %187, %cst_212 {dimension_numbers = #tpu.dot_dimension_numbers<[1], [0], [0], [1], [0, 0, 1, 1], [], []>} : vector<16x112xbf16>, vector<112x256xbf16>, vector<16x256xf32> -> vector<16x256xf32>
    %c1_213 = arith.constant 1 : index
    %c0_214 = arith.constant 0 : index
    %c0_215 = arith.constant 0 : index
    %189 = vector.load %arg5[%c1_213, %c0_214, %c0_215] : memref<6x16x1xf32, #tpu.memory_space<vmem>>, vector<1x16x1xf32>
    %190 = vector.shape_cast %189 : vector<1x16x1xf32> to vector<16x1xf32>
    %191 = vector.broadcast %190 : vector<16x1xf32> to vector<16x256xf32>
    %192 = arith.addf %188, %191 : vector<16x256xf32>
    %193 = arith.addf %5, %192 : vector<16x256xf32>
    %cst_216 = arith.constant 0.000000e+00 : f32
    %194 = vector.broadcast %cst_216 : f32 to vector<16x256xf32>
    %195 = arith.cmpf ogt, %193, %194 : vector<16x256xf32>
    %cst_217 = arith.constant 0.00999999977 : f32
    %196 = vector.broadcast %cst_217 : f32 to vector<16x256xf32>
    %197 = arith.mulf %196, %193 : vector<16x256xf32>
    %198 = arith.select %195, %193, %197 : vector<16x256xi1>, vector<16x256xf32>
    %199 = arith.truncf %198 : vector<16x256xf32> to vector<16x256xbf16>
    %c0_218 = arith.constant 0 : index
    %c128_219 = arith.constant 128 : index
    %200 = vector.load %arg9[%c0_218, %c128_219] : memref<16x512xbf16, #tpu.memory_space<vmem>>, vector<16x256xbf16>
    tpu.vector_store %arg9[%c0_218, %c128_219], %199 {strides = array<i32>} : memref<16x512xbf16, #tpu.memory_space<vmem>>, vector<16x256xbf16>,
    %c0_220 = arith.constant 0 : index
    %c119_221 = arith.constant 119 : index
    %201 = vector.load %arg9[%c0_220, %c119_221] : memref<16x512xbf16, #tpu.memory_space<vmem>>, vector<16x256xbf16>
    %c0_222 = arith.constant 0 : index
    %c0_223 = arith.constant 0 : index
    %202 = vector.load %arg10[%c0_222, %c0_223] : memref<176x256xbf16, #tpu.memory_space<vmem>>, vector<16x256xbf16>
    tpu.vector_store %arg10[%c0_222, %c0_223], %201 {strides = array<i32>} : memref<176x256xbf16, #tpu.memory_space<vmem>>, vector<16x256xbf16>,
    %c0_224 = arith.constant 0 : index
    %c122_225 = arith.constant 122 : index
    %203 = vector.load %arg9[%c0_224, %c122_225] : memref<16x512xbf16, #tpu.memory_space<vmem>>, vector<16x256xbf16>
    %c16_226 = arith.constant 16 : index
    %c0_227 = arith.constant 0 : index
    %204 = vector.load %arg10[%c16_226, %c0_227] : memref<176x256xbf16, #tpu.memory_space<vmem>>, vector<16x256xbf16>
    tpu.vector_store %arg10[%c16_226, %c0_227], %203 {strides = array<i32>} : memref<176x256xbf16, #tpu.memory_space<vmem>>, vector<16x256xbf16>,
    %c0_228 = arith.constant 0 : index
    %c125_229 = arith.constant 125 : index
    %205 = vector.load %arg9[%c0_228, %c125_229] : memref<16x512xbf16, #tpu.memory_space<vmem>>, vector<16x256xbf16>
    %c32_230 = arith.constant 32 : index
    %c0_231 = arith.constant 0 : index
    %206 = vector.load %arg10[%c32_230, %c0_231] : memref<176x256xbf16, #tpu.memory_space<vmem>>, vector<16x256xbf16>
    tpu.vector_store %arg10[%c32_230, %c0_231], %205 {strides = array<i32>} : memref<176x256xbf16, #tpu.memory_space<vmem>>, vector<16x256xbf16>,
    %c0_232 = arith.constant 0 : index
    %c128_233 = arith.constant 128 : index
    %207 = vector.load %arg9[%c0_232, %c128_233] : memref<16x512xbf16, #tpu.memory_space<vmem>>, vector<16x256xbf16>
    %c48_234 = arith.constant 48 : index
    %c0_235 = arith.constant 0 : index
    %208 = vector.load %arg10[%c48_234, %c0_235] : memref<176x256xbf16, #tpu.memory_space<vmem>>, vector<16x256xbf16>
    tpu.vector_store %arg10[%c48_234, %c0_235], %207 {strides = array<i32>} : memref<176x256xbf16, #tpu.memory_space<vmem>>, vector<16x256xbf16>,
    %c0_236 = arith.constant 0 : index
    %c131_237 = arith.constant 131 : index
    %209 = vector.load %arg9[%c0_236, %c131_237] : memref<16x512xbf16, #tpu.memory_space<vmem>>, vector<16x256xbf16>
    %c64_238 = arith.constant 64 : index
    %c0_239 = arith.constant 0 : index
    %210 = vector.load %arg10[%c64_238, %c0_239] : memref<176x256xbf16, #tpu.memory_space<vmem>>, vector<16x256xbf16>
    tpu.vector_store %arg10[%c64_238, %c0_239], %209 {strides = array<i32>} : memref<176x256xbf16, #tpu.memory_space<vmem>>, vector<16x256xbf16>,
    %c0_240 = arith.constant 0 : index
    %c134_241 = arith.constant 134 : index
    %211 = vector.load %arg9[%c0_240, %c134_241] : memref<16x512xbf16, #tpu.memory_space<vmem>>, vector<16x256xbf16>
    %c80_242 = arith.constant 80 : index
    %c0_243 = arith.constant 0 : index
    %212 = vector.load %arg10[%c80_242, %c0_243] : memref<176x256xbf16, #tpu.memory_space<vmem>>, vector<16x256xbf16>
    tpu.vector_store %arg10[%c80_242, %c0_243], %211 {strides = array<i32>} : memref<176x256xbf16, #tpu.memory_space<vmem>>, vector<16x256xbf16>,
    %c0_244 = arith.constant 0 : index
    %c137_245 = arith.constant 137 : index
    %213 = vector.load %arg9[%c0_244, %c137_245] : memref<16x512xbf16, #tpu.memory_space<vmem>>, vector<16x256xbf16>
    %c96_246 = arith.constant 96 : index
    %c0_247 = arith.constant 0 : index
    %214 = vector.load %arg10[%c96_246, %c0_247] : memref<176x256xbf16, #tpu.memory_space<vmem>>, vector<16x256xbf16>
    tpu.vector_store %arg10[%c96_246, %c0_247], %213 {strides = array<i32>} : memref<176x256xbf16, #tpu.memory_space<vmem>>, vector<16x256xbf16>,
    %c2_248 = arith.constant 2 : index
    %c0_249 = arith.constant 0 : index
    %c0_250 = arith.constant 0 : index
    %215 = vector.load %arg4[%c2_248, %c0_249, %c0_250] : memref<6x16x112xbf16, #tpu.memory_space<vmem>>, vector<1x16x112xbf16>
    %216 = vector.shape_cast %215 : vector<1x16x112xbf16> to vector<16x112xbf16>
    %c0_251 = arith.constant 0 : index
    %c0_252 = arith.constant 0 : index
    %217 = vector.load %arg10[%c0_251, %c0_252] : memref<176x256xbf16, #tpu.memory_space<vmem>>, vector<112x256xbf16>
    %cst_253 = arith.constant dense<0.000000e+00> : vector<16x256xf32>
    %218 = tpu.matmul %216, %217, %cst_253 {dimension_numbers = #tpu.dot_dimension_numbers<[1], [0], [0], [1], [0, 0, 1, 1], [], []>} : vector<16x112xbf16>, vector<112x256xbf16>, vector<16x256xf32> -> vector<16x256xf32>
    %c2_254 = arith.constant 2 : index
    %c0_255 = arith.constant 0 : index
    %c0_256 = arith.constant 0 : index
    %219 = vector.load %arg5[%c2_254, %c0_255, %c0_256] : memref<6x16x1xf32, #tpu.memory_space<vmem>>, vector<1x16x1xf32>
    %220 = vector.shape_cast %219 : vector<1x16x1xf32> to vector<16x1xf32>
    %221 = vector.broadcast %220 : vector<16x1xf32> to vector<16x256xf32>
    %222 = arith.addf %218, %221 : vector<16x256xf32>
    %cst_257 = arith.constant 0.000000e+00 : f32
    %223 = vector.broadcast %cst_257 : f32 to vector<16x256xf32>
    %224 = arith.cmpf ogt, %222, %223 : vector<16x256xf32>
    %cst_258 = arith.constant 0.00999999977 : f32
    %225 = vector.broadcast %cst_258 : f32 to vector<16x256xf32>
    %226 = arith.mulf %225, %222 : vector<16x256xf32>
    %227 = arith.select %224, %222, %226 : vector<16x256xi1>, vector<16x256xf32>
    %228 = arith.truncf %227 : vector<16x256xf32> to vector<16x256xbf16>
    %c0_259 = arith.constant 0 : index
    %c128_260 = arith.constant 128 : index
    %229 = vector.load %arg9[%c0_259, %c128_260] : memref<16x512xbf16, #tpu.memory_space<vmem>>, vector<16x256xbf16>
    tpu.vector_store %arg9[%c0_259, %c128_260], %228 {strides = array<i32>} : memref<16x512xbf16, #tpu.memory_space<vmem>>, vector<16x256xbf16>,
    %c0_261 = arith.constant 0 : index
    %c125_262 = arith.constant 125 : index
    %230 = vector.load %arg9[%c0_261, %c125_262] : memref<16x512xbf16, #tpu.memory_space<vmem>>, vector<16x256xbf16>
    %c0_263 = arith.constant 0 : index
    %c0_264 = arith.constant 0 : index
    %231 = vector.load %arg10[%c0_263, %c0_264] : memref<176x256xbf16, #tpu.memory_space<vmem>>, vector<16x256xbf16>
    tpu.vector_store %arg10[%c0_263, %c0_264], %230 {strides = array<i32>} : memref<176x256xbf16, #tpu.memory_space<vmem>>, vector<16x256xbf16>,
    %c0_265 = arith.constant 0 : index
    %c126_266 = arith.constant 126 : index
    %232 = vector.load %arg9[%c0_265, %c126_266] : memref<16x512xbf16, #tpu.memory_space<vmem>>, vector<16x256xbf16>
    %c16_267 = arith.constant 16 : index
    %c0_268 = arith.constant 0 : index
    %233 = vector.load %arg10[%c16_267, %c0_268] : memref<176x256xbf16, #tpu.memory_space<vmem>>, vector<16x256xbf16>
    tpu.vector_store %arg10[%c16_267, %c0_268], %232 {strides = array<i32>} : memref<176x256xbf16, #tpu.memory_space<vmem>>, vector<16x256xbf16>,
    %c0_269 = arith.constant 0 : index
    %c127_270 = arith.constant 127 : index
    %234 = vector.load %arg9[%c0_269, %c127_270] : memref<16x512xbf16, #tpu.memory_space<vmem>>, vector<16x256xbf16>
    %c32_271 = arith.constant 32 : index
    %c0_272 = arith.constant 0 : index
    %235 = vector.load %arg10[%c32_271, %c0_272] : memref<176x256xbf16, #tpu.memory_space<vmem>>, vector<16x256xbf16>
    tpu.vector_store %arg10[%c32_271, %c0_272], %234 {strides = array<i32>} : memref<176x256xbf16, #tpu.memory_space<vmem>>, vector<16x256xbf16>,
    %c0_273 = arith.constant 0 : index
    %c128_274 = arith.constant 128 : index
    %236 = vector.load %arg9[%c0_273, %c128_274] : memref<16x512xbf16, #tpu.memory_space<vmem>>, vector<16x256xbf16>
    %c48_275 = arith.constant 48 : index
    %c0_276 = arith.constant 0 : index
    %237 = vector.load %arg10[%c48_275, %c0_276] : memref<176x256xbf16, #tpu.memory_space<vmem>>, vector<16x256xbf16>
    tpu.vector_store %arg10[%c48_275, %c0_276], %236 {strides = array<i32>} : memref<176x256xbf16, #tpu.memory_space<vmem>>, vector<16x256xbf16>,
    %c0_277 = arith.constant 0 : index
    %c129_278 = arith.constant 129 : index
    %238 = vector.load %arg9[%c0_277, %c129_278] : memref<16x512xbf16, #tpu.memory_space<vmem>>, vector<16x256xbf16>
    %c64_279 = arith.constant 64 : index
    %c0_280 = arith.constant 0 : index
    %239 = vector.load %arg10[%c64_279, %c0_280] : memref<176x256xbf16, #tpu.memory_space<vmem>>, vector<16x256xbf16>
    tpu.vector_store %arg10[%c64_279, %c0_280], %238 {strides = array<i32>} : memref<176x256xbf16, #tpu.memory_space<vmem>>, vector<16x256xbf16>,
    %c0_281 = arith.constant 0 : index
    %c130_282 = arith.constant 130 : index
    %240 = vector.load %arg9[%c0_281, %c130_282] : memref<16x512xbf16, #tpu.memory_space<vmem>>, vector<16x256xbf16>
    %c80_283 = arith.constant 80 : index
    %c0_284 = arith.constant 0 : index
    %241 = vector.load %arg10[%c80_283, %c0_284] : memref<176x256xbf16, #tpu.memory_space<vmem>>, vector<16x256xbf16>
    tpu.vector_store %arg10[%c80_283, %c0_284], %240 {strides = array<i32>} : memref<176x256xbf16, #tpu.memory_space<vmem>>, vector<16x256xbf16>,
    %c0_285 = arith.constant 0 : index
    %c131_286 = arith.constant 131 : index
    %242 = vector.load %arg9[%c0_285, %c131_286] : memref<16x512xbf16, #tpu.memory_space<vmem>>, vector<16x256xbf16>
    %c96_287 = arith.constant 96 : index
    %c0_288 = arith.constant 0 : index
    %243 = vector.load %arg10[%c96_287, %c0_288] : memref<176x256xbf16, #tpu.memory_space<vmem>>, vector<16x256xbf16>
    tpu.vector_store %arg10[%c96_287, %c0_288], %242 {strides = array<i32>} : memref<176x256xbf16, #tpu.memory_space<vmem>>, vector<16x256xbf16>,
    %c3_289 = arith.constant 3 : index
    %c0_290 = arith.constant 0 : index
    %c0_291 = arith.constant 0 : index
    %244 = vector.load %arg4[%c3_289, %c0_290, %c0_291] : memref<6x16x112xbf16, #tpu.memory_space<vmem>>, vector<1x16x112xbf16>
    %245 = vector.shape_cast %244 : vector<1x16x112xbf16> to vector<16x112xbf16>
    %c0_292 = arith.constant 0 : index
    %c0_293 = arith.constant 0 : index
    %246 = vector.load %arg10[%c0_292, %c0_293] : memref<176x256xbf16, #tpu.memory_space<vmem>>, vector<112x256xbf16>
    %cst_294 = arith.constant dense<0.000000e+00> : vector<16x256xf32>
    %247 = tpu.matmul %245, %246, %cst_294 {dimension_numbers = #tpu.dot_dimension_numbers<[1], [0], [0], [1], [0, 0, 1, 1], [], []>} : vector<16x112xbf16>, vector<112x256xbf16>, vector<16x256xf32> -> vector<16x256xf32>
    %c3_295 = arith.constant 3 : index
    %c0_296 = arith.constant 0 : index
    %c0_297 = arith.constant 0 : index
    %248 = vector.load %arg5[%c3_295, %c0_296, %c0_297] : memref<6x16x1xf32, #tpu.memory_space<vmem>>, vector<1x16x1xf32>
    %249 = vector.shape_cast %248 : vector<1x16x1xf32> to vector<16x1xf32>
    %250 = vector.broadcast %249 : vector<16x1xf32> to vector<16x256xf32>
    %251 = arith.addf %247, %250 : vector<16x256xf32>
    %252 = arith.addf %193, %251 : vector<16x256xf32>
    %cst_298 = arith.constant 0.000000e+00 : f32
    %253 = vector.broadcast %cst_298 : f32 to vector<16x256xf32>
    %254 = arith.cmpf ogt, %252, %253 : vector<16x256xf32>
    %cst_299 = arith.constant 0.00999999977 : f32
    %255 = vector.broadcast %cst_299 : f32 to vector<16x256xf32>
    %256 = arith.mulf %255, %252 : vector<16x256xf32>
    %257 = arith.select %254, %252, %256 : vector<16x256xi1>, vector<16x256xf32>
    %258 = arith.truncf %257 : vector<16x256xf32> to vector<16x256xbf16>
    %c0_300 = arith.constant 0 : index
    %c128_301 = arith.constant 128 : index
    %259 = vector.load %arg9[%c0_300, %c128_301] : memref<16x512xbf16, #tpu.memory_space<vmem>>, vector<16x256xbf16>
    tpu.vector_store %arg9[%c0_300, %c128_301], %258 {strides = array<i32>} : memref<16x512xbf16, #tpu.memory_space<vmem>>, vector<16x256xbf16>,
    %c0_302 = arith.constant 0 : index
    %c119_303 = arith.constant 119 : index
    %260 = vector.load %arg9[%c0_302, %c119_303] : memref<16x512xbf16, #tpu.memory_space<vmem>>, vector<16x256xbf16>
    %c0_304 = arith.constant 0 : index
    %c0_305 = arith.constant 0 : index
    %261 = vector.load %arg10[%c0_304, %c0_305] : memref<176x256xbf16, #tpu.memory_space<vmem>>, vector<16x256xbf16>
    tpu.vector_store %arg10[%c0_304, %c0_305], %260 {strides = array<i32>} : memref<176x256xbf16, #tpu.memory_space<vmem>>, vector<16x256xbf16>,
    %c0_306 = arith.constant 0 : index
    %c122_307 = arith.constant 122 : index
    %262 = vector.load %arg9[%c0_306, %c122_307] : memref<16x512xbf16, #tpu.memory_space<vmem>>, vector<16x256xbf16>
    %c16_308 = arith.constant 16 : index
    %c0_309 = arith.constant 0 : index
    %263 = vector.load %arg10[%c16_308, %c0_309] : memref<176x256xbf16, #tpu.memory_space<vmem>>, vector<16x256xbf16>
    tpu.vector_store %arg10[%c16_308, %c0_309], %262 {strides = array<i32>} : memref<176x256xbf16, #tpu.memory_space<vmem>>, vector<16x256xbf16>,
    %c0_310 = arith.constant 0 : index
    %c125_311 = arith.constant 125 : index
    %264 = vector.load %arg9[%c0_310, %c125_311] : memref<16x512xbf16, #tpu.memory_space<vmem>>, vector<16x256xbf16>
    %c32_312 = arith.constant 32 : index
    %c0_313 = arith.constant 0 : index
    %265 = vector.load %arg10[%c32_312, %c0_313] : memref<176x256xbf16, #tpu.memory_space<vmem>>, vector<16x256xbf16>
    tpu.vector_store %arg10[%c32_312, %c0_313], %264 {strides = array<i32>} : memref<176x256xbf16, #tpu.memory_space<vmem>>, vector<16x256xbf16>,
    %c0_314 = arith.constant 0 : index
    %c128_315 = arith.constant 128 : index
    %266 = vector.load %arg9[%c0_314, %c128_315] : memref<16x512xbf16, #tpu.memory_space<vmem>>, vector<16x256xbf16>
    %c48_316 = arith.constant 48 : index
    %c0_317 = arith.constant 0 : index
    %267 = vector.load %arg10[%c48_316, %c0_317] : memref<176x256xbf16, #tpu.memory_space<vmem>>, vector<16x256xbf16>
    tpu.vector_store %arg10[%c48_316, %c0_317], %266 {strides = array<i32>} : memref<176x256xbf16, #tpu.memory_space<vmem>>, vector<16x256xbf16>,
    %c0_318 = arith.constant 0 : index
    %c131_319 = arith.constant 131 : index
    %268 = vector.load %arg9[%c0_318, %c131_319] : memref<16x512xbf16, #tpu.memory_space<vmem>>, vector<16x256xbf16>
    %c64_320 = arith.constant 64 : index
    %c0_321 = arith.constant 0 : index
    %269 = vector.load %arg10[%c64_320, %c0_321] : memref<176x256xbf16, #tpu.memory_space<vmem>>, vector<16x256xbf16>
    tpu.vector_store %arg10[%c64_320, %c0_321], %268 {strides = array<i32>} : memref<176x256xbf16, #tpu.memory_space<vmem>>, vector<16x256xbf16>,
    %c0_322 = arith.constant 0 : index
    %c134_323 = arith.constant 134 : index
    %270 = vector.load %arg9[%c0_322, %c134_323] : memref<16x512xbf16, #tpu.memory_space<vmem>>, vector<16x256xbf16>
    %c80_324 = arith.constant 80 : index
    %c0_325 = arith.constant 0 : index
    %271 = vector.load %arg10[%c80_324, %c0_325] : memref<176x256xbf16, #tpu.memory_space<vmem>>, vector<16x256xbf16>
    tpu.vector_store %arg10[%c80_324, %c0_325], %270 {strides = array<i32>} : memref<176x256xbf16, #tpu.memory_space<vmem>>, vector<16x256xbf16>,
    %c0_326 = arith.constant 0 : index
    %c137_327 = arith.constant 137 : index
    %272 = vector.load %arg9[%c0_326, %c137_327] : memref<16x512xbf16, #tpu.memory_space<vmem>>, vector<16x256xbf16>
    %c96_328 = arith.constant 96 : index
    %c0_329 = arith.constant 0 : index
    %273 = vector.load %arg10[%c96_328, %c0_329] : memref<176x256xbf16, #tpu.memory_space<vmem>>, vector<16x256xbf16>
    tpu.vector_store %arg10[%c96_328, %c0_329], %272 {strides = array<i32>} : memref<176x256xbf16, #tpu.memory_space<vmem>>, vector<16x256xbf16>,
    %c4_330 = arith.constant 4 : index
    %c0_331 = arith.constant 0 : index
    %c0_332 = arith.constant 0 : index
    %274 = vector.load %arg4[%c4_330, %c0_331, %c0_332] : memref<6x16x112xbf16, #tpu.memory_space<vmem>>, vector<1x16x112xbf16>
    %275 = vector.shape_cast %274 : vector<1x16x112xbf16> to vector<16x112xbf16>
    %c0_333 = arith.constant 0 : index
    %c0_334 = arith.constant 0 : index
    %276 = vector.load %arg10[%c0_333, %c0_334] : memref<176x256xbf16, #tpu.memory_space<vmem>>, vector<112x256xbf16>
    %cst_335 = arith.constant dense<0.000000e+00> : vector<16x256xf32>
    %277 = tpu.matmul %275, %276, %cst_335 {dimension_numbers = #tpu.dot_dimension_numbers<[1], [0], [0], [1], [0, 0, 1, 1], [], []>} : vector<16x112xbf16>, vector<112x256xbf16>, vector<16x256xf32> -> vector<16x256xf32>
    %c4_336 = arith.constant 4 : index
    %c0_337 = arith.constant 0 : index
    %c0_338 = arith.constant 0 : index
    %278 = vector.load %arg5[%c4_336, %c0_337, %c0_338] : memref<6x16x1xf32, #tpu.memory_space<vmem>>, vector<1x16x1xf32>
    %279 = vector.shape_cast %278 : vector<1x16x1xf32> to vector<16x1xf32>
    %280 = vector.broadcast %279 : vector<16x1xf32> to vector<16x256xf32>
    %281 = arith.addf %277, %280 : vector<16x256xf32>
    %cst_339 = arith.constant 0.000000e+00 : f32
    %282 = vector.broadcast %cst_339 : f32 to vector<16x256xf32>
    %283 = arith.cmpf ogt, %281, %282 : vector<16x256xf32>
    %cst_340 = arith.constant 0.00999999977 : f32
    %284 = vector.broadcast %cst_340 : f32 to vector<16x256xf32>
    %285 = arith.mulf %284, %281 : vector<16x256xf32>
    %286 = arith.select %283, %281, %285 : vector<16x256xi1>, vector<16x256xf32>
    %287 = arith.truncf %286 : vector<16x256xf32> to vector<16x256xbf16>
    %c0_341 = arith.constant 0 : index
    %c128_342 = arith.constant 128 : index
    %288 = vector.load %arg9[%c0_341, %c128_342] : memref<16x512xbf16, #tpu.memory_space<vmem>>, vector<16x256xbf16>
    tpu.vector_store %arg9[%c0_341, %c128_342], %287 {strides = array<i32>} : memref<16x512xbf16, #tpu.memory_space<vmem>>, vector<16x256xbf16>,
    %c0_343 = arith.constant 0 : index
    %c125_344 = arith.constant 125 : index
    %289 = vector.load %arg9[%c0_343, %c125_344] : memref<16x512xbf16, #tpu.memory_space<vmem>>, vector<16x256xbf16>
    %c0_345 = arith.constant 0 : index
    %c0_346 = arith.constant 0 : index
    %290 = vector.load %arg10[%c0_345, %c0_346] : memref<176x256xbf16, #tpu.memory_space<vmem>>, vector<16x256xbf16>
    tpu.vector_store %arg10[%c0_345, %c0_346], %289 {strides = array<i32>} : memref<176x256xbf16, #tpu.memory_space<vmem>>, vector<16x256xbf16>,
    %c0_347 = arith.constant 0 : index
    %c126_348 = arith.constant 126 : index
    %291 = vector.load %arg9[%c0_347, %c126_348] : memref<16x512xbf16, #tpu.memory_space<vmem>>, vector<16x256xbf16>
    %c16_349 = arith.constant 16 : index
    %c0_350 = arith.constant 0 : index
    %292 = vector.load %arg10[%c16_349, %c0_350] : memref<176x256xbf16, #tpu.memory_space<vmem>>, vector<16x256xbf16>
    tpu.vector_store %arg10[%c16_349, %c0_350], %291 {strides = array<i32>} : memref<176x256xbf16, #tpu.memory_space<vmem>>, vector<16x256xbf16>,
    %c0_351 = arith.constant 0 : index
    %c127_352 = arith.constant 127 : index
    %293 = vector.load %arg9[%c0_351, %c127_352] : memref<16x512xbf16, #tpu.memory_space<vmem>>, vector<16x256xbf16>
    %c32_353 = arith.constant 32 : index
    %c0_354 = arith.constant 0 : index
    %294 = vector.load %arg10[%c32_353, %c0_354] : memref<176x256xbf16, #tpu.memory_space<vmem>>, vector<16x256xbf16>
    tpu.vector_store %arg10[%c32_353, %c0_354], %293 {strides = array<i32>} : memref<176x256xbf16, #tpu.memory_space<vmem>>, vector<16x256xbf16>,
    %c0_355 = arith.constant 0 : index
    %c128_356 = arith.constant 128 : index
    %295 = vector.load %arg9[%c0_355, %c128_356] : memref<16x512xbf16, #tpu.memory_space<vmem>>, vector<16x256xbf16>
    %c48_357 = arith.constant 48 : index
    %c0_358 = arith.constant 0 : index
    %296 = vector.load %arg10[%c48_357, %c0_358] : memref<176x256xbf16, #tpu.memory_space<vmem>>, vector<16x256xbf16>
    tpu.vector_store %arg10[%c48_357, %c0_358], %295 {strides = array<i32>} : memref<176x256xbf16, #tpu.memory_space<vmem>>, vector<16x256xbf16>,
    %c0_359 = arith.constant 0 : index
    %c129_360 = arith.constant 129 : index
    %297 = vector.load %arg9[%c0_359, %c129_360] : memref<16x512xbf16, #tpu.memory_space<vmem>>, vector<16x256xbf16>
    %c64_361 = arith.constant 64 : index
    %c0_362 = arith.constant 0 : index
    %298 = vector.load %arg10[%c64_361, %c0_362] : memref<176x256xbf16, #tpu.memory_space<vmem>>, vector<16x256xbf16>
    tpu.vector_store %arg10[%c64_361, %c0_362], %297 {strides = array<i32>} : memref<176x256xbf16, #tpu.memory_space<vmem>>, vector<16x256xbf16>,
    %c0_363 = arith.constant 0 : index
    %c130_364 = arith.constant 130 : index
    %299 = vector.load %arg9[%c0_363, %c130_364] : memref<16x512xbf16, #tpu.memory_space<vmem>>, vector<16x256xbf16>
    %c80_365 = arith.constant 80 : index
    %c0_366 = arith.constant 0 : index
    %300 = vector.load %arg10[%c80_365, %c0_366] : memref<176x256xbf16, #tpu.memory_space<vmem>>, vector<16x256xbf16>
    tpu.vector_store %arg10[%c80_365, %c0_366], %299 {strides = array<i32>} : memref<176x256xbf16, #tpu.memory_space<vmem>>, vector<16x256xbf16>,
    %c0_367 = arith.constant 0 : index
    %c131_368 = arith.constant 131 : index
    %301 = vector.load %arg9[%c0_367, %c131_368] : memref<16x512xbf16, #tpu.memory_space<vmem>>, vector<16x256xbf16>
    %c96_369 = arith.constant 96 : index
    %c0_370 = arith.constant 0 : index
    %302 = vector.load %arg10[%c96_369, %c0_370] : memref<176x256xbf16, #tpu.memory_space<vmem>>, vector<16x256xbf16>
    tpu.vector_store %arg10[%c96_369, %c0_370], %301 {strides = array<i32>} : memref<176x256xbf16, #tpu.memory_space<vmem>>, vector<16x256xbf16>,
    %c5_371 = arith.constant 5 : index
    %c0_372 = arith.constant 0 : index
    %c0_373 = arith.constant 0 : index
    %303 = vector.load %arg4[%c5_371, %c0_372, %c0_373] : memref<6x16x112xbf16, #tpu.memory_space<vmem>>, vector<1x16x112xbf16>
    %304 = vector.shape_cast %303 : vector<1x16x112xbf16> to vector<16x112xbf16>
    %c0_374 = arith.constant 0 : index
    %c0_375 = arith.constant 0 : index
    %305 = vector.load %arg10[%c0_374, %c0_375] : memref<176x256xbf16, #tpu.memory_space<vmem>>, vector<112x256xbf16>
    %cst_376 = arith.constant dense<0.000000e+00> : vector<16x256xf32>
    %306 = tpu.matmul %304, %305, %cst_376 {dimension_numbers = #tpu.dot_dimension_numbers<[1], [0], [0], [1], [0, 0, 1, 1], [], []>} : vector<16x112xbf16>, vector<112x256xbf16>, vector<16x256xf32> -> vector<16x256xf32>
    %c5_377 = arith.constant 5 : index
    %c0_378 = arith.constant 0 : index
    %c0_379 = arith.constant 0 : index
    %307 = vector.load %arg5[%c5_377, %c0_378, %c0_379] : memref<6x16x1xf32, #tpu.memory_space<vmem>>, vector<1x16x1xf32>
    %308 = vector.shape_cast %307 : vector<1x16x1xf32> to vector<16x1xf32>
    %309 = vector.broadcast %308 : vector<16x1xf32> to vector<16x256xf32>
    %310 = arith.addf %306, %309 : vector<16x256xf32>
    %311 = arith.addf %252, %310 : vector<16x256xf32>
    %312 = arith.addf %134, %311 : vector<16x256xf32>
    %cst_380 = arith.constant 0.000000e+00 : f32
    %313 = vector.broadcast %cst_380 : f32 to vector<16x256xf32>
    %314 = arith.cmpf ogt, %5, %313 : vector<16x256xf32>
    %cst_381 = arith.constant 0.00999999977 : f32
    %315 = vector.broadcast %cst_381 : f32 to vector<16x256xf32>
    %316 = arith.mulf %315, %5 : vector<16x256xf32>
    %317 = arith.select %314, %5, %316 : vector<16x256xi1>, vector<16x256xf32>
    %318 = arith.truncf %317 : vector<16x256xf32> to vector<16x256xbf16>
    %c0_382 = arith.constant 0 : index
    %c128_383 = arith.constant 128 : index
    %319 = vector.load %arg9[%c0_382, %c128_383] : memref<16x512xbf16, #tpu.memory_space<vmem>>, vector<16x256xbf16>
    tpu.vector_store %arg9[%c0_382, %c128_383], %318 {strides = array<i32>} : memref<16x512xbf16, #tpu.memory_space<vmem>>, vector<16x256xbf16>,
    %c0_384 = arith.constant 0 : index
    %c103 = arith.constant 103 : index
    %320 = vector.load %arg9[%c0_384, %c103] : memref<16x512xbf16, #tpu.memory_space<vmem>>, vector<16x256xbf16>
    %c0_385 = arith.constant 0 : index
    %c0_386 = arith.constant 0 : index
    %321 = vector.load %arg10[%c0_385, %c0_386] : memref<176x256xbf16, #tpu.memory_space<vmem>>, vector<16x256xbf16>
    tpu.vector_store %arg10[%c0_385, %c0_386], %320 {strides = array<i32>} : memref<176x256xbf16, #tpu.memory_space<vmem>>, vector<16x256xbf16>,
    %c0_387 = arith.constant 0 : index
    %c108 = arith.constant 108 : index
    %322 = vector.load %arg9[%c0_387, %c108] : memref<16x512xbf16, #tpu.memory_space<vmem>>, vector<16x256xbf16>
    %c16_388 = arith.constant 16 : index
    %c0_389 = arith.constant 0 : index
    %323 = vector.load %arg10[%c16_388, %c0_389] : memref<176x256xbf16, #tpu.memory_space<vmem>>, vector<16x256xbf16>
    tpu.vector_store %arg10[%c16_388, %c0_389], %322 {strides = array<i32>} : memref<176x256xbf16, #tpu.memory_space<vmem>>, vector<16x256xbf16>,
    %c0_390 = arith.constant 0 : index
    %c113 = arith.constant 113 : index
    %324 = vector.load %arg9[%c0_390, %c113] : memref<16x512xbf16, #tpu.memory_space<vmem>>, vector<16x256xbf16>
    %c32_391 = arith.constant 32 : index
    %c0_392 = arith.constant 0 : index
    %325 = vector.load %arg10[%c32_391, %c0_392] : memref<176x256xbf16, #tpu.memory_space<vmem>>, vector<16x256xbf16>
    tpu.vector_store %arg10[%c32_391, %c0_392], %324 {strides = array<i32>} : memref<176x256xbf16, #tpu.memory_space<vmem>>, vector<16x256xbf16>,
    %c0_393 = arith.constant 0 : index
    %c118 = arith.constant 118 : index
    %326 = vector.load %arg9[%c0_393, %c118] : memref<16x512xbf16, #tpu.memory_space<vmem>>, vector<16x256xbf16>
    %c48_394 = arith.constant 48 : index
    %c0_395 = arith.constant 0 : index
    %327 = vector.load %arg10[%c48_394, %c0_395] : memref<176x256xbf16, #tpu.memory_space<vmem>>, vector<16x256xbf16>
    tpu.vector_store %arg10[%c48_394, %c0_395], %326 {strides = array<i32>} : memref<176x256xbf16, #tpu.memory_space<vmem>>, vector<16x256xbf16>,
    %c0_396 = arith.constant 0 : index
    %c123 = arith.constant 123 : index
    %328 = vector.load %arg9[%c0_396, %c123] : memref<16x512xbf16, #tpu.memory_space<vmem>>, vector<16x256xbf16>
    %c64_397 = arith.constant 64 : index
    %c0_398 = arith.constant 0 : index
    %329 = vector.load %arg10[%c64_397, %c0_398] : memref<176x256xbf16, #tpu.memory_space<vmem>>, vector<16x256xbf16>
    tpu.vector_store %arg10[%c64_397, %c0_398], %328 {strides = array<i32>} : memref<176x256xbf16, #tpu.memory_space<vmem>>, vector<16x256xbf16>,
    %c0_399 = arith.constant 0 : index
    %c128_400 = arith.constant 128 : index
    %330 = vector.load %arg9[%c0_399, %c128_400] : memref<16x512xbf16, #tpu.memory_space<vmem>>, vector<16x256xbf16>
    %c80_401 = arith.constant 80 : index
    %c0_402 = arith.constant 0 : index
    %331 = vector.load %arg10[%c80_401, %c0_402] : memref<176x256xbf16, #tpu.memory_space<vmem>>, vector<16x256xbf16>
    tpu.vector_store %arg10[%c80_401, %c0_402], %330 {strides = array<i32>} : memref<176x256xbf16, #tpu.memory_space<vmem>>, vector<16x256xbf16>,
    %c0_403 = arith.constant 0 : index
    %c133 = arith.constant 133 : index
    %332 = vector.load %arg9[%c0_403, %c133] : memref<16x512xbf16, #tpu.memory_space<vmem>>, vector<16x256xbf16>
    %c96_404 = arith.constant 96 : index
    %c0_405 = arith.constant 0 : index
    %333 = vector.load %arg10[%c96_404, %c0_405] : memref<176x256xbf16, #tpu.memory_space<vmem>>, vector<16x256xbf16>
    tpu.vector_store %arg10[%c96_404, %c0_405], %332 {strides = array<i32>} : memref<176x256xbf16, #tpu.memory_space<vmem>>, vector<16x256xbf16>,
    %c0_406 = arith.constant 0 : index
    %c138 = arith.constant 138 : index
    %334 = vector.load %arg9[%c0_406, %c138] : memref<16x512xbf16, #tpu.memory_space<vmem>>, vector<16x256xbf16>
    %c112 = arith.constant 112 : index
    %c0_407 = arith.constant 0 : index
    %335 = vector.load %arg10[%c112, %c0_407] : memref<176x256xbf16, #tpu.memory_space<vmem>>, vector<16x256xbf16>
    tpu.vector_store %arg10[%c112, %c0_407], %334 {strides = array<i32>} : memref<176x256xbf16, #tpu.memory_space<vmem>>, vector<16x256xbf16>,
    %c0_408 = arith.constant 0 : index
    %c143 = arith.constant 143 : index
    %336 = vector.load %arg9[%c0_408, %c143] : memref<16x512xbf16, #tpu.memory_space<vmem>>, vector<16x256xbf16>
    %c128_409 = arith.constant 128 : index
    %c0_410 = arith.constant 0 : index
    %337 = vector.load %arg10[%c128_409, %c0_410] : memref<176x256xbf16, #tpu.memory_space<vmem>>, vector<16x256xbf16>
    tpu.vector_store %arg10[%c128_409, %c0_410], %336 {strides = array<i32>} : memref<176x256xbf16, #tpu.memory_space<vmem>>, vector<16x256xbf16>,
    %c0_411 = arith.constant 0 : index
    %c148 = arith.constant 148 : index
    %338 = vector.load %arg9[%c0_411, %c148] : memref<16x512xbf16, #tpu.memory_space<vmem>>, vector<16x256xbf16>
    %c144 = arith.constant 144 : index
    %c0_412 = arith.constant 0 : index
    %339 = vector.load %arg10[%c144, %c0_412] : memref<176x256xbf16, #tpu.memory_space<vmem>>, vector<16x256xbf16>
    tpu.vector_store %arg10[%c144, %c0_412], %338 {strides = array<i32>} : memref<176x256xbf16, #tpu.memory_space<vmem>>, vector<16x256xbf16>,
    %c0_413 = arith.constant 0 : index
    %c153 = arith.constant 153 : index
    %340 = vector.load %arg9[%c0_413, %c153] : memref<16x512xbf16, #tpu.memory_space<vmem>>, vector<16x256xbf16>
    %c160 = arith.constant 160 : index
    %c0_414 = arith.constant 0 : index
    %341 = vector.load %arg10[%c160, %c0_414] : memref<176x256xbf16, #tpu.memory_space<vmem>>, vector<16x256xbf16>
    tpu.vector_store %arg10[%c160, %c0_414], %340 {strides = array<i32>} : memref<176x256xbf16, #tpu.memory_space<vmem>>, vector<16x256xbf16>,
    %c0_415 = arith.constant 0 : index
    %c0_416 = arith.constant 0 : index
    %c0_417 = arith.constant 0 : index
    %342 = vector.load %arg6[%c0_415, %c0_416, %c0_417] : memref<6x16x176xbf16, #tpu.memory_space<vmem>>, vector<1x16x176xbf16>
    %343 = vector.shape_cast %342 : vector<1x16x176xbf16> to vector<16x176xbf16>
    %c0_418 = arith.constant 0 : index
    %c0_419 = arith.constant 0 : index
    %344 = vector.load %arg10[%c0_418, %c0_419] : memref<176x256xbf16, #tpu.memory_space<vmem>>, vector<176x256xbf16>
    %cst_420 = arith.constant dense<0.000000e+00> : vector<16x256xf32>
    %345 = tpu.matmul %343, %344, %cst_420 {dimension_numbers = #tpu.dot_dimension_numbers<[1], [0], [0], [1], [0, 0, 1, 1], [], []>} : vector<16x176xbf16>, vector<176x256xbf16>, vector<16x256xf32> -> vector<16x256xf32>
    %c0_421 = arith.constant 0 : index
    %c0_422 = arith.constant 0 : index
    %c0_423 = arith.constant 0 : index
    %346 = vector.load %arg7[%c0_421, %c0_422, %c0_423] : memref<6x16x1xf32, #tpu.memory_space<vmem>>, vector<1x16x1xf32>
    %347 = vector.shape_cast %346 : vector<1x16x1xf32> to vector<16x1xf32>
    %348 = vector.broadcast %347 : vector<16x1xf32> to vector<16x256xf32>
    %349 = arith.addf %345, %348 : vector<16x256xf32>
    %cst_424 = arith.constant 0.000000e+00 : f32
    %350 = vector.broadcast %cst_424 : f32 to vector<16x256xf32>
    %351 = arith.cmpf ogt, %349, %350 : vector<16x256xf32>
    %cst_425 = arith.constant 0.00999999977 : f32
    %352 = vector.broadcast %cst_425 : f32 to vector<16x256xf32>
    %353 = arith.mulf %352, %349 : vector<16x256xf32>
    %354 = arith.select %351, %349, %353 : vector<16x256xi1>, vector<16x256xf32>
    %355 = arith.truncf %354 : vector<16x256xf32> to vector<16x256xbf16>
    %c0_426 = arith.constant 0 : index
    %c128_427 = arith.constant 128 : index
    %356 = vector.load %arg9[%c0_426, %c128_427] : memref<16x512xbf16, #tpu.memory_space<vmem>>, vector<16x256xbf16>
    tpu.vector_store %arg9[%c0_426, %c128_427], %355 {strides = array<i32>} : memref<16x512xbf16, #tpu.memory_space<vmem>>, vector<16x256xbf16>,
    %c0_428 = arith.constant 0 : index
    %c123_429 = arith.constant 123 : index
    %357 = vector.load %arg9[%c0_428, %c123_429] : memref<16x512xbf16, #tpu.memory_space<vmem>>, vector<16x256xbf16>
    %c0_430 = arith.constant 0 : index
    %c0_431 = arith.constant 0 : index
    %358 = vector.load %arg10[%c0_430, %c0_431] : memref<176x256xbf16, #tpu.memory_space<vmem>>, vector<16x256xbf16>
    tpu.vector_store %arg10[%c0_430, %c0_431], %357 {strides = array<i32>} : memref<176x256xbf16, #tpu.memory_space<vmem>>, vector<16x256xbf16>,
    %c0_432 = arith.constant 0 : index
    %c124 = arith.constant 124 : index
    %359 = vector.load %arg9[%c0_432, %c124] : memref<16x512xbf16, #tpu.memory_space<vmem>>, vector<16x256xbf16>
    %c16_433 = arith.constant 16 : index
    %c0_434 = arith.constant 0 : index
    %360 = vector.load %arg10[%c16_433, %c0_434] : memref<176x256xbf16, #tpu.memory_space<vmem>>, vector<16x256xbf16>
    tpu.vector_store %arg10[%c16_433, %c0_434], %359 {strides = array<i32>} : memref<176x256xbf16, #tpu.memory_space<vmem>>, vector<16x256xbf16>,
    %c0_435 = arith.constant 0 : index
    %c125_436 = arith.constant 125 : index
    %361 = vector.load %arg9[%c0_435, %c125_436] : memref<16x512xbf16, #tpu.memory_space<vmem>>, vector<16x256xbf16>
    %c32_437 = arith.constant 32 : index
    %c0_438 = arith.constant 0 : index
    %362 = vector.load %arg10[%c32_437, %c0_438] : memref<176x256xbf16, #tpu.memory_space<vmem>>, vector<16x256xbf16>
    tpu.vector_store %arg10[%c32_437, %c0_438], %361 {strides = array<i32>} : memref<176x256xbf16, #tpu.memory_space<vmem>>, vector<16x256xbf16>,
    %c0_439 = arith.constant 0 : index
    %c126_440 = arith.constant 126 : index
    %363 = vector.load %arg9[%c0_439, %c126_440] : memref<16x512xbf16, #tpu.memory_space<vmem>>, vector<16x256xbf16>
    %c48_441 = arith.constant 48 : index
    %c0_442 = arith.constant 0 : index
    %364 = vector.load %arg10[%c48_441, %c0_442] : memref<176x256xbf16, #tpu.memory_space<vmem>>, vector<16x256xbf16>
    tpu.vector_store %arg10[%c48_441, %c0_442], %363 {strides = array<i32>} : memref<176x256xbf16, #tpu.memory_space<vmem>>, vector<16x256xbf16>,
    %c0_443 = arith.constant 0 : index
    %c127_444 = arith.constant 127 : index
    %365 = vector.load %arg9[%c0_443, %c127_444] : memref<16x512xbf16, #tpu.memory_space<vmem>>, vector<16x256xbf16>
    %c64_445 = arith.constant 64 : index
    %c0_446 = arith.constant 0 : index
    %366 = vector.load %arg10[%c64_445, %c0_446] : memref<176x256xbf16, #tpu.memory_space<vmem>>, vector<16x256xbf16>
    tpu.vector_store %arg10[%c64_445, %c0_446], %365 {strides = array<i32>} : memref<176x256xbf16, #tpu.memory_space<vmem>>, vector<16x256xbf16>,
    %c0_447 = arith.constant 0 : index
    %c128_448 = arith.constant 128 : index
    %367 = vector.load %arg9[%c0_447, %c128_448] : memref<16x512xbf16, #tpu.memory_space<vmem>>, vector<16x256xbf16>
    %c80_449 = arith.constant 80 : index
    %c0_450 = arith.constant 0 : index
    %368 = vector.load %arg10[%c80_449, %c0_450] : memref<176x256xbf16, #tpu.memory_space<vmem>>, vector<16x256xbf16>
    tpu.vector_store %arg10[%c80_449, %c0_450], %367 {strides = array<i32>} : memref<176x256xbf16, #tpu.memory_space<vmem>>, vector<16x256xbf16>,
    %c0_451 = arith.constant 0 : index
    %c129_452 = arith.constant 129 : index
    %369 = vector.load %arg9[%c0_451, %c129_452] : memref<16x512xbf16, #tpu.memory_space<vmem>>, vector<16x256xbf16>
    %c96_453 = arith.constant 96 : index
    %c0_454 = arith.constant 0 : index
    %370 = vector.load %arg10[%c96_453, %c0_454] : memref<176x256xbf16, #tpu.memory_space<vmem>>, vector<16x256xbf16>
    tpu.vector_store %arg10[%c96_453, %c0_454], %369 {strides = array<i32>} : memref<176x256xbf16, #tpu.memory_space<vmem>>, vector<16x256xbf16>,
    %c0_455 = arith.constant 0 : index
    %c130_456 = arith.constant 130 : index
    %371 = vector.load %arg9[%c0_455, %c130_456] : memref<16x512xbf16, #tpu.memory_space<vmem>>, vector<16x256xbf16>
    %c112_457 = arith.constant 112 : index
    %c0_458 = arith.constant 0 : index
    %372 = vector.load %arg10[%c112_457, %c0_458] : memref<176x256xbf16, #tpu.memory_space<vmem>>, vector<16x256xbf16>
    tpu.vector_store %arg10[%c112_457, %c0_458], %371 {strides = array<i32>} : memref<176x256xbf16, #tpu.memory_space<vmem>>, vector<16x256xbf16>,
    %c0_459 = arith.constant 0 : index
    %c131_460 = arith.constant 131 : index
    %373 = vector.load %arg9[%c0_459, %c131_460] : memref<16x512xbf16, #tpu.memory_space<vmem>>, vector<16x256xbf16>
    %c128_461 = arith.constant 128 : index
    %c0_462 = arith.constant 0 : index
    %374 = vector.load %arg10[%c128_461, %c0_462] : memref<176x256xbf16, #tpu.memory_space<vmem>>, vector<16x256xbf16>
    tpu.vector_store %arg10[%c128_461, %c0_462], %373 {strides = array<i32>} : memref<176x256xbf16, #tpu.memory_space<vmem>>, vector<16x256xbf16>,
    %c0_463 = arith.constant 0 : index
    %c132 = arith.constant 132 : index
    %375 = vector.load %arg9[%c0_463, %c132] : memref<16x512xbf16, #tpu.memory_space<vmem>>, vector<16x256xbf16>
    %c144_464 = arith.constant 144 : index
    %c0_465 = arith.constant 0 : index
    %376 = vector.load %arg10[%c144_464, %c0_465] : memref<176x256xbf16, #tpu.memory_space<vmem>>, vector<16x256xbf16>
    tpu.vector_store %arg10[%c144_464, %c0_465], %375 {strides = array<i32>} : memref<176x256xbf16, #tpu.memory_space<vmem>>, vector<16x256xbf16>,
    %c0_466 = arith.constant 0 : index
    %c133_467 = arith.constant 133 : index
    %377 = vector.load %arg9[%c0_466, %c133_467] : memref<16x512xbf16, #tpu.memory_space<vmem>>, vector<16x256xbf16>
    %c160_468 = arith.constant 160 : index
    %c0_469 = arith.constant 0 : index
    %378 = vector.load %arg10[%c160_468, %c0_469] : memref<176x256xbf16, #tpu.memory_space<vmem>>, vector<16x256xbf16>
    tpu.vector_store %arg10[%c160_468, %c0_469], %377 {strides = array<i32>} : memref<176x256xbf16, #tpu.memory_space<vmem>>, vector<16x256xbf16>,
    %c1_470 = arith.constant 1 : index
    %c0_471 = arith.constant 0 : index
    %c0_472 = arith.constant 0 : index
    %379 = vector.load %arg6[%c1_470, %c0_471, %c0_472] : memref<6x16x176xbf16, #tpu.memory_space<vmem>>, vector<1x16x176xbf16>
    %380 = vector.shape_cast %379 : vector<1x16x176xbf16> to vector<16x176xbf16>
    %c0_473 = arith.constant 0 : index
    %c0_474 = arith.constant 0 : index
    %381 = vector.load %arg10[%c0_473, %c0_474] : memref<176x256xbf16, #tpu.memory_space<vmem>>, vector<176x256xbf16>
    %cst_475 = arith.constant dense<0.000000e+00> : vector<16x256xf32>
    %382 = tpu.matmul %380, %381, %cst_475 {dimension_numbers = #tpu.dot_dimension_numbers<[1], [0], [0], [1], [0, 0, 1, 1], [], []>} : vector<16x176xbf16>, vector<176x256xbf16>, vector<16x256xf32> -> vector<16x256xf32>
    %c1_476 = arith.constant 1 : index
    %c0_477 = arith.constant 0 : index
    %c0_478 = arith.constant 0 : index
    %383 = vector.load %arg7[%c1_476, %c0_477, %c0_478] : memref<6x16x1xf32, #tpu.memory_space<vmem>>, vector<1x16x1xf32>
    %384 = vector.shape_cast %383 : vector<1x16x1xf32> to vector<16x1xf32>
    %385 = vector.broadcast %384 : vector<16x1xf32> to vector<16x256xf32>
    %386 = arith.addf %382, %385 : vector<16x256xf32>
    %387 = arith.addf %5, %386 : vector<16x256xf32>
    %cst_479 = arith.constant 0.000000e+00 : f32
    %388 = vector.broadcast %cst_479 : f32 to vector<16x256xf32>
    %389 = arith.cmpf ogt, %387, %388 : vector<16x256xf32>
    %cst_480 = arith.constant 0.00999999977 : f32
    %390 = vector.broadcast %cst_480 : f32 to vector<16x256xf32>
    %391 = arith.mulf %390, %387 : vector<16x256xf32>
    %392 = arith.select %389, %387, %391 : vector<16x256xi1>, vector<16x256xf32>
    %393 = arith.truncf %392 : vector<16x256xf32> to vector<16x256xbf16>
    %c0_481 = arith.constant 0 : index
    %c128_482 = arith.constant 128 : index
    %394 = vector.load %arg9[%c0_481, %c128_482] : memref<16x512xbf16, #tpu.memory_space<vmem>>, vector<16x256xbf16>
    tpu.vector_store %arg9[%c0_481, %c128_482], %393 {strides = array<i32>} : memref<16x512xbf16, #tpu.memory_space<vmem>>, vector<16x256xbf16>,
    %c0_483 = arith.constant 0 : index
    %c103_484 = arith.constant 103 : index
    %395 = vector.load %arg9[%c0_483, %c103_484] : memref<16x512xbf16, #tpu.memory_space<vmem>>, vector<16x256xbf16>
    %c0_485 = arith.constant 0 : index
    %c0_486 = arith.constant 0 : index
    %396 = vector.load %arg10[%c0_485, %c0_486] : memref<176x256xbf16, #tpu.memory_space<vmem>>, vector<16x256xbf16>
    tpu.vector_store %arg10[%c0_485, %c0_486], %395 {strides = array<i32>} : memref<176x256xbf16, #tpu.memory_space<vmem>>, vector<16x256xbf16>,
    %c0_487 = arith.constant 0 : index
    %c108_488 = arith.constant 108 : index
    %397 = vector.load %arg9[%c0_487, %c108_488] : memref<16x512xbf16, #tpu.memory_space<vmem>>, vector<16x256xbf16>
    %c16_489 = arith.constant 16 : index
    %c0_490 = arith.constant 0 : index
    %398 = vector.load %arg10[%c16_489, %c0_490] : memref<176x256xbf16, #tpu.memory_space<vmem>>, vector<16x256xbf16>
    tpu.vector_store %arg10[%c16_489, %c0_490], %397 {strides = array<i32>} : memref<176x256xbf16, #tpu.memory_space<vmem>>, vector<16x256xbf16>,
    %c0_491 = arith.constant 0 : index
    %c113_492 = arith.constant 113 : index
    %399 = vector.load %arg9[%c0_491, %c113_492] : memref<16x512xbf16, #tpu.memory_space<vmem>>, vector<16x256xbf16>
    %c32_493 = arith.constant 32 : index
    %c0_494 = arith.constant 0 : index
    %400 = vector.load %arg10[%c32_493, %c0_494] : memref<176x256xbf16, #tpu.memory_space<vmem>>, vector<16x256xbf16>
    tpu.vector_store %arg10[%c32_493, %c0_494], %399 {strides = array<i32>} : memref<176x256xbf16, #tpu.memory_space<vmem>>, vector<16x256xbf16>,
    %c0_495 = arith.constant 0 : index
    %c118_496 = arith.constant 118 : index
    %401 = vector.load %arg9[%c0_495, %c118_496] : memref<16x512xbf16, #tpu.memory_space<vmem>>, vector<16x256xbf16>
    %c48_497 = arith.constant 48 : index
    %c0_498 = arith.constant 0 : index
    %402 = vector.load %arg10[%c48_497, %c0_498] : memref<176x256xbf16, #tpu.memory_space<vmem>>, vector<16x256xbf16>
    tpu.vector_store %arg10[%c48_497, %c0_498], %401 {strides = array<i32>} : memref<176x256xbf16, #tpu.memory_space<vmem>>, vector<16x256xbf16>,
    %c0_499 = arith.constant 0 : index
    %c123_500 = arith.constant 123 : index
    %403 = vector.load %arg9[%c0_499, %c123_500] : memref<16x512xbf16, #tpu.memory_space<vmem>>, vector<16x256xbf16>
    %c64_501 = arith.constant 64 : index
    %c0_502 = arith.constant 0 : index
    %404 = vector.load %arg10[%c64_501, %c0_502] : memref<176x256xbf16, #tpu.memory_space<vmem>>, vector<16x256xbf16>
    tpu.vector_store %arg10[%c64_501, %c0_502], %403 {strides = array<i32>} : memref<176x256xbf16, #tpu.memory_space<vmem>>, vector<16x256xbf16>,
    %c0_503 = arith.constant 0 : index
    %c128_504 = arith.constant 128 : index
    %405 = vector.load %arg9[%c0_503, %c128_504] : memref<16x512xbf16, #tpu.memory_space<vmem>>, vector<16x256xbf16>
    %c80_505 = arith.constant 80 : index
    %c0_506 = arith.constant 0 : index
    %406 = vector.load %arg10[%c80_505, %c0_506] : memref<176x256xbf16, #tpu.memory_space<vmem>>, vector<16x256xbf16>
    tpu.vector_store %arg10[%c80_505, %c0_506], %405 {strides = array<i32>} : memref<176x256xbf16, #tpu.memory_space<vmem>>, vector<16x256xbf16>,
    %c0_507 = arith.constant 0 : index
    %c133_508 = arith.constant 133 : index
    %407 = vector.load %arg9[%c0_507, %c133_508] : memref<16x512xbf16, #tpu.memory_space<vmem>>, vector<16x256xbf16>
    %c96_509 = arith.constant 96 : index
    %c0_510 = arith.constant 0 : index
    %408 = vector.load %arg10[%c96_509, %c0_510] : memref<176x256xbf16, #tpu.memory_space<vmem>>, vector<16x256xbf16>
    tpu.vector_store %arg10[%c96_509, %c0_510], %407 {strides = array<i32>} : memref<176x256xbf16, #tpu.memory_space<vmem>>, vector<16x256xbf16>,
    %c0_511 = arith.constant 0 : index
    %c138_512 = arith.constant 138 : index
    %409 = vector.load %arg9[%c0_511, %c138_512] : memref<16x512xbf16, #tpu.memory_space<vmem>>, vector<16x256xbf16>
    %c112_513 = arith.constant 112 : index
    %c0_514 = arith.constant 0 : index
    %410 = vector.load %arg10[%c112_513, %c0_514] : memref<176x256xbf16, #tpu.memory_space<vmem>>, vector<16x256xbf16>
    tpu.vector_store %arg10[%c112_513, %c0_514], %409 {strides = array<i32>} : memref<176x256xbf16, #tpu.memory_space<vmem>>, vector<16x256xbf16>,
    %c0_515 = arith.constant 0 : index
    %c143_516 = arith.constant 143 : index
    %411 = vector.load %arg9[%c0_515, %c143_516] : memref<16x512xbf16, #tpu.memory_space<vmem>>, vector<16x256xbf16>
    %c128_517 = arith.constant 128 : index
    %c0_518 = arith.constant 0 : index
    %412 = vector.load %arg10[%c128_517, %c0_518] : memref<176x256xbf16, #tpu.memory_space<vmem>>, vector<16x256xbf16>
    tpu.vector_store %arg10[%c128_517, %c0_518], %411 {strides = array<i32>} : memref<176x256xbf16, #tpu.memory_space<vmem>>, vector<16x256xbf16>,
    %c0_519 = arith.constant 0 : index
    %c148_520 = arith.constant 148 : index
    %413 = vector.load %arg9[%c0_519, %c148_520] : memref<16x512xbf16, #tpu.memory_space<vmem>>, vector<16x256xbf16>
    %c144_521 = arith.constant 144 : index
    %c0_522 = arith.constant 0 : index
    %414 = vector.load %arg10[%c144_521, %c0_522] : memref<176x256xbf16, #tpu.memory_space<vmem>>, vector<16x256xbf16>
    tpu.vector_store %arg10[%c144_521, %c0_522], %413 {strides = array<i32>} : memref<176x256xbf16, #tpu.memory_space<vmem>>, vector<16x256xbf16>,
    %c0_523 = arith.constant 0 : index
    %c153_524 = arith.constant 153 : index
    %415 = vector.load %arg9[%c0_523, %c153_524] : memref<16x512xbf16, #tpu.memory_space<vmem>>, vector<16x256xbf16>
    %c160_525 = arith.constant 160 : index
    %c0_526 = arith.constant 0 : index
    %416 = vector.load %arg10[%c160_525, %c0_526] : memref<176x256xbf16, #tpu.memory_space<vmem>>, vector<16x256xbf16>
    tpu.vector_store %arg10[%c160_525, %c0_526], %415 {strides = array<i32>} : memref<176x256xbf16, #tpu.memory_space<vmem>>, vector<16x256xbf16>,
    %c2_527 = arith.constant 2 : index
    %c0_528 = arith.constant 0 : index
    %c0_529 = arith.constant 0 : index
    %417 = vector.load %arg6[%c2_527, %c0_528, %c0_529] : memref<6x16x176xbf16, #tpu.memory_space<vmem>>, vector<1x16x176xbf16>
    %418 = vector.shape_cast %417 : vector<1x16x176xbf16> to vector<16x176xbf16>
    %c0_530 = arith.constant 0 : index
    %c0_531 = arith.constant 0 : index
    %419 = vector.load %arg10[%c0_530, %c0_531] : memref<176x256xbf16, #tpu.memory_space<vmem>>, vector<176x256xbf16>
    %cst_532 = arith.constant dense<0.000000e+00> : vector<16x256xf32>
    %420 = tpu.matmul %418, %419, %cst_532 {dimension_numbers = #tpu.dot_dimension_numbers<[1], [0], [0], [1], [0, 0, 1, 1], [], []>} : vector<16x176xbf16>, vector<176x256xbf16>, vector<16x256xf32> -> vector<16x256xf32>
    %c2_533 = arith.constant 2 : index
    %c0_534 = arith.constant 0 : index
    %c0_535 = arith.constant 0 : index
    %421 = vector.load %arg7[%c2_533, %c0_534, %c0_535] : memref<6x16x1xf32, #tpu.memory_space<vmem>>, vector<1x16x1xf32>
    %422 = vector.shape_cast %421 : vector<1x16x1xf32> to vector<16x1xf32>
    %423 = vector.broadcast %422 : vector<16x1xf32> to vector<16x256xf32>
    %424 = arith.addf %420, %423 : vector<16x256xf32>
    %cst_536 = arith.constant 0.000000e+00 : f32
    %425 = vector.broadcast %cst_536 : f32 to vector<16x256xf32>
    %426 = arith.cmpf ogt, %424, %425 : vector<16x256xf32>
    %cst_537 = arith.constant 0.00999999977 : f32
    %427 = vector.broadcast %cst_537 : f32 to vector<16x256xf32>
    %428 = arith.mulf %427, %424 : vector<16x256xf32>
    %429 = arith.select %426, %424, %428 : vector<16x256xi1>, vector<16x256xf32>
    %430 = arith.truncf %429 : vector<16x256xf32> to vector<16x256xbf16>
    %c0_538 = arith.constant 0 : index
    %c128_539 = arith.constant 128 : index
    %431 = vector.load %arg9[%c0_538, %c128_539] : memref<16x512xbf16, #tpu.memory_space<vmem>>, vector<16x256xbf16>
    tpu.vector_store %arg9[%c0_538, %c128_539], %430 {strides = array<i32>} : memref<16x512xbf16, #tpu.memory_space<vmem>>, vector<16x256xbf16>,
    %c0_540 = arith.constant 0 : index
    %c123_541 = arith.constant 123 : index
    %432 = vector.load %arg9[%c0_540, %c123_541] : memref<16x512xbf16, #tpu.memory_space<vmem>>, vector<16x256xbf16>
    %c0_542 = arith.constant 0 : index
    %c0_543 = arith.constant 0 : index
    %433 = vector.load %arg10[%c0_542, %c0_543] : memref<176x256xbf16, #tpu.memory_space<vmem>>, vector<16x256xbf16>
    tpu.vector_store %arg10[%c0_542, %c0_543], %432 {strides = array<i32>} : memref<176x256xbf16, #tpu.memory_space<vmem>>, vector<16x256xbf16>,
    %c0_544 = arith.constant 0 : index
    %c124_545 = arith.constant 124 : index
    %434 = vector.load %arg9[%c0_544, %c124_545] : memref<16x512xbf16, #tpu.memory_space<vmem>>, vector<16x256xbf16>
    %c16_546 = arith.constant 16 : index
    %c0_547 = arith.constant 0 : index
    %435 = vector.load %arg10[%c16_546, %c0_547] : memref<176x256xbf16, #tpu.memory_space<vmem>>, vector<16x256xbf16>
    tpu.vector_store %arg10[%c16_546, %c0_547], %434 {strides = array<i32>} : memref<176x256xbf16, #tpu.memory_space<vmem>>, vector<16x256xbf16>,
    %c0_548 = arith.constant 0 : index
    %c125_549 = arith.constant 125 : index
    %436 = vector.load %arg9[%c0_548, %c125_549] : memref<16x512xbf16, #tpu.memory_space<vmem>>, vector<16x256xbf16>
    %c32_550 = arith.constant 32 : index
    %c0_551 = arith.constant 0 : index
    %437 = vector.load %arg10[%c32_550, %c0_551] : memref<176x256xbf16, #tpu.memory_space<vmem>>, vector<16x256xbf16>
    tpu.vector_store %arg10[%c32_550, %c0_551], %436 {strides = array<i32>} : memref<176x256xbf16, #tpu.memory_space<vmem>>, vector<16x256xbf16>,
    %c0_552 = arith.constant 0 : index
    %c126_553 = arith.constant 126 : index
    %438 = vector.load %arg9[%c0_552, %c126_553] : memref<16x512xbf16, #tpu.memory_space<vmem>>, vector<16x256xbf16>
    %c48_554 = arith.constant 48 : index
    %c0_555 = arith.constant 0 : index
    %439 = vector.load %arg10[%c48_554, %c0_555] : memref<176x256xbf16, #tpu.memory_space<vmem>>, vector<16x256xbf16>
    tpu.vector_store %arg10[%c48_554, %c0_555], %438 {strides = array<i32>} : memref<176x256xbf16, #tpu.memory_space<vmem>>, vector<16x256xbf16>,
    %c0_556 = arith.constant 0 : index
    %c127_557 = arith.constant 127 : index
    %440 = vector.load %arg9[%c0_556, %c127_557] : memref<16x512xbf16, #tpu.memory_space<vmem>>, vector<16x256xbf16>
    %c64_558 = arith.constant 64 : index
    %c0_559 = arith.constant 0 : index
    %441 = vector.load %arg10[%c64_558, %c0_559] : memref<176x256xbf16, #tpu.memory_space<vmem>>, vector<16x256xbf16>
    tpu.vector_store %arg10[%c64_558, %c0_559], %440 {strides = array<i32>} : memref<176x256xbf16, #tpu.memory_space<vmem>>, vector<16x256xbf16>,
    %c0_560 = arith.constant 0 : index
    %c128_561 = arith.constant 128 : index
    %442 = vector.load %arg9[%c0_560, %c128_561] : memref<16x512xbf16, #tpu.memory_space<vmem>>, vector<16x256xbf16>
    %c80_562 = arith.constant 80 : index
    %c0_563 = arith.constant 0 : index
    %443 = vector.load %arg10[%c80_562, %c0_563] : memref<176x256xbf16, #tpu.memory_space<vmem>>, vector<16x256xbf16>
    tpu.vector_store %arg10[%c80_562, %c0_563], %442 {strides = array<i32>} : memref<176x256xbf16, #tpu.memory_space<vmem>>, vector<16x256xbf16>,
    %c0_564 = arith.constant 0 : index
    %c129_565 = arith.constant 129 : index
    %444 = vector.load %arg9[%c0_564, %c129_565] : memref<16x512xbf16, #tpu.memory_space<vmem>>, vector<16x256xbf16>
    %c96_566 = arith.constant 96 : index
    %c0_567 = arith.constant 0 : index
    %445 = vector.load %arg10[%c96_566, %c0_567] : memref<176x256xbf16, #tpu.memory_space<vmem>>, vector<16x256xbf16>
    tpu.vector_store %arg10[%c96_566, %c0_567], %444 {strides = array<i32>} : memref<176x256xbf16, #tpu.memory_space<vmem>>, vector<16x256xbf16>,
    %c0_568 = arith.constant 0 : index
    %c130_569 = arith.constant 130 : index
    %446 = vector.load %arg9[%c0_568, %c130_569] : memref<16x512xbf16, #tpu.memory_space<vmem>>, vector<16x256xbf16>
    %c112_570 = arith.constant 112 : index
    %c0_571 = arith.constant 0 : index
    %447 = vector.load %arg10[%c112_570, %c0_571] : memref<176x256xbf16, #tpu.memory_space<vmem>>, vector<16x256xbf16>
    tpu.vector_store %arg10[%c112_570, %c0_571], %446 {strides = array<i32>} : memref<176x256xbf16, #tpu.memory_space<vmem>>, vector<16x256xbf16>,
    %c0_572 = arith.constant 0 : index
    %c131_573 = arith.constant 131 : index
    %448 = vector.load %arg9[%c0_572, %c131_573] : memref<16x512xbf16, #tpu.memory_space<vmem>>, vector<16x256xbf16>
    %c128_574 = arith.constant 128 : index
    %c0_575 = arith.constant 0 : index
    %449 = vector.load %arg10[%c128_574, %c0_575] : memref<176x256xbf16, #tpu.memory_space<vmem>>, vector<16x256xbf16>
    tpu.vector_store %arg10[%c128_574, %c0_575], %448 {strides = array<i32>} : memref<176x256xbf16, #tpu.memory_space<vmem>>, vector<16x256xbf16>,
    %c0_576 = arith.constant 0 : index
    %c132_577 = arith.constant 132 : index
    %450 = vector.load %arg9[%c0_576, %c132_577] : memref<16x512xbf16, #tpu.memory_space<vmem>>, vector<16x256xbf16>
    %c144_578 = arith.constant 144 : index
    %c0_579 = arith.constant 0 : index
    %451 = vector.load %arg10[%c144_578, %c0_579] : memref<176x256xbf16, #tpu.memory_space<vmem>>, vector<16x256xbf16>
    tpu.vector_store %arg10[%c144_578, %c0_579], %450 {strides = array<i32>} : memref<176x256xbf16, #tpu.memory_space<vmem>>, vector<16x256xbf16>,
    %c0_580 = arith.constant 0 : index
    %c133_581 = arith.constant 133 : index
    %452 = vector.load %arg9[%c0_580, %c133_581] : memref<16x512xbf16, #tpu.memory_space<vmem>>, vector<16x256xbf16>
    %c160_582 = arith.constant 160 : index
    %c0_583 = arith.constant 0 : index
    %453 = vector.load %arg10[%c160_582, %c0_583] : memref<176x256xbf16, #tpu.memory_space<vmem>>, vector<16x256xbf16>
    tpu.vector_store %arg10[%c160_582, %c0_583], %452 {strides = array<i32>} : memref<176x256xbf16, #tpu.memory_space<vmem>>, vector<16x256xbf16>,
    %c3_584 = arith.constant 3 : index
    %c0_585 = arith.constant 0 : index
    %c0_586 = arith.constant 0 : index
    %454 = vector.load %arg6[%c3_584, %c0_585, %c0_586] : memref<6x16x176xbf16, #tpu.memory_space<vmem>>, vector<1x16x176xbf16>
    %455 = vector.shape_cast %454 : vector<1x16x176xbf16> to vector<16x176xbf16>
    %c0_587 = arith.constant 0 : index
    %c0_588 = arith.constant 0 : index
    %456 = vector.load %arg10[%c0_587, %c0_588] : memref<176x256xbf16, #tpu.memory_space<vmem>>, vector<176x256xbf16>
    %cst_589 = arith.constant dense<0.000000e+00> : vector<16x256xf32>
    %457 = tpu.matmul %455, %456, %cst_589 {dimension_numbers = #tpu.dot_dimension_numbers<[1], [0], [0], [1], [0, 0, 1, 1], [], []>} : vector<16x176xbf16>, vector<176x256xbf16>, vector<16x256xf32> -> vector<16x256xf32>
    %c3_590 = arith.constant 3 : index
    %c0_591 = arith.constant 0 : index
    %c0_592 = arith.constant 0 : index
    %458 = vector.load %arg7[%c3_590, %c0_591, %c0_592] : memref<6x16x1xf32, #tpu.memory_space<vmem>>, vector<1x16x1xf32>
    %459 = vector.shape_cast %458 : vector<1x16x1xf32> to vector<16x1xf32>
    %460 = vector.broadcast %459 : vector<16x1xf32> to vector<16x256xf32>
    %461 = arith.addf %457, %460 : vector<16x256xf32>
    %462 = arith.addf %387, %461 : vector<16x256xf32>
    %cst_593 = arith.constant 0.000000e+00 : f32
    %463 = vector.broadcast %cst_593 : f32 to vector<16x256xf32>
    %464 = arith.cmpf ogt, %462, %463 : vector<16x256xf32>
    %cst_594 = arith.constant 0.00999999977 : f32
    %465 = vector.broadcast %cst_594 : f32 to vector<16x256xf32>
    %466 = arith.mulf %465, %462 : vector<16x256xf32>
    %467 = arith.select %464, %462, %466 : vector<16x256xi1>, vector<16x256xf32>
    %468 = arith.truncf %467 : vector<16x256xf32> to vector<16x256xbf16>
    %c0_595 = arith.constant 0 : index
    %c128_596 = arith.constant 128 : index
    %469 = vector.load %arg9[%c0_595, %c128_596] : memref<16x512xbf16, #tpu.memory_space<vmem>>, vector<16x256xbf16>
    tpu.vector_store %arg9[%c0_595, %c128_596], %468 {strides = array<i32>} : memref<16x512xbf16, #tpu.memory_space<vmem>>, vector<16x256xbf16>,
    %c0_597 = arith.constant 0 : index
    %c103_598 = arith.constant 103 : index
    %470 = vector.load %arg9[%c0_597, %c103_598] : memref<16x512xbf16, #tpu.memory_space<vmem>>, vector<16x256xbf16>
    %c0_599 = arith.constant 0 : index
    %c0_600 = arith.constant 0 : index
    %471 = vector.load %arg10[%c0_599, %c0_600] : memref<176x256xbf16, #tpu.memory_space<vmem>>, vector<16x256xbf16>
    tpu.vector_store %arg10[%c0_599, %c0_600], %470 {strides = array<i32>} : memref<176x256xbf16, #tpu.memory_space<vmem>>, vector<16x256xbf16>,
    %c0_601 = arith.constant 0 : index
    %c108_602 = arith.constant 108 : index
    %472 = vector.load %arg9[%c0_601, %c108_602] : memref<16x512xbf16, #tpu.memory_space<vmem>>, vector<16x256xbf16>
    %c16_603 = arith.constant 16 : index
    %c0_604 = arith.constant 0 : index
    %473 = vector.load %arg10[%c16_603, %c0_604] : memref<176x256xbf16, #tpu.memory_space<vmem>>, vector<16x256xbf16>
    tpu.vector_store %arg10[%c16_603, %c0_604], %472 {strides = array<i32>} : memref<176x256xbf16, #tpu.memory_space<vmem>>, vector<16x256xbf16>,
    %c0_605 = arith.constant 0 : index
    %c113_606 = arith.constant 113 : index
    %474 = vector.load %arg9[%c0_605, %c113_606] : memref<16x512xbf16, #tpu.memory_space<vmem>>, vector<16x256xbf16>
    %c32_607 = arith.constant 32 : index
    %c0_608 = arith.constant 0 : index
    %475 = vector.load %arg10[%c32_607, %c0_608] : memref<176x256xbf16, #tpu.memory_space<vmem>>, vector<16x256xbf16>
    tpu.vector_store %arg10[%c32_607, %c0_608], %474 {strides = array<i32>} : memref<176x256xbf16, #tpu.memory_space<vmem>>, vector<16x256xbf16>,
    %c0_609 = arith.constant 0 : index
    %c118_610 = arith.constant 118 : index
    %476 = vector.load %arg9[%c0_609, %c118_610] : memref<16x512xbf16, #tpu.memory_space<vmem>>, vector<16x256xbf16>
    %c48_611 = arith.constant 48 : index
    %c0_612 = arith.constant 0 : index
    %477 = vector.load %arg10[%c48_611, %c0_612] : memref<176x256xbf16, #tpu.memory_space<vmem>>, vector<16x256xbf16>
    tpu.vector_store %arg10[%c48_611, %c0_612], %476 {strides = array<i32>} : memref<176x256xbf16, #tpu.memory_space<vmem>>, vector<16x256xbf16>,
    %c0_613 = arith.constant 0 : index
    %c123_614 = arith.constant 123 : index
    %478 = vector.load %arg9[%c0_613, %c123_614] : memref<16x512xbf16, #tpu.memory_space<vmem>>, vector<16x256xbf16>
    %c64_615 = arith.constant 64 : index
    %c0_616 = arith.constant 0 : index
    %479 = vector.load %arg10[%c64_615, %c0_616] : memref<176x256xbf16, #tpu.memory_space<vmem>>, vector<16x256xbf16>
    tpu.vector_store %arg10[%c64_615, %c0_616], %478 {strides = array<i32>} : memref<176x256xbf16, #tpu.memory_space<vmem>>, vector<16x256xbf16>,
    %c0_617 = arith.constant 0 : index
    %c128_618 = arith.constant 128 : index
    %480 = vector.load %arg9[%c0_617, %c128_618] : memref<16x512xbf16, #tpu.memory_space<vmem>>, vector<16x256xbf16>
    %c80_619 = arith.constant 80 : index
    %c0_620 = arith.constant 0 : index
    %481 = vector.load %arg10[%c80_619, %c0_620] : memref<176x256xbf16, #tpu.memory_space<vmem>>, vector<16x256xbf16>
    tpu.vector_store %arg10[%c80_619, %c0_620], %480 {strides = array<i32>} : memref<176x256xbf16, #tpu.memory_space<vmem>>, vector<16x256xbf16>,
    %c0_621 = arith.constant 0 : index
    %c133_622 = arith.constant 133 : index
    %482 = vector.load %arg9[%c0_621, %c133_622] : memref<16x512xbf16, #tpu.memory_space<vmem>>, vector<16x256xbf16>
    %c96_623 = arith.constant 96 : index
    %c0_624 = arith.constant 0 : index
    %483 = vector.load %arg10[%c96_623, %c0_624] : memref<176x256xbf16, #tpu.memory_space<vmem>>, vector<16x256xbf16>
    tpu.vector_store %arg10[%c96_623, %c0_624], %482 {strides = array<i32>} : memref<176x256xbf16, #tpu.memory_space<vmem>>, vector<16x256xbf16>,
    %c0_625 = arith.constant 0 : index
    %c138_626 = arith.constant 138 : index
    %484 = vector.load %arg9[%c0_625, %c138_626] : memref<16x512xbf16, #tpu.memory_space<vmem>>, vector<16x256xbf16>
    %c112_627 = arith.constant 112 : index
    %c0_628 = arith.constant 0 : index
    %485 = vector.load %arg10[%c112_627, %c0_628] : memref<176x256xbf16, #tpu.memory_space<vmem>>, vector<16x256xbf16>
    tpu.vector_store %arg10[%c112_627, %c0_628], %484 {strides = array<i32>} : memref<176x256xbf16, #tpu.memory_space<vmem>>, vector<16x256xbf16>,
    %c0_629 = arith.constant 0 : index
    %c143_630 = arith.constant 143 : index
    %486 = vector.load %arg9[%c0_629, %c143_630] : memref<16x512xbf16, #tpu.memory_space<vmem>>, vector<16x256xbf16>
    %c128_631 = arith.constant 128 : index
    %c0_632 = arith.constant 0 : index
    %487 = vector.load %arg10[%c128_631, %c0_632] : memref<176x256xbf16, #tpu.memory_space<vmem>>, vector<16x256xbf16>
    tpu.vector_store %arg10[%c128_631, %c0_632], %486 {strides = array<i32>} : memref<176x256xbf16, #tpu.memory_space<vmem>>, vector<16x256xbf16>,
    %c0_633 = arith.constant 0 : index
    %c148_634 = arith.constant 148 : index
    %488 = vector.load %arg9[%c0_633, %c148_634] : memref<16x512xbf16, #tpu.memory_space<vmem>>, vector<16x256xbf16>
    %c144_635 = arith.constant 144 : index
    %c0_636 = arith.constant 0 : index
    %489 = vector.load %arg10[%c144_635, %c0_636] : memref<176x256xbf16, #tpu.memory_space<vmem>>, vector<16x256xbf16>
    tpu.vector_store %arg10[%c144_635, %c0_636], %488 {strides = array<i32>} : memref<176x256xbf16, #tpu.memory_space<vmem>>, vector<16x256xbf16>,
    %c0_637 = arith.constant 0 : index
    %c153_638 = arith.constant 153 : index
    %490 = vector.load %arg9[%c0_637, %c153_638] : memref<16x512xbf16, #tpu.memory_space<vmem>>, vector<16x256xbf16>
    %c160_639 = arith.constant 160 : index
    %c0_640 = arith.constant 0 : index
    %491 = vector.load %arg10[%c160_639, %c0_640] : memref<176x256xbf16, #tpu.memory_space<vmem>>, vector<16x256xbf16>
    tpu.vector_store %arg10[%c160_639, %c0_640], %490 {strides = array<i32>} : memref<176x256xbf16, #tpu.memory_space<vmem>>, vector<16x256xbf16>,
    %c4_641 = arith.constant 4 : index
    %c0_642 = arith.constant 0 : index
    %c0_643 = arith.constant 0 : index
    %492 = vector.load %arg6[%c4_641, %c0_642, %c0_643] : memref<6x16x176xbf16, #tpu.memory_space<vmem>>, vector<1x16x176xbf16>
    %493 = vector.shape_cast %492 : vector<1x16x176xbf16> to vector<16x176xbf16>
    %c0_644 = arith.constant 0 : index
    %c0_645 = arith.constant 0 : index
    %494 = vector.load %arg10[%c0_644, %c0_645] : memref<176x256xbf16, #tpu.memory_space<vmem>>, vector<176x256xbf16>
    %cst_646 = arith.constant dense<0.000000e+00> : vector<16x256xf32>
    %495 = tpu.matmul %493, %494, %cst_646 {dimension_numbers = #tpu.dot_dimension_numbers<[1], [0], [0], [1], [0, 0, 1, 1], [], []>} : vector<16x176xbf16>, vector<176x256xbf16>, vector<16x256xf32> -> vector<16x256xf32>
    %c4_647 = arith.constant 4 : index
    %c0_648 = arith.constant 0 : index
    %c0_649 = arith.constant 0 : index
    %496 = vector.load %arg7[%c4_647, %c0_648, %c0_649] : memref<6x16x1xf32, #tpu.memory_space<vmem>>, vector<1x16x1xf32>
    %497 = vector.shape_cast %496 : vector<1x16x1xf32> to vector<16x1xf32>
    %498 = vector.broadcast %497 : vector<16x1xf32> to vector<16x256xf32>
    %499 = arith.addf %495, %498 : vector<16x256xf32>
    %cst_650 = arith.constant 0.000000e+00 : f32
    %500 = vector.broadcast %cst_650 : f32 to vector<16x256xf32>
    %501 = arith.cmpf ogt, %499, %500 : vector<16x256xf32>
    %cst_651 = arith.constant 0.00999999977 : f32
    %502 = vector.broadcast %cst_651 : f32 to vector<16x256xf32>
    %503 = arith.mulf %502, %499 : vector<16x256xf32>
    %504 = arith.select %501, %499, %503 : vector<16x256xi1>, vector<16x256xf32>
    %505 = arith.truncf %504 : vector<16x256xf32> to vector<16x256xbf16>
    %c0_652 = arith.constant 0 : index
    %c128_653 = arith.constant 128 : index
    %506 = vector.load %arg9[%c0_652, %c128_653] : memref<16x512xbf16, #tpu.memory_space<vmem>>, vector<16x256xbf16>
    tpu.vector_store %arg9[%c0_652, %c128_653], %505 {strides = array<i32>} : memref<16x512xbf16, #tpu.memory_space<vmem>>, vector<16x256xbf16>,
    %c0_654 = arith.constant 0 : index
    %c123_655 = arith.constant 123 : index
    %507 = vector.load %arg9[%c0_654, %c123_655] : memref<16x512xbf16, #tpu.memory_space<vmem>>, vector<16x256xbf16>
    %c0_656 = arith.constant 0 : index
    %c0_657 = arith.constant 0 : index
    %508 = vector.load %arg10[%c0_656, %c0_657] : memref<176x256xbf16, #tpu.memory_space<vmem>>, vector<16x256xbf16>
    tpu.vector_store %arg10[%c0_656, %c0_657], %507 {strides = array<i32>} : memref<176x256xbf16, #tpu.memory_space<vmem>>, vector<16x256xbf16>,
    %c0_658 = arith.constant 0 : index
    %c124_659 = arith.constant 124 : index
    %509 = vector.load %arg9[%c0_658, %c124_659] : memref<16x512xbf16, #tpu.memory_space<vmem>>, vector<16x256xbf16>
    %c16_660 = arith.constant 16 : index
    %c0_661 = arith.constant 0 : index
    %510 = vector.load %arg10[%c16_660, %c0_661] : memref<176x256xbf16, #tpu.memory_space<vmem>>, vector<16x256xbf16>
    tpu.vector_store %arg10[%c16_660, %c0_661], %509 {strides = array<i32>} : memref<176x256xbf16, #tpu.memory_space<vmem>>, vector<16x256xbf16>,
    %c0_662 = arith.constant 0 : index
    %c125_663 = arith.constant 125 : index
    %511 = vector.load %arg9[%c0_662, %c125_663] : memref<16x512xbf16, #tpu.memory_space<vmem>>, vector<16x256xbf16>
    %c32_664 = arith.constant 32 : index
    %c0_665 = arith.constant 0 : index
    %512 = vector.load %arg10[%c32_664, %c0_665] : memref<176x256xbf16, #tpu.memory_space<vmem>>, vector<16x256xbf16>
    tpu.vector_store %arg10[%c32_664, %c0_665], %511 {strides = array<i32>} : memref<176x256xbf16, #tpu.memory_space<vmem>>, vector<16x256xbf16>,
    %c0_666 = arith.constant 0 : index
    %c126_667 = arith.constant 126 : index
    %513 = vector.load %arg9[%c0_666, %c126_667] : memref<16x512xbf16, #tpu.memory_space<vmem>>, vector<16x256xbf16>
    %c48_668 = arith.constant 48 : index
    %c0_669 = arith.constant 0 : index
    %514 = vector.load %arg10[%c48_668, %c0_669] : memref<176x256xbf16, #tpu.memory_space<vmem>>, vector<16x256xbf16>
    tpu.vector_store %arg10[%c48_668, %c0_669], %513 {strides = array<i32>} : memref<176x256xbf16, #tpu.memory_space<vmem>>, vector<16x256xbf16>,
    %c0_670 = arith.constant 0 : index
    %c127_671 = arith.constant 127 : index
    %515 = vector.load %arg9[%c0_670, %c127_671] : memref<16x512xbf16, #tpu.memory_space<vmem>>, vector<16x256xbf16>
    %c64_672 = arith.constant 64 : index
    %c0_673 = arith.constant 0 : index
    %516 = vector.load %arg10[%c64_672, %c0_673] : memref<176x256xbf16, #tpu.memory_space<vmem>>, vector<16x256xbf16>
    tpu.vector_store %arg10[%c64_672, %c0_673], %515 {strides = array<i32>} : memref<176x256xbf16, #tpu.memory_space<vmem>>, vector<16x256xbf16>,
    %c0_674 = arith.constant 0 : index
    %c128_675 = arith.constant 128 : index
    %517 = vector.load %arg9[%c0_674, %c128_675] : memref<16x512xbf16, #tpu.memory_space<vmem>>, vector<16x256xbf16>
    %c80_676 = arith.constant 80 : index
    %c0_677 = arith.constant 0 : index
    %518 = vector.load %arg10[%c80_676, %c0_677] : memref<176x256xbf16, #tpu.memory_space<vmem>>, vector<16x256xbf16>
    tpu.vector_store %arg10[%c80_676, %c0_677], %517 {strides = array<i32>} : memref<176x256xbf16, #tpu.memory_space<vmem>>, vector<16x256xbf16>,
    %c0_678 = arith.constant 0 : index
    %c129_679 = arith.constant 129 : index
    %519 = vector.load %arg9[%c0_678, %c129_679] : memref<16x512xbf16, #tpu.memory_space<vmem>>, vector<16x256xbf16>
    %c96_680 = arith.constant 96 : index
    %c0_681 = arith.constant 0 : index
    %520 = vector.load %arg10[%c96_680, %c0_681] : memref<176x256xbf16, #tpu.memory_space<vmem>>, vector<16x256xbf16>
    tpu.vector_store %arg10[%c96_680, %c0_681], %519 {strides = array<i32>} : memref<176x256xbf16, #tpu.memory_space<vmem>>, vector<16x256xbf16>,
    %c0_682 = arith.constant 0 : index
    %c130_683 = arith.constant 130 : index
    %521 = vector.load %arg9[%c0_682, %c130_683] : memref<16x512xbf16, #tpu.memory_space<vmem>>, vector<16x256xbf16>
    %c112_684 = arith.constant 112 : index
    %c0_685 = arith.constant 0 : index
    %522 = vector.load %arg10[%c112_684, %c0_685] : memref<176x256xbf16, #tpu.memory_space<vmem>>, vector<16x256xbf16>
    tpu.vector_store %arg10[%c112_684, %c0_685], %521 {strides = array<i32>} : memref<176x256xbf16, #tpu.memory_space<vmem>>, vector<16x256xbf16>,
    %c0_686 = arith.constant 0 : index
    %c131_687 = arith.constant 131 : index
    %523 = vector.load %arg9[%c0_686, %c131_687] : memref<16x512xbf16, #tpu.memory_space<vmem>>, vector<16x256xbf16>
    %c128_688 = arith.constant 128 : index
    %c0_689 = arith.constant 0 : index
    %524 = vector.load %arg10[%c128_688, %c0_689] : memref<176x256xbf16, #tpu.memory_space<vmem>>, vector<16x256xbf16>
    tpu.vector_store %arg10[%c128_688, %c0_689], %523 {strides = array<i32>} : memref<176x256xbf16, #tpu.memory_space<vmem>>, vector<16x256xbf16>,
    %c0_690 = arith.constant 0 : index
    %c132_691 = arith.constant 132 : index
    %525 = vector.load %arg9[%c0_690, %c132_691] : memref<16x512xbf16, #tpu.memory_space<vmem>>, vector<16x256xbf16>
    %c144_692 = arith.constant 144 : index
    %c0_693 = arith.constant 0 : index
    %526 = vector.load %arg10[%c144_692, %c0_693] : memref<176x256xbf16, #tpu.memory_space<vmem>>, vector<16x256xbf16>
    tpu.vector_store %arg10[%c144_692, %c0_693], %525 {strides = array<i32>} : memref<176x256xbf16, #tpu.memory_space<vmem>>, vector<16x256xbf16>,
    %c0_694 = arith.constant 0 : index
    %c133_695 = arith.constant 133 : index
    %527 = vector.load %arg9[%c0_694, %c133_695] : memref<16x512xbf16, #tpu.memory_space<vmem>>, vector<16x256xbf16>
    %c160_696 = arith.constant 160 : index
    %c0_697 = arith.constant 0 : index
    %528 = vector.load %arg10[%c160_696, %c0_697] : memref<176x256xbf16, #tpu.memory_space<vmem>>, vector<16x256xbf16>
    tpu.vector_store %arg10[%c160_696, %c0_697], %527 {strides = array<i32>} : memref<176x256xbf16, #tpu.memory_space<vmem>>, vector<16x256xbf16>,
    %c5_698 = arith.constant 5 : index
    %c0_699 = arith.constant 0 : index
    %c0_700 = arith.constant 0 : index
    %529 = vector.load %arg6[%c5_698, %c0_699, %c0_700] : memref<6x16x176xbf16, #tpu.memory_space<vmem>>, vector<1x16x176xbf16>
    %530 = vector.shape_cast %529 : vector<1x16x176xbf16> to vector<16x176xbf16>
    %c0_701 = arith.constant 0 : index
    %c0_702 = arith.constant 0 : index
    %531 = vector.load %arg10[%c0_701, %c0_702] : memref<176x256xbf16, #tpu.memory_space<vmem>>, vector<176x256xbf16>
    %cst_703 = arith.constant dense<0.000000e+00> : vector<16x256xf32>
    %532 = tpu.matmul %530, %531, %cst_703 {dimension_numbers = #tpu.dot_dimension_numbers<[1], [0], [0], [1], [0, 0, 1, 1], [], []>} : vector<16x176xbf16>, vector<176x256xbf16>, vector<16x256xf32> -> vector<16x256xf32>
    %c5_704 = arith.constant 5 : index
    %c0_705 = arith.constant 0 : index
    %c0_706 = arith.constant 0 : index
    %533 = vector.load %arg7[%c5_704, %c0_705, %c0_706] : memref<6x16x1xf32, #tpu.memory_space<vmem>>, vector<1x16x1xf32>
    %534 = vector.shape_cast %533 : vector<1x16x1xf32> to vector<16x1xf32>
    %535 = vector.broadcast %534 : vector<16x1xf32> to vector<16x256xf32>
    %536 = arith.addf %532, %535 : vector<16x256xf32>
    %537 = arith.addf %462, %536 : vector<16x256xf32>
    %538 = arith.addf %312, %537 : vector<16x256xf32>
    %c0_707 = arith.constant 0 : index
    %c0_708 = arith.constant 0 : index
    %c0_709 = arith.constant 0 : index
    %539 = vector.load %arg8[%c0_707, %c0_708, %c0_709] : memref<1x16x256xf32, #tpu.memory_space<vmem>>, vector<1x16x256xf32>
    %540 = vector.shape_cast %539 : vector<1x16x256xf32> to vector<16x256xf32>
    %541 = vector.shape_cast %538 : vector<16x256xf32> to vector<1x16x256xf32>
    tpu.vector_store %arg8[%c0_707, %c0_708, %c0_709], %541 {strides = array<i32>} : memref<1x16x256xf32, #tpu.memory_space<vmem>>, vector<1x16x256xf32>,
    return
  }
  func.func @transform_0(%arg0: i32) -> (i32, i32, i32) {
    %c0_i32 = arith.constant 0 : i32
    %c0_i32_0 = arith.constant 0 : i32
    %c0_i32_1 = arith.constant 0 : i32
    return %arg0, %c0_i32, %c0_i32_0 : i32, i32, i32
  }
  func.func @transform_1(%arg0: i32) -> (i32, i32, i32) {
    %c0_i32 = arith.constant 0 : i32
    %c0_i32_0 = arith.constant 0 : i32
    %c0_i32_1 = arith.constant 0 : i32
    %c0_i32_2 = arith.constant 0 : i32
    return %c0_i32, %c0_i32_0, %c0_i32_1 : i32, i32, i32
  }
  func.func @transform_2(%arg0: i32) -> (i32, i32, i32) {
    %c0_i32 = arith.constant 0 : i32
    %c0_i32_0 = arith.constant 0 : i32
    %c0_i32_1 = arith.constant 0 : i32
    %c0_i32_2 = arith.constant 0 : i32
    return %c0_i32, %c0_i32_0, %c0_i32_1 : i32, i32, i32
  }
  func.func @transform_3(%arg0: i32) -> (i32, i32, i32) {
    %c0_i32 = arith.constant 0 : i32
    %c0_i32_0 = arith.constant 0 : i32
    %c0_i32_1 = arith.constant 0 : i32
    %c0_i32_2 = arith.constant 0 : i32
    return %c0_i32, %c0_i32_0, %c0_i32_1 : i32, i32, i32
  }
  func.func @transform_4(%arg0: i32) -> (i32, i32, i32) {
    %c0_i32 = arith.constant 0 : i32
    %c0_i32_0 = arith.constant 0 : i32
    %c0_i32_1 = arith.constant 0 : i32
    %c0_i32_2 = arith.constant 0 : i32
    return %c0_i32, %c0_i32_0, %c0_i32_1 : i32, i32, i32
  }
  func.func @transform_5(%arg0: i32) -> (i32, i32, i32) {
    %c0_i32 = arith.constant 0 : i32
    %c0_i32_0 = arith.constant 0 : i32
    %c0_i32_1 = arith.constant 0 : i32
    %c0_i32_2 = arith.constant 0 : i32
    return %c0_i32, %c0_i32_0, %c0_i32_1 : i32, i32, i32
  }
  func.func @transform_6(%arg0: i32) -> (i32, i32, i32) {
    %c0_i32 = arith.constant 0 : i32
    %c0_i32_0 = arith.constant 0 : i32
    %c0_i32_1 = arith.constant 0 : i32
    %c0_i32_2 = arith.constant 0 : i32
    return %c0_i32, %c0_i32_0, %c0_i32_1 : i32, i32, i32
  }
  func.func @transform_7(%arg0: i32) -> (i32, i32, i32) {
    %c0_i32 = arith.constant 0 : i32
    %c0_i32_0 = arith.constant 0 : i32
    %c0_i32_1 = arith.constant 0 : i32
    return %arg0, %c0_i32, %c0_i32_0 : i32, i32, i32
  }
}

</mosaic_0001>

<bundles_post_ra>
// kernel: tpu_custom_call.1
= control target key start
LH: loop header
LB: loop body
LE: loop exit
PB: predicated region body
PF: predicated region fallthrough
CT: control target
= control target key end

     0   :  { %s5987_s0 = inlined_call_operand.vmem [shape: f32[2,16,256], index: 0, kind: input, shape index: {}]   ;;  %s5988_s1 = inlined_call_operand.vmem [shape: bf16[6,16,48], index: 1, kind: input, shape index: {}]   ;;  %s5989_s2 = inlined_call_operand.vmem [shape: f32[6,16,1], index: 2, kind: input, shape index: {}]   ;;  %s5990_s3 = inlined_call_operand.vmem [shape: bf16[6,16,112], index: 3, kind: input, shape index: {}]   ;;  %s5991_s4 = inlined_call_operand.vmem [shape: f32[6,16,1], index: 4, kind: input, shape index: {}]   ;;  %s5992_s5 = inlined_call_operand.vmem [shape: bf16[6,16,176], index: 5, kind: input, shape index: {}]   ;;  %s5993_s6 = inlined_call_operand.vmem [shape: f32[6,16,1], index: 6, kind: input, shape index: {}]   ;;  %s5994_s7 = inlined_call_operand.hbm [shape: f32[2,16,256], index: 7, kind: output, shape index: {}]  }
   0x1   :  { %6043 = sst [smem:[#allocation10_spill]] %s5987_s0 }
   0x2   :  { %6044 = sst [smem:[#allocation11_spill]] %s5988_s1 }
   0x3   :  { %6045 = sst [smem:[#allocation12_spill]] %s5990_s3 }
   0x4   :  { %12 = vsyncpa [#allocation5], 0 }
   0x5   :  { %14 = vsyncpa [#allocation5 + $0x1], 0  ;;  %s4568_s24 = smov 0   ;;  %s4570_s25 = smov 0  }
   0x6   :  { %s4572_s26 = smov 0   ;;  %s4574_s27 = smov 0  }
   0x7 LB: > { %6046 = sst [smem:[#allocation7_spill]] %s4496_s26  ;;  %s4589_s28 = sadd.s32 4294967295, %s4500_s27   ;;  %s4500_s27 = sphi %s4574_s27, %s6106_s27   ;;  %s4496_s26 = sphi %s4572_s26, %s6111_s26   ;;  %s4492_s25 = sphi %s4570_s25, %s6110_s25   ;;  %s4488_s24 = sphi %s4568_s24, %s6109_s24  }
   0x8   : > { %s4186_s29 = sadd.s32 4294967294, %s4500_s27   ;;  %s4593_s30 = sadd.s32 1, %s4500_s27  }
   0x9   : > { %6047 = sst [smem:[#allocation8_spill]] %s4593_s30  ;;  %s179_s8 = sadd.s32 1, %s4496_s26 }
   0xa   : > { %s176_s9 = ssub.s32 %s4500_s27, %s4593_s30  ;;  %p189_p0 = scmp.ne.s32.totalorder %s4496_s26, %s4492_s25 }
   0xb   : > { %p177_p1 = scmp.eq.s32.totalorder %s176_s9, 0  ;;  %p190_p2 = scmp.eq.s32.totalorder %s4589_s28, 1 }
   0xc   : > { %p195_p3 = scmp.ne.s32.totalorder %s4492_s25, %s4488_s24  ;;  %p196_p4 = scmp.eq.s32.totalorder %s4186_s29, 1 }
   0xd   : > { %s4604_s10 = scalar_select %p177_p1, %s4496_s26, %s179_s8  }
   0xe   : > { %p4606_p5 = por %p190_p2, %p189_p0  ;;  %p4610_p6 = por %p196_p4, %p195_p3 }
   0xf   : > { %6048 = sst [smem:[#allocation9_spill]] %s4604_s10  ;;  %p4189_p7 = scmp.ge.s32.totalorder %s4500_s27, 1 }
  0x10   : > { %p240_p8 = scmp.lt.s32.totalorder %s4500_s27, 3 }
  0x12   : > { %p241_p9 = pnand %p4189_p7, %p240_p8 }
  0x13   : > { %vm278_vm0 = vcmask (!%p241_p9), 1048320   ;;  %p272_p10 = scmp.lt.s32.totalorder (!%p241_p9), %s4589_s28, 1  ;;  %vm280_vm1 = vcmask (!%p241_p9), 261120   ;;  %v4502_v0 = vmov (!%p241_p9), 0   ;;  %s6051_s0 = sld [smem:[#allocation10_spill]] (!%p241_p9)  ;;  %v353_v17 = vld [vmem:[%s5989_s2 + $0x8] sm:$0xff] (!%p241_p9) }
  0x14   : > { %244 = sbr.rel (%p241_p9) target bundleno = 5396 (0x1514), region = 48  ;;  %279 = vst.msk [vmem:[#allocation2] sm:$0xff] (!%p241_p9), %vm278_vm0, %v4502_v0  ;;  %405 = vmatprep.mubr.bf16.mxu0 (!%p241_p9), %v4502_v0  ;;  %4398 = vset.pattern.permute.xlu0 (!%p241_p9), %v4502_v0  ;;  %s5997_s18 = smov (!%p241_p9), 1   ;;  %v352_v18 = vld [vmem:[%s5989_s2] sm:$0xff] (!%p241_p9)  ;;  %vm314_vm6 = vcmask (!%p241_p9), 7168   ;;  %vm337_vm7 = vcmask (!%p241_p9), 1039360  }
  0x15   : > { %281 = vst.msk [vmem:[#allocation2 + $0x18] sm:$0xff] (!%p241_p9), %vm280_vm1, %v4502_v0  ;;  %4399 = vset.pattern.permute.xlu1 (!%p241_p9), %v4502_v0  ;;  %534 = vmatprep.mubr.bf16.mxu1 (!%p241_p9), %v4502_v0  ;;  %s5995_s19 = smov (!%p241_p9), 127   ;;  %s6052_s1 = sld [smem:[#allocation11_spill]] (!%p241_p9)  ;;  %vm369_vm8 = vcmask (!%p241_p9), 392192   ;;  %v4197_v50 = vld [vmem:[%s5989_s2 + $0x10] sm:$0xff] (!%p241_p9)  ;;  %v4198_v51 = vld [vmem:[%s5989_s2 + $0x18] sm:$0xff] (!%p241_p9) }
  0x16   : > { %s4505_s9 = smov (!%p241_p9), 9   ;;  %s6017_s15 = smov (!%p241_p9), 125  }
  0x17   : > { %s4509_s16 = smov (!%p241_p9), 122   ;;  %s4510_s20 = smov (!%p241_p9), 119  }
  0x18   : > { %s6053_s3 = sld [smem:[#allocation12_spill]] (!%p241_p9)  ;;  %s6023_s29 = smov (!%p241_p9), 2  }
  0x19   : > { %s6021_s8 = smov (!%p241_p9), 126   ;;  %s6054_s22 = smov (!%p241_p9), 127  }
  0x1a   : > { %s6001_s23 = smov (!%p241_p9), 15   ;;  %s6007_s21 = smov (!%p241_p9), 113  }
  0x1b   : > { %s273_s13 = scalar_select %p272_p10, %s4589_s28, 1  ;;  %v4642_v6 = vld [vmem:[#allocation2] sm:$0xff]  ;;  %v4401_v62 = vld [vmem:[%s6052_s1 + $0x8] sm:$0xff]  }
  0x1c   : > { %308 = vrot.lane.b32.xlu1 %v4642_v6, %s5997_s18  ;;  %v4667_v16 = vld [vmem:[#allocation2 + $0x18] sm:$0xff]  ;;  %v4400_v29 = vld [vmem:[%s6052_s1] sm:$0xff]   ;;  %s6081_s10 = smov 123  }
  0x1d   : > { %s4300_s14 = sshll.u32 %s273_s13, 5  ;;  %s4506_s13 = smov 6  }
  0x1e   : > { %s4627_s17 = scalar_lea.vmem %s6051_s0, %s4300_s14  ;;  %s6025_s14 = smov 3  }
  0x1f   : > { %v4630_v1 = vld [vmem:[%s4627_s17] sm:$0xff]  ;;  %v4633_v2 = vld [vmem:[%s4627_s17 + $0x10] sm:$0xff]  ;;  %v4636_v3 = vld [vmem:[%s4627_s17 + $0x8] sm:$0xff]  ;;  %s6080_s0 = smov 124  }
  0x20   : > { %vm286_vm2 = vcmp.gt.f32.partialorder %v4630_v1, 0.0  ;;  %vm288_vm3 = vcmp.gt.f32.partialorder %v4633_v2, 0.0  ;;  %v290_v4 = vmul.f32 0.01, %v4630_v1  ;;  %v292_v5 = vmul.f32 0.01, %v4633_v2 }
  0x21   : > { %v4645_v7 = vld [vmem:[%s4627_s17 + $0x18] sm:$0xff]  ;;  %vm287_vm4 = vcmp.gt.f32.partialorder %v4636_v3, 0.0  ;;  %v291_v8 = vmul.f32 0.01, %v4636_v3 }
  0x22   : > { %v294_v9 = vsel %vm286_vm2, %v4630_v1, %v290_v4  ;;  %v296_v10 = vsel %vm288_vm3, %v4633_v2, %v292_v5  ;;  %vm289_vm5 = vcmp.gt.f32.partialorder %v4645_v7, 0.0  ;;  %v293_v11 = vmul.f32 0.01, %v4645_v7 }
  0x23   : > { %v4655_v12 = vpack.c.bf16 %v296_v10, %v294_v9  ;;  %v295_v13 = vsel %vm287_vm4, %v4636_v3, %v291_v8 }
  0x24   : > { %v297_v14 = vsel %vm289_vm5, %v4645_v7, %v293_v11 }
  0x25   : > { %310 = vrot.lane.b32.xlu0 %v4655_v12, %s5997_s18  ;;  %v4661_v15 = vpack.c.bf16 %v297_v14, %v295_v13 }
  0x27   : > { %333 = vrot.lane.b32.xlu1 %v4661_v15, %s5995_s19 }
  0x29   : > { %312 = vrot.lane.b32.xlu0 %v4661_v15, %s5997_s18 }
  0x2b   : > { %331 = vrot.lane.b32.xlu1 %v4655_v12, %s5995_s19 }
  0x2d   : > { %335 = vrot.lane.b32.xlu0 %v4667_v16, %s5995_s19 }
  0x2f   : > { %361 = vperm.xlu1 %4399, %v353_v17  }
  0x31   : > { %356 = vperm.xlu0 %4398, %v352_v18  }
  0x8e   : > { %v309_v19 = vpop.permute.xlu1 %308 }
  0x97   : > { %v311_v20 = vpop.permute.xlu0 %310 }
  0x98   : > { %v315_v24 = vsel %vm314_vm6, %v309_v19, %v311_v20 }
  0x99   : > { %v334_v22 = vpop.permute.xlu1 %333 }
  0x9b   : > { %v313_v21 = vpop.permute.xlu0 %312 }
  0x9c   : > { %v316_v23 = vsel %vm314_vm6, %v311_v20, %v313_v21 }
  0x9d   : > { %373 = vmatprep.subr.bf16.mxu0 %v316_v23  ;;  %v332_v27 = vpop.permute.xlu1 %331 }
  0x9e   : > { %374 = vmatpush1.bf16.msra.mxu0 %v315_v24  ;;  %v338_v28 = vsel %vm337_vm7, %v332_v27, %v334_v22 }
  0x9f   : > { %v336_v25 = vpop.permute.xlu0 %335  ;;  %375 = vmatprep.subr.bf16.mxu0 %v4661_v15 }
  0xa0   : > { %v339_v26 = vsel %vm337_vm7, %v334_v22, %v336_v25 }
  0xa2   : > { %376 = vmatpush1.bf16.msra.mxu0 %v4655_v12 }
  0xa3   : > { %377 = vmatprep.subr.bf16.mxu0 %v339_v26 }
  0xa6   : > { %378 = vmatpush1.bf16.msra.mxu0 %v338_v28  ;;  %v4203_v28 = vld [vmem:[%s5989_s2 + $0x20] sm:$0xff] }
  0xa9   : > { %4194 = vmatmul.mubr.msk.bf16.vlgmr.msra.gmra.mrb[0].mxu0 %vm369_vm8, %v4400_v29  ;;  %v4204_v29 = vld [vmem:[%s5989_s2 + $0x28] sm:$0xff] }
  0xaa   : > { %667 = vmatprep.mubr.bf16.mxu0 %v4502_v0 }
  0xae   : > { %v362_v32 = vpop.permute.xlu1 %361 }
  0xb0   : > { %v357_v30 = vpop.permute.xlu0 %356 }
 0x17c   : > { %v407_v31 = vpop.f32.mrb[0].mxu0 }
 0x17d   : > { %v408_v33 = vadd.f32 %v407_v31, %v357_v30  ;;  %v409_v34 = vpop.f32.mrb[1].mxu0 }
 0x17e   : > { %v410_v35 = vadd.f32 %v409_v34, %v357_v30  ;;  %v411_v36 = vpop.f32.mrb[2].mxu0 }
 0x17f   : > { %v420_v37 = vmul.f32 0.01, %v408_v33  ;;  %v412_v38 = vadd.f32 %v411_v36, %v362_v32  ;;  %v413_v39 = vpop.f32.mrb[3].mxu0  ;;  %vm416_vm9 = vcmp.gt.f32.partialorder %v408_v33, 0.0 }
 0x180   : > { %v421_v40 = vmul.f32 0.01, %v410_v35  ;;  %v414_v41 = vadd.f32 %v413_v39, %v362_v32  ;;  %vm417_vm10 = vcmp.gt.f32.partialorder %v410_v35, 0.0 }
 0x181   : > { %vm418_vm11 = vcmp.gt.f32.partialorder %v412_v38, 0.0  ;;  %v422_v42 = vmul.f32 0.01, %v412_v38  ;;  %v424_v44 = vsel %vm416_vm9, %v408_v33, %v420_v37 }
 0x182   : > { %vm419_vm12 = vcmp.gt.f32.partialorder %v414_v41, 0.0  ;;  %v423_v43 = vmul.f32 0.01, %v414_v41  ;;  %v425_v46 = vsel %vm417_vm10, %v410_v35, %v421_v40  ;;  %v4402_v40 = vld [vmem:[%s6052_s1 + $0x10] sm:$0xff]  }
 0x183   : > { %v426_v45 = vsel %vm418_vm11, %v412_v38, %v422_v42 }
 0x184   : > { %v428_v47 = vpack.c.bf16 %v426_v45, %v424_v44  ;;  %v427_v48 = vsel %vm419_vm12, %v414_v41, %v423_v43  ;;  %vm1087_vm12 = vcmask 72704  }
 0x185   : > { %v429_v49 = vpack.c.bf16 %v427_v48, %v425_v46 }
 0x186   : > { %440 = vrot.lane.b32.xlu1 %v428_v47, %s5997_s18 }
 0x187   : > { %442 = vrot.lane.b32.xlu0 %v429_v49, %s5997_s18 }
 0x18a   : > { %438 = vrot.lane.b32.xlu1 %v4642_v6, %s5997_s18 }
 0x18b   : > { %462 = vrot.lane.b32.xlu0 %v429_v49, %s5995_s19 }
 0x18e   : > { %464 = vrot.lane.b32.xlu1 %v4667_v16, %s5995_s19 }
 0x18f   : > { %460 = vrot.lane.b32.xlu0 %v428_v47, %s5995_s19 }
 0x192   : > { %486 = vperm.xlu1 %4399, %v4197_v50  }
 0x193   : > { %491 = vperm.xlu0 %4398, %v4198_v51  }
 0x1f8   : > { %v441_v52 = vpop.permute.xlu1 %440 }
 0x1f9   : > { %v443_v53 = vpop.permute.xlu0 %442 }
 0x1fa   : > { %v445_v54 = vsel %vm314_vm6, %v441_v52, %v443_v53 }
 0x1fb   : > { %502 = vmatprep.subr.bf16.mxu1 %v445_v54 }
 0x1fc   : > { %v439_v55 = vpop.permute.xlu1 %438 }
 0x1fd   : > { %v463_v56 = vpop.permute.xlu0 %462  ;;  %v444_v57 = vsel %vm314_vm6, %v439_v55, %v441_v52 }
 0x1fe   : > { %503 = vmatpush1.bf16.msra.mxu1 %v444_v57 }
 0x1ff   : > { %504 = vmatprep.subr.bf16.mxu1 %v429_v49 }
 0x200   : > { %v465_v58 = vpop.permute.xlu1 %464 }
 0x201   : > { %v467_v59 = vsel %vm337_vm7, %v463_v56, %v465_v58  ;;  %v461_v60 = vpop.permute.xlu0 %460 }
 0x202   : > { %505 = vmatpush1.bf16.msra.mxu1 %v428_v47  ;;  %v466_v61 = vsel %vm337_vm7, %v461_v60, %v463_v56 }
 0x203   : > { %506 = vmatprep.subr.bf16.mxu1 %v467_v59 }
 0x206   : > { %507 = vmatpush1.bf16.msra.mxu1 %v466_v61  ;;  %v4209_v61 = vld [vmem:[%s5989_s2 + $0x30] sm:$0xff] }
 0x209   : > { %4200 = vmatmul.mubr.msk.bf16.vlgmr.msra.gmra.mrb[0].mxu1 %vm369_vm8, %v4401_v62  ;;  %v4210_v62 = vld [vmem:[%s5989_s2 + $0x38] sm:$0xff] }
 0x20a   : > { %796 = vmatprep.mubr.bf16.mxu1 %v4502_v0 }
 0x211   : > { %v487_v63 = vpop.permute.xlu1 %486 }
 0x212   : > { %v492_v9 = vpop.permute.xlu0 %491 }
 0x2dc   : > { %v536_v4 = vpop.f32.mrb[0].mxu1 }
 0x2dd   : > { %v537_v5 = vadd.f32 %v536_v4, %v487_v63  ;;  %v538_v8 = vpop.f32.mrb[1].mxu1 }
 0x2de   : > { %v539_v10 = vadd.f32 %v538_v8, %v487_v63  ;;  %v540_v11 = vpop.f32.mrb[2].mxu1 }
 0x2df   : > { %v4714_v13 = vadd.f32 %v537_v5, %v4630_v1  ;;  %v541_v14 = vadd.f32 %v540_v11, %v492_v9  ;;  %v542_v17 = vpop.f32.mrb[3].mxu1 }
 0x2e0   : > { %v4717_v18 = vadd.f32 %v539_v10, %v4636_v3  ;;  %v543_v19 = vadd.f32 %v542_v17, %v492_v9 }
 0x2e1   : > { %v553_v20 = vmul.f32 0.01, %v4714_v13  ;;  %v4721_v21 = vadd.f32 %v541_v14, %v4633_v2  ;;  %vm549_vm13 = vcmp.gt.f32.partialorder %v4714_v13, 0.0 }
 0x2e2   : > { %v554_v22 = vmul.f32 0.01, %v4717_v18  ;;  %v4726_v23 = vadd.f32 %v543_v19, %v4645_v7  ;;  %vm550_vm14 = vcmp.gt.f32.partialorder %v4717_v18, 0.0 }
 0x2e3   : > { %vm551_vm15 = vcmp.gt.f32.partialorder %v4721_v21, 0.0  ;;  %v555_v1 = vmul.f32 0.01, %v4721_v21  ;;  %v557_v2 = vsel %vm549_vm13, %v4714_v13, %v553_v20  ;;  %v4403_v20 = vld [vmem:[%s6052_s1 + $0x18] sm:$0xff]   ;;  %vm1106_vm13 = vcmask 48128  }
 0x2e4   : > { %vm552_vm0 = vcmp.gt.f32.partialorder %v4726_v23, 0.0  ;;  %v556_v3 = vmul.f32 0.01, %v4726_v23  ;;  %v558_v25 = vsel %vm550_vm14, %v4717_v18, %v554_v22  ;;  %vm1125_vm14 = vcmask 23552  }
 0x2e5   : > { %v559_v24 = vsel %vm551_vm15, %v4721_v21, %v555_v1  ;;  %vm1148_vm15 = vcmask 1022976  }
 0x2e6   : > { %v561_v26 = vpack.c.bf16 %v559_v24, %v557_v2  ;;  %v560_v7 = vsel %vm552_vm0, %v4726_v23, %v556_v3  ;;  %vm1167_vm0 = vcmask 998400  }
 0x2e7   : > { %v562_v27 = vpack.c.bf16 %v560_v7, %v558_v25 }
 0x2e8   : > { %573 = vrot.lane.b32.xlu1 %v561_v26, %s5997_s18 }
 0x2e9   : > { %575 = vrot.lane.b32.xlu0 %v562_v27, %s5997_s18 }
 0x2ec   : > { %571 = vrot.lane.b32.xlu1 %v4642_v6, %s5997_s18 }
 0x2ed   : > { %595 = vrot.lane.b32.xlu0 %v562_v27, %s5995_s19 }
 0x2f0   : > { %597 = vrot.lane.b32.xlu1 %v4667_v16, %s5995_s19 }
 0x2f1   : > { %593 = vrot.lane.b32.xlu0 %v561_v26, %s5995_s19 }
 0x2f4   : > { %619 = vperm.xlu1 %4399, %v4203_v28  }
 0x2f5   : > { %624 = vperm.xlu0 %4398, %v4204_v29  }
 0x35a   : > { %v574_v30 = vpop.permute.xlu1 %573 }
 0x35b   : > { %v576_v31 = vpop.permute.xlu0 %575 }
 0x35c   : > { %v578_v32 = vsel %vm314_vm6, %v574_v30, %v576_v31 }
 0x35d   : > { %635 = vmatprep.subr.bf16.mxu0 %v578_v32 }
 0x35e   : > { %v572_v33 = vpop.permute.xlu1 %571 }
 0x35f   : > { %v577_v34 = vsel %vm314_vm6, %v572_v33, %v574_v30  ;;  %v596_v35 = vpop.permute.xlu0 %595 }
 0x360   : > { %636 = vmatpush1.bf16.msra.mxu0 %v577_v34 }
 0x361   : > { %637 = vmatprep.subr.bf16.mxu0 %v562_v27 }
 0x362   : > { %v598_v36 = vpop.permute.xlu1 %597 }
 0x363   : > { %v600_v37 = vsel %vm337_vm7, %v596_v35, %v598_v36  ;;  %v594_v38 = vpop.permute.xlu0 %593 }
 0x364   : > { %638 = vmatpush1.bf16.msra.mxu0 %v561_v26  ;;  %v599_v39 = vsel %vm337_vm7, %v594_v38, %v596_v35 }
 0x365   : > { %639 = vmatprep.subr.bf16.mxu0 %v600_v37 }
 0x368   : > { %640 = vmatpush1.bf16.msra.mxu0 %v599_v39  ;;  %v4215_v39 = vld [vmem:[%s5989_s2 + $0x40] sm:$0xff] }
 0x36b   : > { %4206 = vmatmul.mubr.msk.bf16.vlgmr.msra.gmra.mrb[4].mxu0 %vm369_vm8, %v4402_v40  ;;  %v4216_v40 = vld [vmem:[%s5989_s2 + $0x48] sm:$0xff] }
 0x36c   : > { %929 = vmatprep.mubr.bf16.mxu0 %v4502_v0 }
 0x373   : > { %v620_v41 = vpop.permute.xlu1 %619 }
 0x374   : > { %v625_v45 = vpop.permute.xlu0 %624 }
 0x43e   : > { %v669_v42 = vpop.f32.mrb[4].mxu0 }
 0x43f   : > { %v670_v43 = vadd.f32 %v669_v42, %v620_v41  ;;  %v671_v44 = vpop.f32.mrb[5].mxu0  ;;  %v1210_v42 = vld [vmem:[%s5991_s4 + $0x8] sm:$0xff] }
 0x440   : > { %v672_v46 = vadd.f32 %v671_v44, %v620_v41  ;;  %v673_v47 = vpop.f32.mrb[6].mxu0  ;;  %v1209_v41 = vld [vmem:[%s5991_s4] sm:$0xff] }
 0x441   : > { %v682_v48 = vmul.f32 0.01, %v670_v43  ;;  %v674_v49 = vadd.f32 %v673_v47, %v625_v45  ;;  %v675_v50 = vpop.f32.mrb[7].mxu0  ;;  %vm678_vm1 = vcmp.gt.f32.partialorder %v670_v43, 0.0 }
 0x442   : > { %v683_v51 = vmul.f32 0.01, %v672_v46  ;;  %v676_v52 = vadd.f32 %v675_v50, %v625_v45  ;;  %vm679_vm2 = vcmp.gt.f32.partialorder %v672_v46, 0.0 }
 0x443   : > { %vm680_vm3 = vcmp.gt.f32.partialorder %v674_v49, 0.0  ;;  %v684_v53 = vmul.f32 0.01, %v674_v49  ;;  %v686_v55 = vsel %vm678_vm1, %v670_v43, %v682_v48  ;;  %vm1186_vm1 = vcmask 973824  }
 0x444   : > { %vm681_vm4 = vcmp.gt.f32.partialorder %v676_v52, 0.0  ;;  %v685_v54 = vmul.f32 0.01, %v676_v52  ;;  %v687_v57 = vsel %vm679_vm2, %v672_v46, %v683_v51  ;;  %vm1226_vm2 = vcmask 916480  }
 0x445   : > { %v688_v56 = vsel %vm680_vm3, %v674_v49, %v684_v53  ;;  %v4404_v53 = vld [vmem:[%s6052_s1 + $0x20] sm:$0xff]  }
 0x446   : > { %v690_v58 = vpack.c.bf16 %v688_v56, %v686_v55  ;;  %v689_v59 = vsel %vm681_vm4, %v676_v52, %v685_v54 }
 0x447   : > { %v691_v60 = vpack.c.bf16 %v689_v59, %v687_v57 }
 0x448   : > { %702 = vrot.lane.b32.xlu1 %v690_v58, %s5997_s18 }
 0x449   : > { %704 = vrot.lane.b32.xlu0 %v691_v60, %s5997_s18 }
 0x44c   : > { %700 = vrot.lane.b32.xlu1 %v4642_v6, %s5997_s18 }
 0x44d   : > { %724 = vrot.lane.b32.xlu0 %v691_v60, %s5995_s19 }
 0x450   : > { %726 = vrot.lane.b32.xlu1 %v4667_v16, %s5995_s19 }
 0x451   : > { %722 = vrot.lane.b32.xlu0 %v690_v58, %s5995_s19 }
 0x454   : > { %748 = vperm.xlu1 %4399, %v4209_v61  }
 0x455   : > { %753 = vperm.xlu0 %4398, %v4210_v62  }
 0x4ba   : > { %v703_v63 = vpop.permute.xlu1 %702 }
 0x4bb   : > { %v705_v4 = vpop.permute.xlu0 %704 }
 0x4bc   : > { %v707_v5 = vsel %vm314_vm6, %v703_v63, %v705_v4 }
 0x4bd   : > { %764 = vmatprep.subr.bf16.mxu1 %v707_v5 }
 0x4be   : > { %v701_v8 = vpop.permute.xlu1 %700 }
 0x4bf   : > { %v706_v9 = vsel %vm314_vm6, %v701_v8, %v703_v63  ;;  %v725_v10 = vpop.permute.xlu0 %724 }
 0x4c0   : > { %765 = vmatpush1.bf16.msra.mxu1 %v706_v9 }
 0x4c1   : > { %766 = vmatprep.subr.bf16.mxu1 %v691_v60 }
 0x4c2   : > { %v727_v11 = vpop.permute.xlu1 %726 }
 0x4c3   : > { %v729_v14 = vsel %vm337_vm7, %v725_v10, %v727_v11  ;;  %v723_v17 = vpop.permute.xlu0 %722 }
 0x4c4   : > { %767 = vmatpush1.bf16.msra.mxu1 %v690_v58  ;;  %v728_v19 = vsel %vm337_vm7, %v723_v17, %v725_v10 }
 0x4c5   : > { %768 = vmatprep.subr.bf16.mxu1 %v729_v14 }
 0x4c8   : > { %769 = vmatpush1.bf16.msra.mxu1 %v728_v19 }
 0x4cb   : > { %4212 = vmatmul.mubr.msk.bf16.vlgmr.msra.gmra.mrb[4].mxu1 %vm369_vm8, %v4403_v20 }
 0x4cc   : > { %1058 = vmatprep.mubr.bf16.mxu1 %v4502_v0 }
 0x4d3   : > { %v749_v22 = vpop.permute.xlu1 %748 }
 0x4d4   : > { %v754_v24 = vpop.permute.xlu0 %753 }
 0x59e   : > { %v798_v1 = vpop.f32.mrb[4].mxu1 }
 0x59f   : > { %v799_v3 = vadd.f32 %v798_v1, %v749_v22  ;;  %v800_v2 = vpop.f32.mrb[5].mxu1 }
 0x5a0   : > { %v801_v25 = vadd.f32 %v800_v2, %v749_v22  ;;  %v802_v26 = vpop.f32.mrb[6].mxu1 }
 0x5a1   : > { %v4784_v7 = vadd.f32 %v799_v3, %v4714_v13  ;;  %v803_v27 = vadd.f32 %v802_v26, %v754_v24  ;;  %v804_v28 = vpop.f32.mrb[7].mxu1 }
 0x5a2   : > { %v4787_v29 = vadd.f32 %v801_v25, %v4717_v18  ;;  %v805_v30 = vadd.f32 %v804_v28, %v754_v24 }
 0x5a3   : > { %v815_v31 = vmul.f32 0.01, %v4784_v7  ;;  %v4791_v32 = vadd.f32 %v803_v27, %v4721_v21  ;;  %vm811_vm5 = vcmp.gt.f32.partialorder %v4784_v7, 0.0 }
 0x5a4   : > { %v816_v33 = vmul.f32 0.01, %v4787_v29  ;;  %v4796_v34 = vadd.f32 %v805_v30, %v4726_v23  ;;  %vm812_vm9 = vcmp.gt.f32.partialorder %v4787_v29, 0.0 }
 0x5a5   : > { %vm813_vm10 = vcmp.gt.f32.partialorder %v4791_v32, 0.0  ;;  %v817_v13 = vmul.f32 0.01, %v4791_v32  ;;  %v819_v21 = vsel %vm811_vm5, %v4784_v7, %v815_v31 }
 0x5a6   : > { %vm814_vm11 = vcmp.gt.f32.partialorder %v4796_v34, 0.0  ;;  %v818_v18 = vmul.f32 0.01, %v4796_v34  ;;  %v820_v36 = vsel %vm812_vm9, %v4787_v29, %v816_v33 }
 0x5a7   : > { %v821_v35 = vsel %vm813_vm10, %v4791_v32, %v817_v13  ;;  %v4405_v13 = vld [vmem:[%s6053_s3] sm:$0xff]  }
 0x5a8   : > { %v823_v37 = vpack.c.bf16 %v821_v35, %v819_v21  ;;  %v822_v23 = vsel %vm814_vm11, %v4796_v34, %v818_v18 }
 0x5a9   : > { %v824_v38 = vpack.c.bf16 %v822_v23, %v820_v36 }
 0x5aa   : > { %835 = vrot.lane.b32.xlu1 %v823_v37, %s5997_s18 }
 0x5ab   : > { %837 = vrot.lane.b32.xlu0 %v824_v38, %s5997_s18 }
 0x5ae   : > { %833 = vrot.lane.b32.xlu1 %v4642_v6, %s5997_s18 }
 0x5af   : > { %857 = vrot.lane.b32.xlu0 %v824_v38, %s5995_s19 }
 0x5b2   : > { %859 = vrot.lane.b32.xlu1 %v4667_v16, %s5995_s19 }
 0x5b3   : > { %855 = vrot.lane.b32.xlu0 %v823_v37, %s5995_s19 }
 0x5b6   : > { %881 = vperm.xlu1 %4399, %v4215_v39  }
 0x5b7   : > { %886 = vperm.xlu0 %4398, %v4216_v40  }
 0x5ba   : > { %1081 = vrot.lane.b32.xlu1 %v4642_v6, %s4505_s9 }
 0x5bb   : > { %1102 = vrot.lane.b32.xlu0 %v4655_v12, %s4506_s13 }
 0x5be   : > { %1083 = vrot.lane.b32.xlu1 %v4655_v12, %s4505_s9 }
 0x5bf   : > { %1085 = vrot.lane.b32.xlu0 %v4661_v15, %s4505_s9 }
 0x5c2   : > { %1121 = vrot.lane.b32.xlu1 %v4655_v12, %s6025_s14 }
 0x5c3   : > { %1100 = vrot.lane.b32.xlu0 %v4642_v6, %s4506_s13 }
 0x5c6   : > { %1104 = vrot.lane.b32.xlu1 %v4661_v15, %s4506_s13 }
 0x5c7   : > { %1123 = vrot.lane.b32.xlu0 %v4661_v15, %s6025_s14 }
 0x5ca   : > { %1119 = vrot.lane.b32.xlu1 %v4642_v6, %s6025_s14 }
 0x5cb   : > { %1142 = vrot.lane.b32.xlu0 %v4655_v12, %s6017_s15 }
 0x5ce   : > { %1146 = vrot.lane.b32.xlu1 %v4667_v16, %s6017_s15 }
 0x5cf   : > { %1144 = vrot.lane.b32.xlu0 %v4661_v15, %s6017_s15 }
 0x5d2   : > { %1161 = vrot.lane.b32.xlu1 %v4655_v12, %s4509_s16 }
 0x5d3   : > { %1165 = vrot.lane.b32.xlu0 %v4667_v16, %s4509_s16 }
 0x5d6   : > { %1163 = vrot.lane.b32.xlu1 %v4661_v15, %s4509_s16 }
 0x5d7   : > { %1182 = vrot.lane.b32.xlu0 %v4661_v15, %s4510_s20 }
 0x5da   : > { %1184 = vrot.lane.b32.xlu1 %v4667_v16, %s4510_s20 }
 0x5db   : > { %1180 = vrot.lane.b32.xlu0 %v4655_v12, %s4510_s20 }
 0x5de   : > { %1213 = vperm.xlu1 %4399, %v1209_v41  }
 0x5df   : > { %1218 = vperm.xlu0 %4398, %v1210_v42  }
 0x61c   : > { %v836_v43 = vpop.permute.xlu1 %835 }
 0x61d   : > { %v838_v44 = vpop.permute.xlu0 %837 }
 0x61e   : > { %v840_v45 = vsel %vm314_vm6, %v836_v43, %v838_v44 }
 0x61f   : > { %897 = vmatprep.subr.bf16.mxu0 %v840_v45 }
 0x620   : > { %v834_v46 = vpop.permute.xlu1 %833 }
 0x621   : > { %v839_v47 = vsel %vm314_vm6, %v834_v46, %v836_v43  ;;  %v858_v48 = vpop.permute.xlu0 %857 }
 0x622   : > { %898 = vmatpush1.bf16.msra.mxu0 %v839_v47 }
 0x623   : > { %899 = vmatprep.subr.bf16.mxu0 %v824_v38 }
 0x624   : > { %v860_v49 = vpop.permute.xlu1 %859 }
 0x625   : > { %v862_v50 = vsel %vm337_vm7, %v858_v48, %v860_v49  ;;  %v856_v51 = vpop.permute.xlu0 %855 }
 0x626   : > { %900 = vmatpush1.bf16.msra.mxu0 %v823_v37  ;;  %v861_v52 = vsel %vm337_vm7, %v856_v51, %v858_v48 }
 0x627   : > { %901 = vmatprep.subr.bf16.mxu0 %v862_v50  ;;  %v4911_v50 = vld [vmem:[#allocation2] sm:$0xff] }
 0x62a   : > { %902 = vmatpush1.bf16.msra.mxu0 %v861_v52 }
 0x62d   : > { %4218 = vmatmul.mubr.msk.bf16.vlgmr.msra.gmra.mrb[8].mxu0 %vm369_vm8, %v4404_v53 }
 0x62e   : > { %1262 = vmatprep.mubr.bf16.mxu0 %v4502_v0 }
 0x635   : > { %v882_v54 = vpop.permute.xlu1 %881 }
 0x636   : > { %v4872_v55 = vpop.permute.xlu0 %886 }
 0x639   : > { %v1082_v56 = vpop.permute.xlu1 %1081 }
 0x63a   : > { %v1103_v57 = vpop.permute.xlu0 %1102 }
 0x63d   : > { %v1084_v58 = vpop.permute.xlu1 %1083 }
 0x63e   : > { %v1086_v59 = vpop.permute.xlu0 %1085  ;;  %v1088_v61 = vsel %vm1087_vm12, %v1082_v56, %v1084_v58 }
 0x63f   : > { %v1089_v60 = vsel %vm1087_vm12, %v1084_v58, %v1086_v59 }
 0x640   : > { %1230 = vmatprep.subr.bf16.mxu0 %v1089_v60 }
 0x641   : > { %v1122_v62 = vpop.permute.xlu1 %1121  ;;  %1231 = vmatpush1.bf16.msra.mxu0 %v1088_v61 }
 0x642   : > { %v1101_v63 = vpop.permute.xlu0 %1100 }
 0x643   : > { %v1107_v9 = vsel %vm1106_vm13, %v1101_v63, %v1103_v57 }
 0x645   : > { %v1105_v4 = vpop.permute.xlu1 %1104 }
 0x646   : > { %v1108_v5 = vsel %vm1106_vm13, %v1103_v57, %v1105_v4  ;;  %v1124_v8 = vpop.permute.xlu0 %1123 }
 0x647   : > { %1232 = vmatprep.subr.bf16.mxu0 %v1108_v5  ;;  %v1127_v10 = vsel %vm1125_vm14, %v1122_v62, %v1124_v8 }
 0x648   : > { %1233 = vmatpush1.bf16.msra.mxu0 %v1107_v9 }
 0x649   : > { %v1120_v11 = vpop.permute.xlu1 %1119  ;;  %1234 = vmatprep.subr.bf16.mxu0 %v1127_v10 }
 0x64a   : > { %v1126_v14 = vsel %vm1125_vm14, %v1120_v11, %v1122_v62  ;;  %v1143_v17 = vpop.permute.xlu0 %1142 }
 0x64c   : > { %1235 = vmatpush1.bf16.msra.mxu0 %v1126_v14  ;;  %v4943_v14 = vld [vmem:[#allocation2 + $0x18] sm:$0xff] }
 0x64d   : > { %v1147_v19 = vpop.permute.xlu1 %1146  ;;  %1236 = vmatprep.subr.bf16.mxu0 %v4661_v15 }
 0x64e   : > { %v1145_v20 = vpop.permute.xlu0 %1144 }
 0x64f   : > { %v1150_v22 = vsel %vm1148_vm15, %v1145_v20, %v1147_v19  ;;  %v1149_v2 = vsel %vm1148_vm15, %v1143_v17, %v1145_v20  ;;  %v4230_v17 = vld [vmem:[%s5991_s4 + $0x18] sm:$0xff] }
 0x650   : > { %1237 = vmatpush1.bf16.msra.mxu0 %v4655_v12 }
 0x651   : > { %v1162_v1 = vpop.permute.xlu1 %1161  ;;  %1238 = vmatprep.subr.bf16.mxu0 %v1150_v22 }
 0x652   : > { %v1166_v3 = vpop.permute.xlu0 %1165 }
 0x654   : > { %1239 = vmatpush1.bf16.msra.mxu0 %v1149_v2 }
 0x655   : > { %v1164_v24 = vpop.permute.xlu1 %1163 }
 0x656   : > { %v1169_v25 = vsel %vm1167_vm0, %v1164_v24, %v1166_v3  ;;  %v1168_v26 = vsel %vm1167_vm0, %v1162_v1, %v1164_v24  ;;  %v1183_v27 = vpop.permute.xlu0 %1182 }
 0x657   : > { %1240 = vmatprep.subr.bf16.mxu0 %v1169_v25 }
 0x658   : > { %1241 = vmatpush1.bf16.msra.mxu0 %v1168_v26 }
 0x659   : > { %v1185_v28 = vpop.permute.xlu1 %1184 }
 0x65a   : > { %v1188_v30 = vsel %vm1186_vm1, %v1183_v27, %v1185_v28  ;;  %v1181_v31 = vpop.permute.xlu0 %1180  ;;  %v4406_v28 = vld [vmem:[%s6052_s1 + $0x28] sm:$0xff]   ;;  %s269_s1 = sand.u32 1, %s4492_s25  }
 0x65b   : > { %1242 = vmatprep.subr.bf16.mxu0 %v1188_v30  ;;  %v1187_v33 = vsel %vm1186_vm1, %v1181_v31, %v1183_v27 }
 0x65c   : > { %1243 = vmatpush1.bf16.msra.mxu0 %v1187_v33 }
 0x65d   : > { %v1214_v51 = vpop.permute.xlu1 %1213 }
 0x65f   : > { %4226 = vmatmul.mubr.msk.bf16.vlgmr.msra.gmra.mrb[12].mxu0 %vm1226_vm2, %v4405_v13 }
 0x660   : > { %1686 = vmatprep.mubr.bf16.mxu0 %v4502_v0 }
 0x700   : > { %v931_v18 = vpop.f32.mrb[8].mxu0 }
 0x701   : > { %v932_v21 = vadd.f32 %v931_v18, %v882_v54  ;;  %v933_v35 = vpop.f32.mrb[9].mxu0 }
 0x702   : > { %v934_v36 = vadd.f32 %v933_v35, %v882_v54  ;;  %v935_v37 = vpop.f32.mrb[10].mxu0 }
 0x703   : > { %v944_v23 = vmul.f32 0.01, %v932_v21  ;;  %v936_v38 = vadd.f32 %v935_v37, %v4872_v55  ;;  %v937_v39 = vpop.f32.mrb[11].mxu0  ;;  %vm940_vm3 = vcmp.gt.f32.partialorder %v932_v21, 0.0 }
 0x704   : > { %v945_v40 = vmul.f32 0.01, %v934_v36  ;;  %v938_v41 = vadd.f32 %v937_v39, %v4872_v55  ;;  %vm941_vm4 = vcmp.gt.f32.partialorder %v934_v36, 0.0  ;;  %v1219_v55 = vpop.permute.xlu0 %1218 }
 0x705   : > { %vm942_vm5 = vcmp.gt.f32.partialorder %v936_v38, 0.0  ;;  %v946_v42 = vmul.f32 0.01, %v936_v38  ;;  %v948_v44 = vsel %vm940_vm3, %v932_v21, %v944_v23 }
 0x706   : > { %vm943_vm9 = vcmp.gt.f32.partialorder %v938_v41, 0.0  ;;  %v947_v43 = vmul.f32 0.01, %v938_v41  ;;  %v949_v46 = vsel %vm941_vm4, %v934_v36, %v945_v40 }
 0x707   : > { %v950_v45 = vsel %vm942_vm5, %v936_v38, %v946_v42  ;;  %vm1319_vm5 = vcmask 15360  }
 0x708   : > { %v4895_v47 = vpack.c.bf16 %v950_v45, %v948_v44  ;;  %v951_v48 = vsel %vm943_vm9, %v938_v41, %v947_v43  ;;  %vm1378_vm9 = vcmask 1031168  }
 0x709   : > { %v4897_v49 = vpack.c.bf16 %v951_v48, %v949_v46 }
 0x70a   : > { %964 = vrot.lane.b32.xlu1 %v4895_v47, %s5997_s18 }
 0x70b   : > { %966 = vrot.lane.b32.xlu0 %v4897_v49, %s5997_s18 }
 0x70e   : > { %962 = vrot.lane.b32.xlu1 %v4642_v6, %s5997_s18 }
 0x70f   : > { %986 = vrot.lane.b32.xlu0 %v4897_v49, %s5995_s19 }
 0x712   : > { %988 = vrot.lane.b32.xlu1 %v4667_v16, %s5995_s19 }
 0x713   : > { %984 = vrot.lane.b32.xlu0 %v4895_v47, %s5995_s19 }
 0x716   : > { %1295 = vrot.lane.b32.xlu1 %v4911_v50, %s6025_s14 }
 0x732   : > { %v1264_v52 = vpop.f32.mrb[12].mxu0 }
 0x733   : > { %v1265_v53 = vadd.f32 %v1264_v52, %v1214_v51  ;;  %v1266_v54 = vpop.f32.mrb[13].mxu0 }
 0x734   : > { %v1267_v6 = vadd.f32 %v1266_v54, %v1214_v51  ;;  %v1268_v56 = vpop.f32.mrb[14].mxu0 }
 0x735   : > { %v1277_v57 = vmul.f32 0.01, %v1265_v53  ;;  %v1269_v58 = vadd.f32 %v1268_v56, %v1219_v55  ;;  %v1270_v59 = vpop.f32.mrb[15].mxu0  ;;  %vm1273_vm10 = vcmp.gt.f32.partialorder %v1265_v53, 0.0 }
 0x736   : > { %v1278_v60 = vmul.f32 0.01, %v1267_v6  ;;  %v1271_v61 = vadd.f32 %v1270_v59, %v1219_v55  ;;  %vm1274_vm11 = vcmp.gt.f32.partialorder %v1267_v6, 0.0 }
 0x737   : > { %vm1275_vm3 = vcmp.gt.f32.partialorder %v1269_v58, 0.0  ;;  %v1279_v62 = vmul.f32 0.01, %v1269_v58  ;;  %v1281_v4 = vsel %vm1273_vm10, %v1265_v53, %v1277_v57 }
 0x738   : > { %vm1276_vm4 = vcmp.gt.f32.partialorder %v1271_v61, 0.0  ;;  %v1280_v63 = vmul.f32 0.01, %v1271_v61  ;;  %v1282_v8 = vsel %vm1274_vm11, %v1267_v6, %v1278_v60 }
 0x739   : > { %v1283_v5 = vsel %vm1275_vm3, %v1269_v58, %v1279_v62  ;;  %v4407_v58 = vld [vmem:[%s6053_s3 + $0x8] sm:$0xff]  }
 0x73a   : > { %v4915_v9 = vpack.c.bf16 %v1283_v5, %v1281_v4  ;;  %v1284_v10 = vsel %vm1276_vm4, %v1271_v61, %v1280_v63 }
 0x73b   : > { %v4917_v11 = vpack.c.bf16 %v1284_v10, %v1282_v8  ;;  %v4430_v8 = vld [vmem:[%s4627_s17] sm:$0xff] }
 0x73c   : > { %1315 = vrot.lane.b32.xlu0 %v4915_v9, %s6023_s29  ;;  %1297 = vrot.lane.b32.xlu1 %v4915_v9, %s6025_s14 }
 0x740   : > { %1299 = vrot.lane.b32.xlu0 %v4917_v11, %s6025_s14  ;;  %1334 = vrot.lane.b32.xlu1 %v4915_v9, %s5997_s18 }
 0x744   : > { %1313 = vrot.lane.b32.xlu0 %v4911_v50, %s6023_s29  ;;  %1317 = vrot.lane.b32.xlu1 %v4917_v11, %s6023_s29 }
 0x748   : > { %1336 = vrot.lane.b32.xlu0 %v4917_v11, %s5997_s18  ;;  %1332 = vrot.lane.b32.xlu1 %v4911_v50, %s5997_s18 }
 0x74c   : > { %1354 = vrot.lane.b32.xlu0 %v4915_v9, %s5995_s19  ;;  %1358 = vrot.lane.b32.xlu1 %v4667_v16, %s5995_s19  ;;  %v4229_v16 = vld [vmem:[%s5991_s4 + $0x10] sm:$0xff] }
 0x750   : > { %1356 = vrot.lane.b32.xlu0 %v4917_v11, %s5995_s19  ;;  %1372 = vrot.lane.b32.xlu1 %v4915_v9, %s6021_s8  ;;  %s6003_s19 = smov 118  }
 0x754   : > { %1376 = vrot.lane.b32.xlu0 %v4943_v14, %s6021_s8  ;;  %1374 = vrot.lane.b32.xlu1 %v4917_v11, %s6021_s8 }
 0x758   : > { %1393 = vrot.lane.b32.xlu0 %v4917_v11, %s6017_s15  ;;  %1395 = vrot.lane.b32.xlu1 %v4943_v14, %s6017_s15 }
 0x75c   : > { %1391 = vrot.lane.b32.xlu0 %v4915_v9, %s6017_s15  ;;  %1425 = vperm.xlu1 %4399, %v4229_v16  }
 0x760   : > { %1430 = vperm.xlu0 %4398, %v4230_v17   ;;  %1510 = vrot.lane.b32.xlu1 %v4911_v50, %s4505_s9 }
 0x77c   : > { %v965_v19 = vpop.permute.xlu1 %964 }
 0x77d   : > { %v967_v20 = vpop.permute.xlu0 %966 }
 0x77e   : > { %v969_v22 = vsel %vm314_vm6, %v965_v19, %v967_v20 }
 0x77f   : > { %1026 = vmatprep.subr.bf16.mxu1 %v969_v22  ;;  %v4432_v22 = vld [vmem:[%s4627_s17 + $0x10] sm:$0xff] }
 0x780   : > { %v963_v1 = vpop.permute.xlu1 %962 }
 0x781   : > { %v968_v3 = vsel %vm314_vm6, %v963_v1, %v965_v19  ;;  %v987_v2 = vpop.permute.xlu0 %986  ;;  %v4431_v19 = vld [vmem:[%s4627_s17 + $0x8] sm:$0xff] }
 0x782   : > { %1027 = vmatpush1.bf16.msra.mxu1 %v968_v3  ;;  %v4433_v3 = vld [vmem:[%s4627_s17 + $0x18] sm:$0xff] }
 0x783   : > { %1028 = vmatprep.subr.bf16.mxu1 %v4897_v49 }
 0x784   : > { %v989_v24 = vpop.permute.xlu1 %988 }
 0x785   : > { %v991_v25 = vsel %vm337_vm7, %v987_v2, %v989_v24  ;;  %v985_v26 = vpop.permute.xlu0 %984 }
 0x786   : > { %1029 = vmatpush1.bf16.msra.mxu1 %v4895_v47  ;;  %v990_v27 = vsel %vm337_vm7, %v985_v26, %v987_v2 }
 0x787   : > { %1030 = vmatprep.subr.bf16.mxu1 %v991_v25 }
 0x788   : > { %v1296_v30 = vpop.permute.xlu1 %1295 }
 0x78a   : > { %1031 = vmatpush1.bf16.msra.mxu1 %v990_v27 }
 0x78d   : > { %4224 = vmatmul.mubr.msk.bf16.vlgmr.msra.gmra.mrb[8].mxu1 %vm369_vm8, %v4406_v28 }
 0x78e   : > { %1473 = vmatprep.mubr.bf16.mxu1 %v4502_v0 }
 0x7ae   : > { %v1316_v31 = vpop.permute.xlu0 %1315  ;;  %v1298_v33 = vpop.permute.xlu1 %1297 }
 0x7af   : > { %v1301_v35 = vsel %vm1125_vm14, %v1296_v30, %v1298_v33 }
 0x7b2   : > { %v1300_v13 = vpop.permute.xlu0 %1299  ;;  %v1335_v18 = vpop.permute.xlu1 %1334 }
 0x7b3   : > { %v1302_v21 = vsel %vm1125_vm14, %v1298_v33, %v1300_v13 }
 0x7b4   : > { %1441 = vmatprep.subr.bf16.mxu1 %v1302_v21  ;;  %v4236_v21 = vld [vmem:[%s5991_s4 + $0x28] sm:$0xff] }
 0x7b5   : > { %1442 = vmatpush1.bf16.msra.mxu1 %v1301_v35 }
 0x7b6   : > { %v1314_v36 = vpop.permute.xlu0 %1313  ;;  %v1318_v37 = vpop.permute.xlu1 %1317 }
 0x7b7   : > { %v1320_v23 = vsel %vm1319_vm5, %v1314_v36, %v1316_v31  ;;  %v1321_v38 = vsel %vm1319_vm5, %v1316_v31, %v1318_v37 }
 0x7b8   : > { %1443 = vmatprep.subr.bf16.mxu1 %v1321_v38 }
 0x7b9   : > { %1444 = vmatpush1.bf16.msra.mxu1 %v1320_v23 }
 0x7ba   : > { %v1337_v39 = vpop.permute.xlu0 %1336  ;;  %v1333_v40 = vpop.permute.xlu1 %1332 }
 0x7bb   : > { %v1338_v41 = vsel %vm314_vm6, %v1333_v40, %v1335_v18  ;;  %v1339_v42 = vsel %vm314_vm6, %v1335_v18, %v1337_v39  ;;  %v4235_v18 = vld [vmem:[%s5991_s4 + $0x20] sm:$0xff] }
 0x7bc   : > { %1445 = vmatprep.subr.bf16.mxu1 %v1339_v42 }
 0x7bd   : > { %1446 = vmatpush1.bf16.msra.mxu1 %v1338_v41 }
 0x7be   : > { %v1355_v43 = vpop.permute.xlu0 %1354  ;;  %1447 = vmatprep.subr.bf16.mxu1 %v4917_v11  ;;  %v1359_v44 = vpop.permute.xlu1 %1358 }
 0x7c1   : > { %1448 = vmatpush1.bf16.msra.mxu1 %v4915_v9 }
 0x7c2   : > { %v1357_v45 = vpop.permute.xlu0 %1356  ;;  %v1373_v46 = vpop.permute.xlu1 %1372 }
 0x7c3   : > { %v1361_v47 = vsel %vm337_vm7, %v1357_v45, %v1359_v44  ;;  %v1360_v48 = vsel %vm337_vm7, %v1355_v43, %v1357_v45 }
 0x7c4   : > { %1449 = vmatprep.subr.bf16.mxu1 %v1361_v47 }
 0x7c5   : > { %1450 = vmatpush1.bf16.msra.mxu1 %v1360_v48 }
 0x7c6   : > { %v1377_v49 = vpop.permute.xlu0 %1376  ;;  %v1375_v51 = vpop.permute.xlu1 %1374 }
 0x7c7   : > { %v1380_v52 = vsel %vm1378_vm9, %v1375_v51, %v1377_v49  ;;  %v1379_v53 = vsel %vm1378_vm9, %v1373_v46, %v1375_v51 }
 0x7c8   : > { %1451 = vmatprep.subr.bf16.mxu1 %v1380_v52 }
 0x7c9   : > { %1452 = vmatpush1.bf16.msra.mxu1 %v1379_v53 }
 0x7ca   : > { %v1394_v54 = vpop.permute.xlu0 %1393  ;;  %v1396_v55 = vpop.permute.xlu1 %1395 }
 0x7cb   : > { %v1398_v6 = vsel %vm1148_vm15, %v1394_v54, %v1396_v55 }
 0x7cc   : > { %1453 = vmatprep.subr.bf16.mxu1 %v1398_v6 }
 0x7ce   : > { %v1392_v56 = vpop.permute.xlu0 %1391 }
 0x7cf   : > { %v1397_v57 = vsel %vm1148_vm15, %v1392_v56, %v1394_v54 }
 0x7d0   : > { %1454 = vmatpush1.bf16.msra.mxu1 %v1397_v57 }
 0x7d3   : > { %4232 = vmatmul.mubr.msk.bf16.vlgmr.msra.gmra.mrb[12].mxu1 %vm1226_vm2, %v4407_v58 }
 0x7d4   : > { %1895 = vmatprep.mubr.bf16.mxu1 %v4502_v0 }
 0x7db   : > { %v1426_v59 = vpop.permute.xlu1 %1425 }
 0x7df   : > { %v1431_v63 = vpop.permute.xlu0 %1430  ;;  %v1511_v35 = vpop.permute.xlu1 %1510 }
 0x8a6   : > { %v1475_v60 = vpop.f32.mrb[12].mxu1 }
 0x8a7   : > { %v1476_v61 = vadd.f32 %v1475_v60, %v1426_v59  ;;  %v1477_v62 = vpop.f32.mrb[13].mxu1 }
 0x8a8   : > { %v1478_v4 = vadd.f32 %v1477_v62, %v1426_v59  ;;  %v1479_v5 = vpop.f32.mrb[14].mxu1 }
 0x8a9   : > { %v4994_v9 = vadd.f32 %v4430_v8, %v1476_v61  ;;  %v1480_v10 = vadd.f32 %v1479_v5, %v1431_v63  ;;  %v1481_v11 = vpop.f32.mrb[15].mxu1 }
 0x8aa   : > { %v1482_v16 = vadd.f32 %v1481_v11, %v1431_v63  ;;  %v4998_v20 = vadd.f32 %v4431_v19, %v1478_v4  ;;  %v4408_v4 = vld [vmem:[%s6053_s3 + $0x10] sm:$0xff]  }
 0x8ab   : > { %v1492_v17 = vmul.f32 0.01, %v4994_v9  ;;  %v5001_v1 = vadd.f32 %v4432_v22, %v1480_v10  ;;  %vm1488_vm10 = vcmp.gt.f32.partialorder %v4994_v9, 0.0 }
 0x8ac   : > { %v5005_v2 = vadd.f32 %v4433_v3, %v1482_v16  ;;  %v1493_v27 = vmul.f32 0.01, %v4998_v20  ;;  %vm1489_vm4 = vcmp.gt.f32.partialorder %v4998_v20, 0.0 }
 0x8ad   : > { %vm1490_vm11 = vcmp.gt.f32.partialorder %v5001_v1, 0.0  ;;  %v1494_v24 = vmul.f32 0.01, %v5001_v1  ;;  %v1496_v26 = vsel %vm1488_vm10, %v4994_v9, %v1492_v17 }
 0x8ae   : > { %vm1491_vm3 = vcmp.gt.f32.partialorder %v5005_v2, 0.0  ;;  %v1495_v25 = vmul.f32 0.01, %v5005_v2  ;;  %v1497_v33 = vsel %vm1489_vm4, %v4998_v20, %v1493_v27 }
 0x8af   : > { %v1498_v28 = vsel %vm1490_vm11, %v5001_v1, %v1494_v24 }
 0x8b0   : > { %v1500_v30 = vpack.c.bf16 %v1498_v28, %v1496_v26  ;;  %v1499_v31 = vsel %vm1491_vm3, %v5005_v2, %v1495_v25 }
 0x8b1   : > { %v1501_v13 = vpack.c.bf16 %v1499_v31, %v1497_v33 }
 0x8b2   : > { %1530 = vrot.lane.b32.xlu0 %v1500_v30, %s4506_s13  ;;  %1512 = vrot.lane.b32.xlu1 %v1500_v30, %s4505_s9 }
 0x8b6   : > { %1514 = vrot.lane.b32.xlu0 %v1501_v13, %s4505_s9  ;;  %1548 = vrot.lane.b32.xlu1 %v1500_v30, %s6025_s14 }
 0x8ba   : > { %1528 = vrot.lane.b32.xlu0 %v4911_v50, %s4506_s13  ;;  %1532 = vrot.lane.b32.xlu1 %v1501_v13, %s4506_s13 }
 0x8be   : > { %1550 = vrot.lane.b32.xlu0 %v1501_v13, %s6025_s14  ;;  %1546 = vrot.lane.b32.xlu1 %v4911_v50, %s6025_s14 }
 0x8c2   : > { %1568 = vrot.lane.b32.xlu0 %v1500_v30, %s6017_s15  ;;  %1572 = vrot.lane.b32.xlu1 %v4943_v14, %s6017_s15 }
 0x8c6   : > { %1570 = vrot.lane.b32.xlu0 %v1501_v13, %s6017_s15  ;;  %1586 = vrot.lane.b32.xlu1 %v1500_v30, %s4509_s16 }
 0x8ca   : > { %1590 = vrot.lane.b32.xlu0 %v4943_v14, %s4509_s16  ;;  %1588 = vrot.lane.b32.xlu1 %v1501_v13, %s4509_s16 }
 0x8ce   : > { %1606 = vrot.lane.b32.xlu0 %v1501_v13, %s4510_s20  ;;  %1608 = vrot.lane.b32.xlu1 %v4943_v14, %s4510_s20 }
 0x8d2   : > { %1604 = vrot.lane.b32.xlu0 %v1500_v30, %s4510_s20  ;;  %1638 = vperm.xlu1 %4399, %v4235_v18  }
 0x8d6   : > { %1643 = vperm.xlu0 %4398, %v4236_v21   ;;  %1719 = vrot.lane.b32.xlu1 %v4911_v50, %s6025_s14 }
 0x924   : > { %v1531_v36 = vpop.permute.xlu0 %1530  ;;  %v1513_v37 = vpop.permute.xlu1 %1512 }
 0x925   : > { %v1516_v40 = vsel %vm1087_vm12, %v1511_v35, %v1513_v37  ;;  %v4241_v35 = vld [vmem:[%s5991_s4 + $0x30] sm:$0xff] }
 0x928   : > { %v1515_v23 = vpop.permute.xlu0 %1514  ;;  %v1549_v38 = vpop.permute.xlu1 %1548 }
 0x929   : > { %v1517_v39 = vsel %vm1087_vm12, %v1513_v37, %v1515_v23 }
 0x92a   : > { %1654 = vmatprep.subr.bf16.mxu0 %v1517_v39 }
 0x92b   : > { %1655 = vmatpush1.bf16.msra.mxu0 %v1516_v40 }
 0x92c   : > { %v1529_v41 = vpop.permute.xlu0 %1528  ;;  %v1533_v42 = vpop.permute.xlu1 %1532 }
 0x92d   : > { %v1534_v43 = vsel %vm1106_vm13, %v1529_v41, %v1531_v36  ;;  %v1535_v44 = vsel %vm1106_vm13, %v1531_v36, %v1533_v42  ;;  %v4242_v36 = vld [vmem:[%s5991_s4 + $0x38] sm:$0xff] }
 0x92e   : > { %1656 = vmatprep.subr.bf16.mxu0 %v1535_v44 }
 0x92f   : > { %1657 = vmatpush1.bf16.msra.mxu0 %v1534_v43 }
 0x930   : > { %v1551_v45 = vpop.permute.xlu0 %1550  ;;  %v1547_v46 = vpop.permute.xlu1 %1546 }
 0x931   : > { %v1552_v47 = vsel %vm1125_vm14, %v1547_v46, %v1549_v38  ;;  %v1553_v48 = vsel %vm1125_vm14, %v1549_v38, %v1551_v45 }
 0x932   : > { %1658 = vmatprep.subr.bf16.mxu0 %v1553_v48 }
 0x933   : > { %1659 = vmatpush1.bf16.msra.mxu0 %v1552_v47 }
 0x934   : > { %v1569_v49 = vpop.permute.xlu0 %1568  ;;  %1660 = vmatprep.subr.bf16.mxu0 %v1501_v13  ;;  %v1573_v51 = vpop.permute.xlu1 %1572 }
 0x937   : > { %1661 = vmatpush1.bf16.msra.mxu0 %v1500_v30 }
 0x938   : > { %v1571_v52 = vpop.permute.xlu0 %1570  ;;  %v1587_v53 = vpop.permute.xlu1 %1586 }
 0x939   : > { %v1575_v54 = vsel %vm1148_vm15, %v1571_v52, %v1573_v51  ;;  %v1574_v55 = vsel %vm1148_vm15, %v1569_v49, %v1571_v52 }
 0x93a   : > { %1662 = vmatprep.subr.bf16.mxu0 %v1575_v54 }
 0x93b   : > { %1663 = vmatpush1.bf16.msra.mxu0 %v1574_v55 }
 0x93c   : > { %v1591_v6 = vpop.permute.xlu0 %1590  ;;  %v1589_v56 = vpop.permute.xlu1 %1588 }
 0x93d   : > { %v1593_v57 = vsel %vm1167_vm0, %v1589_v56, %v1591_v6  ;;  %v1592_v58 = vsel %vm1167_vm0, %v1587_v53, %v1589_v56 }
 0x93e   : > { %1664 = vmatprep.subr.bf16.mxu0 %v1593_v57 }
 0x93f   : > { %1665 = vmatpush1.bf16.msra.mxu0 %v1592_v58 }
 0x940   : > { %v1607_v59 = vpop.permute.xlu0 %1606  ;;  %v1609_v60 = vpop.permute.xlu1 %1608 }
 0x941   : > { %v1611_v61 = vsel %vm1186_vm1, %v1607_v59, %v1609_v60 }
 0x942   : > { %1666 = vmatprep.subr.bf16.mxu0 %v1611_v61 }
 0x944   : > { %v1605_v62 = vpop.permute.xlu0 %1604 }
 0x945   : > { %v1610_v63 = vsel %vm1186_vm1, %v1605_v62, %v1607_v59 }
 0x946   : > { %1667 = vmatpush1.bf16.msra.mxu0 %v1610_v63 }
 0x949   : > { %4238 = vmatmul.mubr.msk.bf16.vlgmr.msra.gmra.mrb[16].mxu0 %vm1226_vm2, %v4408_v4 }
 0x94a   : > { %2108 = vmatprep.mubr.bf16.mxu0 %v4502_v0 }
 0x951   : > { %v1639_v5 = vpop.permute.xlu1 %1638 }
 0x955   : > { %v1644_v16 = vpop.permute.xlu0 %1643  ;;  %v1720_v37 = vpop.permute.xlu1 %1719 }
 0xa1c   : > { %v1688_v8 = vpop.f32.mrb[16].mxu0 }
 0xa1d   : > { %v1689_v10 = vadd.f32 %v1688_v8, %v1639_v5  ;;  %v1690_v11 = vpop.f32.mrb[17].mxu0  ;;  %v4409_v8 = vld [vmem:[%s6053_s3 + $0x18] sm:$0xff]  }
 0xa1e   : > { %v1691_v17 = vadd.f32 %v1690_v11, %v1639_v5  ;;  %v1692_v19 = vpop.f32.mrb[18].mxu0 }
 0xa1f   : > { %v1701_v22 = vmul.f32 0.01, %v1689_v10  ;;  %v1693_v3 = vadd.f32 %v1692_v19, %v1644_v16  ;;  %v1694_v24 = vpop.f32.mrb[19].mxu0  ;;  %vm1697_vm10 = vcmp.gt.f32.partialorder %v1689_v10, 0.0 }
 0xa20   : > { %v1702_v25 = vmul.f32 0.01, %v1691_v17  ;;  %v1695_v26 = vadd.f32 %v1694_v24, %v1644_v16  ;;  %vm1698_vm11 = vcmp.gt.f32.partialorder %v1691_v17, 0.0 }
 0xa21   : > { %vm1699_vm3 = vcmp.gt.f32.partialorder %v1693_v3, 0.0  ;;  %v1703_v27 = vmul.f32 0.01, %v1693_v3  ;;  %v1705_v30 = vsel %vm1697_vm10, %v1689_v10, %v1701_v22 }
 0xa22   : > { %vm1700_vm4 = vcmp.gt.f32.partialorder %v1695_v26, 0.0  ;;  %v1704_v28 = vmul.f32 0.01, %v1695_v26  ;;  %v1706_v33 = vsel %vm1698_vm11, %v1691_v17, %v1702_v25 }
 0xa23   : > { %v1707_v31 = vsel %vm1699_vm3, %v1693_v3, %v1703_v27 }
 0xa24   : > { %v1709_v13 = vpack.c.bf16 %v1707_v31, %v1705_v30  ;;  %v1708_v18 = vsel %vm1700_vm4, %v1695_v26, %v1704_v28 }
 0xa25   : > { %v1710_v21 = vpack.c.bf16 %v1708_v18, %v1706_v33 }
 0xa26   : > { %1739 = vrot.lane.b32.xlu0 %v1709_v13, %s6023_s29  ;;  %1721 = vrot.lane.b32.xlu1 %v1709_v13, %s6025_s14 }
 0xa2a   : > { %1723 = vrot.lane.b32.xlu0 %v1710_v21, %s6025_s14  ;;  %1757 = vrot.lane.b32.xlu1 %v1709_v13, %s5997_s18 }
 0xa2e   : > { %1737 = vrot.lane.b32.xlu0 %v4911_v50, %s6023_s29  ;;  %1741 = vrot.lane.b32.xlu1 %v1710_v21, %s6023_s29 }
 0xa32   : > { %1759 = vrot.lane.b32.xlu0 %v1710_v21, %s5997_s18  ;;  %1755 = vrot.lane.b32.xlu1 %v4911_v50, %s5997_s18  ;;  %s6005_s18 = smov 20  }
 0xa36   : > { %1777 = vrot.lane.b32.xlu0 %v1709_v13, %s6054_s22  ;;  %1781 = vrot.lane.b32.xlu1 %v4943_v14, %s6054_s22 }
 0xa3a   : > { %1779 = vrot.lane.b32.xlu0 %v1710_v21, %s6054_s22  ;;  %1795 = vrot.lane.b32.xlu1 %v1709_v13, %s6021_s8 }
 0xa3e   : > { %1799 = vrot.lane.b32.xlu0 %v4943_v14, %s6021_s8  ;;  %1797 = vrot.lane.b32.xlu1 %v1710_v21, %s6021_s8 }
 0xa42   : > { %1815 = vrot.lane.b32.xlu0 %v1710_v21, %s6017_s15  ;;  %1817 = vrot.lane.b32.xlu1 %v4943_v14, %s6017_s15 }
 0xa46   : > { %1813 = vrot.lane.b32.xlu0 %v1709_v13, %s6017_s15  ;;  %1847 = vperm.xlu1 %4399, %v4241_v35  }
 0xa4a   : > { %1852 = vperm.xlu0 %4398, %v4242_v36   ;;  %1932 = vrot.lane.b32.xlu1 %v4911_v50, %s4505_s9  ;;  %v4247_v36 = vld [vmem:[%s5991_s4 + $0x40] sm:$0xff] }
 0xa98   : > { %v1740_v23 = vpop.permute.xlu0 %1739  ;;  %v1722_v38 = vpop.permute.xlu1 %1721 }
 0xa99   : > { %v1725_v42 = vsel %vm1125_vm14, %v1720_v37, %v1722_v38  ;;  %v4248_v37 = vld [vmem:[%s5991_s4 + $0x48] sm:$0xff] }
 0xa9c   : > { %v1724_v39 = vpop.permute.xlu0 %1723  ;;  %v1758_v40 = vpop.permute.xlu1 %1757 }
 0xa9d   : > { %v1726_v41 = vsel %vm1125_vm14, %v1722_v38, %v1724_v39  ;;  %v2557_v38 = vld [vmem:[%s5993_s6 + $0x8] sm:$0xff] }
 0xa9e   : > { %1863 = vmatprep.subr.bf16.mxu1 %v1726_v41 }
 0xa9f   : > { %1864 = vmatpush1.bf16.msra.mxu1 %v1725_v42 }
 0xaa0   : > { %v1738_v43 = vpop.permute.xlu0 %1737  ;;  %v1742_v44 = vpop.permute.xlu1 %1741 }
 0xaa1   : > { %v1743_v45 = vsel %vm1319_vm5, %v1738_v43, %v1740_v23  ;;  %v1744_v46 = vsel %vm1319_vm5, %v1740_v23, %v1742_v44  ;;  %v5215_v23 = vld [vmem:[#allocation2 + $0x18] sm:$0xff] }
 0xaa2   : > { %1865 = vmatprep.subr.bf16.mxu1 %v1744_v46 }
 0xaa3   : > { %1866 = vmatpush1.bf16.msra.mxu1 %v1743_v45 }
 0xaa4   : > { %v1760_v47 = vpop.permute.xlu0 %1759  ;;  %v1756_v48 = vpop.permute.xlu1 %1755 }
 0xaa5   : > { %v1761_v49 = vsel %vm314_vm6, %v1756_v48, %v1758_v40  ;;  %v1762_v51 = vsel %vm314_vm6, %v1758_v40, %v1760_v47 }
 0xaa6   : > { %1867 = vmatprep.subr.bf16.mxu1 %v1762_v51 }
 0xaa7   : > { %1868 = vmatpush1.bf16.msra.mxu1 %v1761_v49 }
 0xaa8   : > { %v1778_v52 = vpop.permute.xlu0 %1777  ;;  %1869 = vmatprep.subr.bf16.mxu1 %v1710_v21  ;;  %v1782_v53 = vpop.permute.xlu1 %1781 }
 0xaab   : > { %1870 = vmatpush1.bf16.msra.mxu1 %v1709_v13 }
 0xaac   : > { %v1780_v54 = vpop.permute.xlu0 %1779  ;;  %v1796_v55 = vpop.permute.xlu1 %1795 }
 0xaad   : > { %v1784_v6 = vsel %vm337_vm7, %v1780_v54, %v1782_v53  ;;  %v1783_v56 = vsel %vm337_vm7, %v1778_v52, %v1780_v54 }
 0xaae   : > { %1871 = vmatprep.subr.bf16.mxu1 %v1784_v6 }
 0xaaf   : > { %1872 = vmatpush1.bf16.msra.mxu1 %v1783_v56 }
 0xab0   : > { %v1800_v57 = vpop.permute.xlu0 %1799  ;;  %v1798_v58 = vpop.permute.xlu1 %1797 }
 0xab1   : > { %v1802_v59 = vsel %vm1378_vm9, %v1798_v58, %v1800_v57  ;;  %v1801_v60 = vsel %vm1378_vm9, %v1796_v55, %v1798_v58 }
 0xab2   : > { %1873 = vmatprep.subr.bf16.mxu1 %v1802_v59 }
 0xab3   : > { %1874 = vmatpush1.bf16.msra.mxu1 %v1801_v60 }
 0xab4   : > { %v1816_v61 = vpop.permute.xlu0 %1815  ;;  %v1818_v62 = vpop.permute.xlu1 %1817 }
 0xab5   : > { %v1820_v63 = vsel %vm1148_vm15, %v1816_v61, %v1818_v62 }
 0xab6   : > { %1875 = vmatprep.subr.bf16.mxu1 %v1820_v63 }
 0xab8   : > { %v1814_v4 = vpop.permute.xlu0 %1813 }
 0xab9   : > { %v1819_v5 = vsel %vm1148_vm15, %v1814_v4, %v1816_v61 }
 0xaba   : > { %1876 = vmatpush1.bf16.msra.mxu1 %v1819_v5 }
 0xabd   : > { %4244 = vmatmul.mubr.msk.bf16.vlgmr.msra.gmra.mrb[16].mxu1 %vm1226_vm2, %v4409_v8 }
 0xabe   : > { %2317 = vmatprep.mubr.bf16.mxu1 %v4502_v0 }
 0xac5   : > { %v1848_v10 = vpop.permute.xlu1 %1847 }
 0xac9   : > { %v1853_v19 = vpop.permute.xlu0 %1852  ;;  %v1933_v39 = vpop.permute.xlu1 %1932 }
 0xb90   : > { %v1897_v11 = vpop.f32.mrb[16].mxu1 }
 0xb91   : > { %v1898_v16 = vadd.f32 %v1897_v11, %v1848_v10  ;;  %v1899_v17 = vpop.f32.mrb[17].mxu1 }
 0xb92   : > { %v1900_v22 = vadd.f32 %v1899_v17, %v1848_v10  ;;  %v1901_v3 = vpop.f32.mrb[18].mxu1  ;;  %v4411_v17 = vld [vmem:[%s5992_s5 + $0x4] ss:$8 sps:$4 sm:$0xff]  }
 0xb93   : > { %v5112_v24 = vadd.f32 %v1898_v16, %v4994_v9  ;;  %v1902_v25 = vadd.f32 %v1901_v3, %v1853_v19  ;;  %v1903_v26 = vpop.f32.mrb[19].mxu1  ;;  %v4410_v16 = vld [vmem:[%s6053_s3 + $0x20] sm:$0xff]  }
 0xb94   : > { %v1904_v27 = vadd.f32 %v1903_v26, %v1853_v19  ;;  %v5116_v30 = vadd.f32 %v1900_v22, %v4998_v20 }
 0xb95   : > { %v1914_v28 = vmul.f32 0.01, %v5112_v24  ;;  %v5119_v0 = vadd.f32 %v1902_v25, %v5001_v1  ;;  %vm1910_vm10 = vcmp.gt.f32.partialorder %v5112_v24, 0.0 }
 0xb96   : > { %v5123_v31 = vadd.f32 %v1904_v27, %v5005_v2  ;;  %v1915_v20 = vmul.f32 0.01, %v5116_v30  ;;  %vm1911_vm4 = vcmp.gt.f32.partialorder %v5116_v30, 0.0 }
 0xb97   : > { %vm1912_vm11 = vcmp.gt.f32.partialorder %v5119_v0, 0.0  ;;  %v1916_v9 = vmul.f32 0.01, %v5119_v0  ;;  %v1918_v13 = vsel %vm1910_vm10, %v5112_v24, %v1914_v28  ;;  %vm2426_vm10 = vcmask 39936  }
 0xb98   : > { %vm1913_vm3 = vcmp.gt.f32.partialorder %v5123_v31, 0.0  ;;  %v1917_v33 = vmul.f32 0.01, %v5123_v31  ;;  %v1919_v21 = vsel %vm1911_vm4, %v5116_v30, %v1915_v20  ;;  %vm6015_vm4 = vcmask 924672  }
 0xb99   : > { %v1920_v1 = vsel %vm1912_vm11, %v5119_v0, %v1916_v9  ;;  %vm6035_vm11 = vcmask 1006592  }
 0xb9a   : > { %v5133_v18 = vpack.c.bf16 %v1920_v1, %v1918_v13  ;;  %v1921_v2 = vsel %vm1913_vm3, %v5123_v31, %v1917_v33  ;;  %vm6012_vm3 = vcmask 965632  }
 0xb9b   : > { %v5141_v35 = vpack.c.bf16 %v1921_v2, %v1919_v21 }
 0xb9c   : > { %1952 = vrot.lane.b32.xlu0 %v5133_v18, %s4506_s13  ;;  %1934 = vrot.lane.b32.xlu1 %v5133_v18, %s4505_s9 }
 0xba0   : > { %1936 = vrot.lane.b32.xlu0 %v5141_v35, %s4505_s9  ;;  %1970 = vrot.lane.b32.xlu1 %v5133_v18, %s6025_s14  ;;  %s6031_s9 = smov 5  }
 0xba4   : > { %1950 = vrot.lane.b32.xlu0 %v4911_v50, %s4506_s13  ;;  %1954 = vrot.lane.b32.xlu1 %v5141_v35, %s4506_s13  ;;  %s6029_s13 = smov 123  }
 0xba8   : > { %1972 = vrot.lane.b32.xlu0 %v5141_v35, %s6025_s14  ;;  %1968 = vrot.lane.b32.xlu1 %v4911_v50, %s6025_s14 }
 0xbac   : > { %1990 = vrot.lane.b32.xlu0 %v5133_v18, %s6017_s15  ;;  %1994 = vrot.lane.b32.xlu1 %v4943_v14, %s6017_s15 }
 0xbb0   : > { %1992 = vrot.lane.b32.xlu0 %v5141_v35, %s6017_s15  ;;  %2008 = vrot.lane.b32.xlu1 %v5133_v18, %s4509_s16 }
 0xbb4   : > { %2012 = vrot.lane.b32.xlu0 %v4943_v14, %s4509_s16  ;;  %2010 = vrot.lane.b32.xlu1 %v5141_v35, %s4509_s16  ;;  %s6009_s16 = smov 25  }
 0xbb8   : > { %2028 = vrot.lane.b32.xlu0 %v5141_v35, %s4510_s20  ;;  %2030 = vrot.lane.b32.xlu1 %v4943_v14, %s4510_s20 }
 0xbbc   : > { %2026 = vrot.lane.b32.xlu0 %v5133_v18, %s4510_s20  ;;  %2060 = vperm.xlu1 %4399, %v4247_v36   ;;  %s5999_s20 = smov 10  }
 0xbc0   : > { %2065 = vperm.xlu0 %4398, %v4248_v37   ;;  %2344 = vrot.lane.b32.xlu1 %v4911_v50, %s6009_s16 }
 0xbc4   : > { %2363 = vrot.lane.b32.xlu0 %v4911_v50, %s6005_s18  ;;  %2382 = vrot.lane.b32.xlu1 %v4911_v50, %s6001_s23  ;;  %v5197_v50 = vld [vmem:[#allocation2] sm:$0xff] }
 0xbc8   : > { %2365 = vrot.lane.b32.xlu0 %v4655_v12, %s6005_s18  ;;  %2346 = vrot.lane.b32.xlu1 %v4655_v12, %s6009_s16 }
 0xbcc   : > { %2403 = vrot.lane.b32.xlu0 %v4655_v12, %s5999_s20  ;;  %2384 = vrot.lane.b32.xlu1 %v4655_v12, %s6001_s23 }
 0xbd0   : > { %2348 = vrot.lane.b32.xlu0 %v4661_v15, %s6009_s16  ;;  %2422 = vrot.lane.b32.xlu1 %v4655_v12, %s6031_s9  ;;  %s6019_s16 = smov 124  }
 0xbd4   : > { %2401 = vrot.lane.b32.xlu0 %v5197_v50, %s5999_s20  ;;  %2367 = vrot.lane.b32.xlu1 %v4661_v15, %s6005_s18  ;;  %s6057_s18 = smov 20  }
 0xbd8   : > { %2386 = vrot.lane.b32.xlu0 %v4661_v15, %s6001_s23  ;;  %2420 = vrot.lane.b32.xlu1 %v5197_v50, %s6031_s9  ;;  %s6036_s23 = smov 103  }
 0xbdc   : > { %2443 = vrot.lane.b32.xlu0 %v4655_v12, %s6029_s13  ;;  %2405 = vrot.lane.b32.xlu1 %v4661_v15, %s5999_s20  ;;  %s6038_s20 = smov 108  }
 0xbe0   : > { %2424 = vrot.lane.b32.xlu0 %v4661_v15, %s6031_s9  ;;  %2447 = vrot.lane.b32.xlu1 %v4943_v14, %s6029_s13  ;;  %v2556_v14 = vld [vmem:[%s5993_s6] sm:$0xff] }
 0xbe4   : > { %2466 = vrot.lane.b32.xlu0 %v5215_v23, %s6003_s19  ;;  %2462 = vrot.lane.b32.xlu1 %v4655_v12, %s6003_s19 }
 0xbe8   : > { %2445 = vrot.lane.b32.xlu0 %v4661_v15, %s6029_s13  ;;  %2485 = vrot.lane.b32.xlu1 %v5215_v23, %s6007_s21 }
 0xbec   : > { %2481 = vrot.lane.b32.xlu0 %v4655_v12, %s6007_s21  ;;  %2464 = vrot.lane.b32.xlu1 %v4661_v15, %s6003_s19  ;;  %s6055_s19 = smov 1  }
 0xbf0   : > { %2483 = vrot.lane.b32.xlu0 %v4661_v15, %s6007_s21  ;;  %2500 = vrot.lane.b32.xlu1 %v4655_v12, %s6038_s20  ;;  %s6027_s21 = smov 4  }
 0xbf4   : > { %2504 = vrot.lane.b32.xlu0 %v5215_v23, %s6038_s20  ;;  %2502 = vrot.lane.b32.xlu1 %v4661_v15, %s6038_s20 }
 0xbf8   : > { %2521 = vrot.lane.b32.xlu0 %v4661_v15, %s6036_s23  ;;  %2523 = vrot.lane.b32.xlu1 %v5215_v23, %s6036_s23 }
 0xbfc   : > { %2519 = vrot.lane.b32.xlu0 %v4655_v12, %s6036_s23  ;;  %2560 = vperm.xlu1 %4399, %v2556_v14  }
 0xc00   : > { %2565 = vperm.xlu0 %4398, %v2557_v38  }
 0xc0e   : > { %v1953_v40 = vpop.permute.xlu0 %1952  ;;  %v1935_v41 = vpop.permute.xlu1 %1934 }
 0xc0f   : > { %v1938_v45 = vsel %vm1087_vm12, %v1933_v39, %v1935_v41 }
 0xc12   : > { %v1937_v42 = vpop.permute.xlu0 %1936  ;;  %v1971_v43 = vpop.permute.xlu1 %1970 }
 0xc13   : > { %v1939_v44 = vsel %vm1087_vm12, %v1935_v41, %v1937_v42  ;;  %vm6033_vm12 = vcmask 203776  }
 0xc14   : > { %2076 = vmatprep.subr.bf16.mxu0 %v1939_v44 }
 0xc15   : > { %2077 = vmatpush1.bf16.msra.mxu0 %v1938_v45 }
 0xc16   : > { %v1951_v46 = vpop.permute.xlu0 %1950  ;;  %v1955_v47 = vpop.permute.xlu1 %1954 }
 0xc17   : > { %v1956_v48 = vsel %vm1106_vm13, %v1951_v46, %v1953_v40  ;;  %v1957_v49 = vsel %vm1106_vm13, %v1953_v40, %v1955_v47  ;;  %vm6034_vm13 = vcmask 162816  }
 0xc18   : > { %2078 = vmatprep.subr.bf16.mxu0 %v1957_v49 }
 0xc19   : > { %2079 = vmatpush1.bf16.msra.mxu0 %v1956_v48 }
 0xc1a   : > { %v1973_v51 = vpop.permute.xlu0 %1972  ;;  %v1969_v52 = vpop.permute.xlu1 %1968 }
 0xc1b   : > { %v1974_v53 = vsel %vm1125_vm14, %v1969_v52, %v1971_v43  ;;  %v1975_v54 = vsel %vm1125_vm14, %v1971_v43, %v1973_v51 }
 0xc1c   : > { %2080 = vmatprep.subr.bf16.mxu0 %v1975_v54 }
 0xc1d   : > { %2081 = vmatpush1.bf16.msra.mxu0 %v1974_v53 }
 0xc1e   : > { %v1991_v55 = vpop.permute.xlu0 %1990  ;;  %2082 = vmatprep.subr.bf16.mxu0 %v5141_v35  ;;  %v1995_v6 = vpop.permute.xlu1 %1994 }
 0xc21   : > { %2083 = vmatpush1.bf16.msra.mxu0 %v5133_v18 }
 0xc22   : > { %v1993_v56 = vpop.permute.xlu0 %1992  ;;  %v2009_v57 = vpop.permute.xlu1 %2008 }
 0xc23   : > { %v1997_v58 = vsel %vm1148_vm15, %v1993_v56, %v1995_v6  ;;  %v1996_v59 = vsel %vm1148_vm15, %v1991_v55, %v1993_v56 }
 0xc24   : > { %2084 = vmatprep.subr.bf16.mxu0 %v1997_v58 }
 0xc25   : > { %2085 = vmatpush1.bf16.msra.mxu0 %v1996_v59 }
 0xc26   : > { %v2013_v60 = vpop.permute.xlu0 %2012  ;;  %v2011_v61 = vpop.permute.xlu1 %2010 }
 0xc27   : > { %v2015_v62 = vsel %vm1167_vm0, %v2011_v61, %v2013_v60  ;;  %v2014_v63 = vsel %vm1167_vm0, %v2009_v57, %v2011_v61  ;;  %vm6016_vm0 = vcmask 121856  }
 0xc28   : > { %2086 = vmatprep.subr.bf16.mxu0 %v2015_v62 }
 0xc29   : > { %2087 = vmatpush1.bf16.msra.mxu0 %v2014_v63 }
 0xc2a   : > { %v2029_v4 = vpop.permute.xlu0 %2028  ;;  %v2031_v5 = vpop.permute.xlu1 %2030 }
 0xc2b   : > { %v2033_v8 = vsel %vm1186_vm1, %v2029_v4, %v2031_v5 }
 0xc2c   : > { %2088 = vmatprep.subr.bf16.mxu0 %v2033_v8 }
 0xc2e   : > { %v2027_v10 = vpop.permute.xlu0 %2026 }
 0xc2f   : > { %v2032_v11 = vsel %vm1186_vm1, %v2027_v10, %v2029_v4  ;;  %vm6011_vm1 = vcmask 80896  }
 0xc30   : > { %2089 = vmatpush1.bf16.msra.mxu0 %v2032_v11 }
 0xc33   : > { %4250 = vmatmul.mubr.msk.bf16.vlgmr.msra.gmra.mrb[20].mxu0 %vm1226_vm2, %v4410_v16  ;;  %v4413_v16 = vld [vmem:[%s5992_s5] ss:$8 sps:$4 sm:$0xff]  }
 0xc34   : > { %4259 = vmatprep.mubr.msk.bf16.mxu0 %vm369_vm8, %v4411_v17 }
 0xc3b   : > { %v5271_v19 = vpop.permute.xlu1 %2060 }
 0xc3f   : > { %v5273_v22 = vpop.permute.xlu0 %2065  ;;  %v2345_v3 = vpop.permute.xlu1 %2344 }
 0xc43   : > { %v2364_v25 = vpop.permute.xlu0 %2363  ;;  %v2383_v26 = vpop.permute.xlu1 %2382 }
 0xc47   : > { %v2366_v27 = vpop.permute.xlu0 %2365  ;;  %v2347_v28 = vpop.permute.xlu1 %2346 }
 0xc48   : > { %v2351_v18 = vsel %vm6033_vm12, %v2345_v3, %v2347_v28  ;;  %v2370_v36 = vsel %vm6034_vm13, %v2364_v25, %v2366_v27 }
 0xc4b   : > { %v2404_v9 = vpop.permute.xlu0 %2403  ;;  %v2385_v33 = vpop.permute.xlu1 %2384 }
 0xc4c   : > { %v2389_v39 = vsel %vm6016_vm0, %v2383_v26, %v2385_v33 }
 0xc4f   : > { %v2349_v13 = vpop.permute.xlu0 %2348  ;;  %v2423_v20 = vpop.permute.xlu1 %2422 }
 0xc50   : > { %v2352_v1 = vsel %vm6033_vm12, %v2347_v28, %v2349_v13 }
 0xc51   : > { %2580 = vmatprep.subr.bf16.mxu0 %v2352_v1 }
 0xc52   : > { %2581 = vmatpush1.bf16.msra.mxu0 %v2351_v18 }
 0xc53   : > { %v2402_v2 = vpop.permute.xlu0 %2401  ;;  %v2368_v21 = vpop.permute.xlu1 %2367 }
 0xc54   : > { %v2371_v35 = vsel %vm6034_vm13, %v2366_v27, %v2368_v21  ;;  %v2408_v43 = vsel %vm6011_vm1, %v2402_v2, %v2404_v9 }
 0xc55   : > { %2582 = vmatprep.subr.bf16.mxu0 %v2371_v35 }
 0xc56   : > { %2583 = vmatpush1.bf16.msra.mxu0 %v2370_v36 }
 0xc57   : > { %v2387_v37 = vpop.permute.xlu0 %2386  ;;  %v2421_v14 = vpop.permute.xlu1 %2420 }
 0xc58   : > { %v2390_v38 = vsel %vm6016_vm0, %v2385_v33, %v2387_v37  ;;  %v2427_v47 = vsel %vm2426_vm10, %v2421_v14, %v2423_v20 }
 0xc59   : > { %2584 = vmatprep.subr.bf16.mxu0 %v2390_v38 }
 0xc5a   : > { %2585 = vmatpush1.bf16.msra.mxu0 %v2389_v39 }
 0xc5b   : > { %v2444_v40 = vpop.permute.xlu0 %2443  ;;  %v2406_v41 = vpop.permute.xlu1 %2405 }
 0xc5c   : > { %v2409_v42 = vsel %vm6011_vm1, %v2404_v9, %v2406_v41  ;;  %vm6013_vm1 = vcmask 883712  }
 0xc5d   : > { %2586 = vmatprep.subr.bf16.mxu0 %v2409_v42 }
 0xc5e   : > { %2587 = vmatpush1.bf16.msra.mxu0 %v2408_v43 }
 0xc5f   : > { %v2425_v44 = vpop.permute.xlu0 %2424  ;;  %v2448_v45 = vpop.permute.xlu1 %2447 }
 0xc60   : > { %v2428_v46 = vsel %vm2426_vm10, %v2423_v20, %v2425_v44 }
 0xc61   : > { %2588 = vmatprep.subr.bf16.mxu0 %v2428_v46 }
 0xc62   : > { %2589 = vmatpush1.bf16.msra.mxu0 %v2427_v47 }
 0xc63   : > { %v2467_v48 = vpop.permute.xlu0 %2466  ;;  %v2463_v49 = vpop.permute.xlu1 %2462  ;;  %2590 = vmatprep.subr.bf16.mxu0 %v4661_v15 }
 0xc66   : > { %2591 = vmatpush1.bf16.msra.mxu0 %v4655_v12 }
 0xc67   : > { %v2446_v51 = vpop.permute.xlu0 %2445  ;;  %v2486_v52 = vpop.permute.xlu1 %2485 }
 0xc68   : > { %v2451_v53 = vsel %vm6035_vm11, %v2446_v51, %v2448_v45  ;;  %v2450_v54 = vsel %vm6035_vm11, %v2444_v40, %v2446_v51 }
 0xc69   : > { %2592 = vmatprep.subr.bf16.mxu0 %v2451_v53 }
 0xc6a   : > { %2593 = vmatpush1.bf16.msra.mxu0 %v2450_v54 }
 0xc6b   : > { %v2482_v55 = vpop.permute.xlu0 %2481  ;;  %v2465_v6 = vpop.permute.xlu1 %2464 }
 0xc6c   : > { %v2470_v56 = vsel %vm6012_vm3, %v2465_v6, %v2467_v48  ;;  %v2469_v57 = vsel %vm6012_vm3, %v2463_v49, %v2465_v6  ;;  %vm6014_vm3 = vcmask 842752  }
 0xc6d   : > { %2594 = vmatprep.subr.bf16.mxu0 %v2470_v56 }
 0xc6e   : > { %2595 = vmatpush1.bf16.msra.mxu0 %v2469_v57 }
 0xc6f   : > { %v2484_v15 = vpop.permute.xlu0 %2483  ;;  %v2501_v12 = vpop.permute.xlu1 %2500 }
 0xc70   : > { %v2489_v58 = vsel %vm6015_vm4, %v2484_v15, %v2486_v52  ;;  %v2488_v59 = vsel %vm6015_vm4, %v2482_v55, %v2484_v15 }
 0xc71   : > { %2596 = vmatprep.subr.bf16.mxu0 %v2489_v58 }
 0xc72   : > { %2597 = vmatpush1.bf16.msra.mxu0 %v2488_v59 }
 0xc73   : > { %v2505_v60 = vpop.permute.xlu0 %2504  ;;  %v2503_v61 = vpop.permute.xlu1 %2502 }
 0xc74   : > { %v2508_v62 = vsel %vm6013_vm1, %v2503_v61, %v2505_v60  ;;  %v2507_v63 = vsel %vm6013_vm1, %v2501_v12, %v2503_v61 }
 0xc75   : > { %2598 = vmatprep.subr.bf16.mxu0 %v2508_v62 }
 0xc76   : > { %2599 = vmatpush1.bf16.msra.mxu0 %v2507_v63 }
 0xc77   : > { %v2522_v4 = vpop.permute.xlu0 %2521  ;;  %v2524_v5 = vpop.permute.xlu1 %2523 }
 0xc78   : > { %v2527_v8 = vsel %vm6014_vm3, %v2522_v4, %v2524_v5 }
 0xc79   : > { %2600 = vmatprep.subr.bf16.mxu0 %v2527_v8  ;;  %v4262_v8 = vld [vmem:[%s5993_s6 + $0x10] sm:$0xff] }
 0xc7b   : > { %v2520_v10 = vpop.permute.xlu0 %2519 }
 0xc7c   : > { %v2526_v11 = vsel %vm6014_vm3, %v2520_v10, %v2522_v4 }
 0xc7d   : > { %2601 = vmatpush1.bf16.msra.mxu0 %v2526_v11 }
 0xc7f   : > { %v2566_v40 = vpop.permute.xlu0 %2565 }
 0xc80   : > { %2613 = vmatmul.mubr.bf16.vlgmr.msra.gmra.mrb[24].mxu0 %v4413_v16  ;;  %v4263_v16 = vld [vmem:[%s5993_s6 + $0x18] sm:$0xff] }
 0xd06   : > { %v2110_v17 = vpop.f32.mrb[20].mxu0 }
 0xd07   : > { %v2111_v3 = vadd.f32 %v2110_v17, %v5271_v19  ;;  %v2112_v25 = vpop.f32.mrb[21].mxu0 }
 0xd08   : > { %v2113_v26 = vadd.f32 %v2112_v25, %v5271_v19  ;;  %v2114_v27 = vpop.f32.mrb[22].mxu0 }
 0xd09   : > { %v2123_v28 = vmul.f32 0.01, %v2111_v3  ;;  %v2115_v9 = vadd.f32 %v2114_v27, %v5273_v22  ;;  %v2116_v33 = vpop.f32.mrb[23].mxu0  ;;  %vm2119_vm1 = vcmp.gt.f32.partialorder %v2111_v3, 0.0 }
 0xd0a   : > { %v2124_v13 = vmul.f32 0.01, %v2113_v26  ;;  %v2117_v20 = vadd.f32 %v2116_v33, %v5273_v22  ;;  %vm2120_vm3 = vcmp.gt.f32.partialorder %v2113_v26, 0.0  ;;  %v2561_v22 = vpop.permute.xlu1 %2560 }
 0xd0b   : > { %vm2121_vm4 = vcmp.gt.f32.partialorder %v2115_v9, 0.0  ;;  %v2125_v1 = vmul.f32 0.01, %v2115_v9  ;;  %v2127_v2 = vsel %vm2119_vm1, %v2111_v3, %v2123_v28 }
 0xd0c   : > { %vm2122_vm0 = vcmp.gt.f32.partialorder %v2117_v20, 0.0  ;;  %v2126_v18 = vmul.f32 0.01, %v2117_v20  ;;  %v2128_v35 = vsel %vm2120_vm3, %v2113_v26, %v2124_v13 }
 0xd0d   : > { %v2129_v21 = vsel %vm2121_vm4, %v2115_v9, %v2125_v1 }
 0xd0e   : > { %v5304_v36 = vpack.c.bf16 %v2129_v21, %v2127_v2  ;;  %v2130_v19 = vsel %vm2122_vm0, %v2117_v20, %v2126_v18 }
 0xd0f   : > { %v5306_v37 = vpack.c.bf16 %v2130_v19, %v2128_v35  ;;  %v4414_v19 = vld [vmem:[%s6053_s3 + $0x28] sm:$0xff]   ;;  %s4190_s3 = sshll.u32 %s269_s1, 5 }
 0xd10   : > { %2143 = vrot.lane.b32.xlu1 %v5304_v36, %s6025_s14  ;;  %s271_s26 = scalar_lea.vmem [#allocation4], %s4190_s3 }
 0xd11   : > { %2145 = vrot.lane.b32.xlu0 %v5306_v37, %s6025_s14  ;;  %s4124_s30 = sshll.u32 %s271_s26, 4  ;;  %s5937_s30 = int_to_ptr.vmem [resolvable:$true] %s4124_s30 }
 0xd14   : > { %2141 = vrot.lane.b32.xlu1 %v5197_v50, %s6025_s14 }
 0xd15   : > { %2161 = vrot.lane.b32.xlu0 %v5304_v36, %s6023_s29 }
 0xd18   : > { %2163 = vrot.lane.b32.xlu1 %v5306_v37, %s6023_s29 }
 0xd19   : > { %2159 = vrot.lane.b32.xlu0 %v5197_v50, %s6023_s29 }
 0xd1c   : > { %2179 = vrot.lane.b32.xlu1 %v5304_v36, %s6055_s19 }
 0xd1d   : > { %2181 = vrot.lane.b32.xlu0 %v5306_v37, %s6055_s19 }
 0xd20   : > { %2177 = vrot.lane.b32.xlu1 %v5197_v50, %s6055_s19 }
 0xd21   : > { %2201 = vrot.lane.b32.xlu0 %v5306_v37, %s6054_s22 }
 0xd24   : > { %2203 = vrot.lane.b32.xlu1 %v5215_v23, %s6054_s22 }
 0xd25   : > { %2199 = vrot.lane.b32.xlu0 %v5304_v36, %s6054_s22 }
 0xd28   : > { %2219 = vrot.lane.b32.xlu1 %v5306_v37, %s6021_s8 }
 0xd29   : > { %2221 = vrot.lane.b32.xlu0 %v5215_v23, %s6021_s8 }
 0xd2c   : > { %2217 = vrot.lane.b32.xlu1 %v5304_v36, %s6021_s8 }
 0xd2d   : > { %2237 = vrot.lane.b32.xlu0 %v5306_v37, %s6017_s15 }
 0xd30   : > { %2239 = vrot.lane.b32.xlu1 %v5215_v23, %s6017_s15 }
 0xd31   : > { %2235 = vrot.lane.b32.xlu0 %v5304_v36, %s6017_s15 }
 0xd34   : > { %2645 = vrot.lane.b32.xlu1 %v5197_v50, %s6031_s9 }
 0xd35   : > { %2663 = vrot.lane.b32.xlu0 %v5197_v50, %s6027_s21 }
 0xd38   : > { %2682 = vrot.lane.b32.xlu1 %v5197_v50, %s6025_s14 }
 0xd53   : > { %v2614_v14 = vpop.f32.mrb[24].mxu0 }
 0xd54   : > { %v2615_v38 = vadd.f32 %v2614_v14, %v2561_v22  ;;  %v2616_v39 = vpop.f32.mrb[25].mxu0 }
 0xd55   : > { %v2617_v41 = vadd.f32 %v2616_v39, %v2561_v22  ;;  %v2618_v42 = vpop.f32.mrb[26].mxu0 }
 0xd56   : > { %v2627_v43 = vmul.f32 0.01, %v2615_v38  ;;  %v2619_v44 = vadd.f32 %v2618_v42, %v2566_v40  ;;  %v2620_v45 = vpop.f32.mrb[27].mxu0  ;;  %vm2623_vm0 = vcmp.gt.f32.partialorder %v2615_v38, 0.0 }
 0xd57   : > { %v2628_v46 = vmul.f32 0.01, %v2617_v41  ;;  %v2621_v47 = vadd.f32 %v2620_v45, %v2566_v40  ;;  %vm2624_vm1 = vcmp.gt.f32.partialorder %v2617_v41, 0.0 }
 0xd58   : > { %vm2625_vm3 = vcmp.gt.f32.partialorder %v2619_v44, 0.0  ;;  %v2629_v48 = vmul.f32 0.01, %v2619_v44  ;;  %v2631_v51 = vsel %vm2623_vm0, %v2615_v38, %v2627_v43  ;;  %vm2669_vm0 = vcmask 31744  }
 0xd59   : > { %vm2626_vm4 = vcmp.gt.f32.partialorder %v2621_v47, 0.0  ;;  %v2630_v49 = vmul.f32 0.01, %v2621_v47  ;;  %v2632_v53 = vsel %vm2624_vm1, %v2617_v41, %v2628_v46 }
 0xd5a   : > { %v2633_v52 = vsel %vm2625_vm3, %v2619_v44, %v2629_v48 }
 0xd5b   : > { %v5350_v54 = vpack.c.bf16 %v2633_v52, %v2631_v51  ;;  %v2634_v55 = vsel %vm2626_vm4, %v2621_v47, %v2630_v49 }
 0xd5c   : > { %v5352_v6 = vpack.c.bf16 %v2634_v55, %v2632_v53 }
 0xd5d   : > { %2665 = vrot.lane.b32.xlu0 %v5350_v54, %s6027_s21  ;;  %2647 = vrot.lane.b32.xlu1 %v5350_v54, %s6031_s9 }
 0xd61   : > { %2702 = vrot.lane.b32.xlu0 %v5350_v54, %s6023_s29  ;;  %2684 = vrot.lane.b32.xlu1 %v5350_v54, %s6025_s14 }
 0xd65   : > { %2649 = vrot.lane.b32.xlu0 %v5352_v6, %s6031_s9  ;;  %2720 = vrot.lane.b32.xlu1 %v5350_v54, %s6055_s19 }
 0xd69   : > { %2700 = vrot.lane.b32.xlu0 %v5197_v50, %s6023_s29  ;;  %2667 = vrot.lane.b32.xlu1 %v5352_v6, %s6027_s21  ;;  %s6060_s21 = smov 118  }
 0xd6d   : > { %2686 = vrot.lane.b32.xlu0 %v5352_v6, %s6025_s14  ;;  %2718 = vrot.lane.b32.xlu1 %v5197_v50, %s6055_s19  ;;  %s6074_s14 = smov 5  }
 0xd71   : > { %2740 = vrot.lane.b32.xlu0 %v5350_v54, %s6054_s22  ;;  %2704 = vrot.lane.b32.xlu1 %v5352_v6, %s6023_s29  ;;  %s6075_s29 = smov 4  }
 0xd75   : > { %2722 = vrot.lane.b32.xlu0 %v5352_v6, %s6055_s19  ;;  %2744 = vrot.lane.b32.xlu1 %v5215_v23, %s6054_s22 }
 0xd79   : > { %2762 = vrot.lane.b32.xlu0 %v5215_v23, %s6021_s8  ;;  %2758 = vrot.lane.b32.xlu1 %v5350_v54, %s6021_s8 }
 0xd7d   : > { %2742 = vrot.lane.b32.xlu0 %v5352_v6, %s6054_s22  ;;  %2780 = vrot.lane.b32.xlu1 %v5215_v23, %s6017_s15 }
 0xd81   : > { %2776 = vrot.lane.b32.xlu0 %v5350_v54, %s6017_s15  ;;  %2760 = vrot.lane.b32.xlu1 %v5352_v6, %s6021_s8  ;;  %s6058_s8 = smov 15  }
 0xd82   : > { %v2144_v56 = vpop.permute.xlu1 %2143 }
 0xd83   : > { %v2146_v57 = vpop.permute.xlu0 %2145 }
 0xd84   : > { %v2148_v15 = vsel %vm1125_vm14, %v2144_v56, %v2146_v57 }
 0xd85   : > { %2285 = vmatprep.subr.bf16.mxu1 %v2148_v15  ;;  %2778 = vrot.lane.b32.xlu0 %v5352_v6, %s6017_s15  ;;  %s6056_s15 = smov 25  }
 0xd86   : > { %v2142_v12 = vpop.permute.xlu1 %2141  ;;  %2794 = vrot.lane.b32.xlu1 %v5350_v54, %s6019_s16 }
 0xd87   : > { %v2147_v58 = vsel %vm1125_vm14, %v2142_v12, %v2144_v56  ;;  %v2162_v59 = vpop.permute.xlu0 %2161 }
 0xd88   : > { %2286 = vmatpush1.bf16.msra.mxu1 %v2147_v58 }
 0xd89   : > { %2798 = vrot.lane.b32.xlu0 %v5215_v23, %s6019_s16 }
 0xd8a   : > { %v2164_v60 = vpop.permute.xlu1 %2163  ;;  %2796 = vrot.lane.b32.xlu1 %v5352_v6, %s6019_s16  ;;  %s6061_s16 = smov 113  }
 0xd8b   : > { %v2166_v61 = vsel %vm1319_vm5, %v2162_v59, %v2164_v60  ;;  %v2160_v62 = vpop.permute.xlu0 %2159 }
 0xd8c   : > { %2287 = vmatprep.subr.bf16.mxu1 %v2166_v61  ;;  %v2165_v63 = vsel %vm1319_vm5, %v2160_v62, %v2162_v59 }
 0xd8d   : > { %2288 = vmatpush1.bf16.msra.mxu1 %v2165_v63  ;;  %2815 = vrot.lane.b32.xlu0 %v5352_v6, %s6029_s13 }
 0xd8e   : > { %v2180_v4 = vpop.permute.xlu1 %2179  ;;  %2817 = vrot.lane.b32.xlu1 %v5215_v23, %s6029_s13 }
 0xd8f   : > { %v2182_v5 = vpop.permute.xlu0 %2181 }
 0xd90   : > { %v2184_v10 = vsel %vm314_vm6, %v2180_v4, %v2182_v5 }
 0xd91   : > { %2289 = vmatprep.subr.bf16.mxu1 %v2184_v10  ;;  %2813 = vrot.lane.b32.xlu0 %v5350_v54, %s6029_s13 }
 0xd92   : > { %v2178_v11 = vpop.permute.xlu1 %2177  ;;  %2855 = vperm.xlu1 %4399, %v4262_v8  }
 0xd93   : > { %v2183_v17 = vsel %vm314_vm6, %v2178_v11, %v2180_v4  ;;  %v2202_v3 = vpop.permute.xlu0 %2201 }
 0xd94   : > { %2290 = vmatpush1.bf16.msra.mxu1 %v2183_v17 }
 0xd95   : > { %2291 = vmatprep.subr.bf16.mxu1 %v5306_v37  ;;  %2860 = vperm.xlu0 %4398, %v4263_v16   ;;  %v4415_v37 = vld [vmem:[%s5992_s5 + $0x14] ss:$8 sps:$4 sm:$0xff]  }
 0xd96   : > { %v2204_v25 = vpop.permute.xlu1 %2203  ;;  %2944 = vrot.lane.b32.xlu1 %v5197_v50, %s6056_s15 }
 0xd97   : > { %v2200_v26 = vpop.permute.xlu0 %2199  ;;  %v2206_v27 = vsel %vm337_vm7, %v2202_v3, %v2204_v25 }
 0xd98   : > { %2292 = vmatpush1.bf16.msra.mxu1 %v5304_v36  ;;  %v2205_v9 = vsel %vm337_vm7, %v2200_v26, %v2202_v3 }
 0xd99   : > { %2293 = vmatprep.subr.bf16.mxu1 %v2206_v27  ;;  %2962 = vrot.lane.b32.xlu0 %v5197_v50, %s6057_s18 }
 0xd9a   : > { %v2220_v28 = vpop.permute.xlu1 %2219  ;;  %2980 = vrot.lane.b32.xlu1 %v5197_v50, %s6058_s8 }
 0xd9b   : > { %v2222_v33 = vpop.permute.xlu0 %2221 }
 0xd9c   : > { %2294 = vmatpush1.bf16.msra.mxu1 %v2205_v9  ;;  %v2224_v13 = vsel %vm1378_vm9, %v2220_v28, %v2222_v33 }
 0xd9d   : > { %2295 = vmatprep.subr.bf16.mxu1 %v2224_v13 }
 0xd9e   : > { %v2218_v20 = vpop.permute.xlu1 %2217 }
 0xd9f   : > { %v2223_v1 = vsel %vm1378_vm9, %v2218_v20, %v2220_v28  ;;  %v2238_v18 = vpop.permute.xlu0 %2237 }
 0xda0   : > { %2296 = vmatpush1.bf16.msra.mxu1 %v2223_v1 }
 0xda2   : > { %v2240_v2 = vpop.permute.xlu1 %2239 }
 0xda3   : > { %v2242_v21 = vsel %vm1148_vm15, %v2238_v18, %v2240_v2  ;;  %v2236_v35 = vpop.permute.xlu0 %2235 }
 0xda4   : > { %2297 = vmatprep.subr.bf16.mxu1 %v2242_v21  ;;  %v2241_v36 = vsel %vm1148_vm15, %v2236_v35, %v2238_v18  ;;  %v4417_v35 = vld [vmem:[%s5992_s5 + $0x10] ss:$8 sps:$4 sm:$0xff]  }
 0xda5   : > { %2298 = vmatpush1.bf16.msra.mxu1 %v2241_v36 }
 0xda6   : > { %v2646_v22 = vpop.permute.xlu1 %2645 }
 0xda7   : > { %v2664_v14 = vpop.permute.xlu0 %2663 }
 0xda8   : > { %4256 = vmatmul.mubr.msk.bf16.vlgmr.msra.gmra.mrb[8].mxu1 %vm1226_vm2, %v4414_v19  ;;  %vm2800_vm2 = vcmask 1014784  }
 0xda9   : > { %4266 = vmatprep.mubr.msk.bf16.mxu1 %vm369_vm8, %v4415_v37 }
 0xdaa   : > { %v2683_v38 = vpop.permute.xlu1 %2682 }
 0xdcf   : > { %v2666_v39 = vpop.permute.xlu0 %2665  ;;  %v2648_v40 = vpop.permute.xlu1 %2647 }
 0xdd0   : > { %v2651_v46 = vsel %vm2426_vm10, %v2646_v22, %v2648_v40  ;;  %v2670_v51 = vsel %vm2669_vm0, %v2664_v14, %v2666_v39 }
 0xdd3   : > { %v2703_v41 = vpop.permute.xlu0 %2702  ;;  %v2685_v42 = vpop.permute.xlu1 %2684 }
 0xdd4   : > { %v2688_v56 = vsel %vm1125_vm14, %v2683_v38, %v2685_v42 }
 0xdd7   : > { %v2650_v43 = vpop.permute.xlu0 %2649  ;;  %v2721_v44 = vpop.permute.xlu1 %2720 }
 0xdd8   : > { %v2652_v45 = vsel %vm2426_vm10, %v2648_v40, %v2650_v43 }
 0xdd9   : > { %2875 = vmatprep.subr.bf16.mxu1 %v2652_v45 }
 0xdda   : > { %2876 = vmatpush1.bf16.msra.mxu1 %v2651_v46  ;;  %v4435_v46 = vld [vmem:[%s4627_s17 + $0x10] sm:$0xff] }
 0xddb   : > { %v2701_v47 = vpop.permute.xlu0 %2700  ;;  %v2668_v48 = vpop.permute.xlu1 %2667 }
 0xddc   : > { %v2671_v49 = vsel %vm2669_vm0, %v2666_v39, %v2668_v48  ;;  %v2706_v58 = vsel %vm1319_vm5, %v2701_v47, %v2703_v41  ;;  %v4434_v39 = vld [vmem:[%s4627_s17] sm:$0xff] }
 0xddd   : > { %2877 = vmatprep.subr.bf16.mxu1 %v2671_v49  ;;  %v4436_v49 = vld [vmem:[%s4627_s17 + $0x18] sm:$0xff] }
 0xdde   : > { %2878 = vmatpush1.bf16.msra.mxu1 %v2670_v51 }
 0xddf   : > { %v2687_v52 = vpop.permute.xlu0 %2686  ;;  %v2719_v53 = vpop.permute.xlu1 %2718 }
 0xde0   : > { %v2689_v55 = vsel %vm1125_vm14, %v2685_v42, %v2687_v52  ;;  %v2724_v62 = vsel %vm314_vm6, %v2719_v53, %v2721_v44  ;;  %v4437_v53 = vld [vmem:[%s4627_s17 + $0x8] sm:$0xff]  ;;  %s6059_s17 = smov 10  }
 0xde1   : > { %2879 = vmatprep.subr.bf16.mxu1 %v2689_v55 }
 0xde2   : > { %2880 = vmatpush1.bf16.msra.mxu1 %v2688_v56 }
 0xde3   : > { %v2741_v57 = vpop.permute.xlu0 %2740  ;;  %v2705_v15 = vpop.permute.xlu1 %2704 }
 0xde4   : > { %v2707_v12 = vsel %vm1319_vm5, %v2703_v41, %v2705_v15 }
 0xde5   : > { %2881 = vmatprep.subr.bf16.mxu1 %v2707_v12 }
 0xde6   : > { %2882 = vmatpush1.bf16.msra.mxu1 %v2706_v58 }
 0xde7   : > { %v2723_v59 = vpop.permute.xlu0 %2722  ;;  %v2745_v60 = vpop.permute.xlu1 %2744 }
 0xde8   : > { %v2725_v61 = vsel %vm314_vm6, %v2721_v44, %v2723_v59 }
 0xde9   : > { %2883 = vmatprep.subr.bf16.mxu1 %v2725_v61  ;;  %v4269_v61 = vld [vmem:[%s5993_s6 + $0x20] sm:$0xff] }
 0xdea   : > { %2884 = vmatpush1.bf16.msra.mxu1 %v2724_v62  ;;  %v4270_v62 = vld [vmem:[%s5993_s6 + $0x28] sm:$0xff] }
 0xdeb   : > { %v2763_v63 = vpop.permute.xlu0 %2762  ;;  %2885 = vmatprep.subr.bf16.mxu1 %v5352_v6  ;;  %v2759_v4 = vpop.permute.xlu1 %2758 }
 0xdee   : > { %2886 = vmatpush1.bf16.msra.mxu1 %v5350_v54 }
 0xdef   : > { %v2743_v5 = vpop.permute.xlu0 %2742  ;;  %v2781_v8 = vpop.permute.xlu1 %2780 }
 0xdf0   : > { %v2747_v10 = vsel %vm337_vm7, %v2743_v5, %v2745_v60  ;;  %v2746_v11 = vsel %vm337_vm7, %v2741_v57, %v2743_v5 }
 0xdf1   : > { %2887 = vmatprep.subr.bf16.mxu1 %v2747_v10 }
 0xdf2   : > { %2888 = vmatpush1.bf16.msra.mxu1 %v2746_v11 }
 0xdf3   : > { %v2777_v16 = vpop.permute.xlu0 %2776  ;;  %v2761_v17 = vpop.permute.xlu1 %2760 }
 0xdf4   : > { %v2765_v3 = vsel %vm1378_vm9, %v2761_v17, %v2763_v63  ;;  %v2764_v25 = vsel %vm1378_vm9, %v2759_v4, %v2761_v17 }
 0xdf5   : > { %2889 = vmatprep.subr.bf16.mxu1 %v2765_v3 }
 0xdf6   : > { %2890 = vmatpush1.bf16.msra.mxu1 %v2764_v25 }
 0xdf7   : > { %v2779_v6 = vpop.permute.xlu0 %2778 }
 0xdf8   : > { %v2795_v26 = vpop.permute.xlu1 %2794  ;;  %v2783_v54 = vsel %vm1148_vm15, %v2779_v6, %v2781_v8  ;;  %v2782_v27 = vsel %vm1148_vm15, %v2777_v16, %v2779_v6 }
 0xdf9   : > { %2891 = vmatprep.subr.bf16.mxu1 %v2783_v54 }
 0xdfa   : > { %2892 = vmatpush1.bf16.msra.mxu1 %v2782_v27 }
 0xdfb   : > { %v2799_v28 = vpop.permute.xlu0 %2798 }
 0xdfc   : > { %v2797_v9 = vpop.permute.xlu1 %2796 }
 0xdfd   : > { %v2802_v33 = vsel %vm2800_vm2, %v2797_v9, %v2799_v28  ;;  %v2801_v13 = vsel %vm2800_vm2, %v2795_v26, %v2797_v9 }
 0xdfe   : > { %2893 = vmatprep.subr.bf16.mxu1 %v2802_v33 }
 0xdff   : > { %2894 = vmatpush1.bf16.msra.mxu1 %v2801_v13  ;;  %v2816_v20 = vpop.permute.xlu0 %2815 }
 0xe00   : > { %v2818_v1 = vpop.permute.xlu1 %2817 }
 0xe01   : > { %v2820_v18 = vsel %vm6035_vm11, %v2816_v20, %v2818_v1 }
 0xe02   : > { %2895 = vmatprep.subr.bf16.mxu1 %v2820_v18 }
 0xe03   : > { %v2814_v2 = vpop.permute.xlu0 %2813 }
 0xe04   : > { %v2819_v21 = vsel %vm6035_vm11, %v2814_v2, %v2816_v20 }
 0xe05   : > { %2896 = vmatpush1.bf16.msra.mxu1 %v2819_v21 }
 0xe08   : > { %2908 = vmatmul.mubr.bf16.vlgmr.msra.gmra.mrb[20].mxu1 %v4417_v35 }
 0xe11   : > { %v2856_v36 = vpop.permute.xlu1 %2855 }
 0xe14   : > { %v2861_v14 = vpop.permute.xlu0 %2860 }
 0xe15   : > { %v2945_v63 = vpop.permute.xlu1 %2944 }
 0xe18   : > { %v2963_v4 = vpop.permute.xlu0 %2962 }
 0xe19   : > { %v2981_v5 = vpop.permute.xlu1 %2980 }
 0xedb   : > { %v2909_v19 = vpop.f32.mrb[20].mxu1 }
 0xedc   : > { %v2910_v37 = vadd.f32 %v2909_v19, %v2856_v36  ;;  %v2911_v22 = vpop.f32.mrb[21].mxu1 }
 0xedd   : > { %v2913_v38 = vpop.f32.mrb[22].mxu1  ;;  %v2912_v45 = vadd.f32 %v2911_v22, %v2856_v36 }
 0xede   : > { %v5468_v40 = vadd.f32 %v4434_v39, %v2910_v37  ;;  %v2914_v41 = vadd.f32 %v2913_v38, %v2861_v14  ;;  %v2915_v42 = vpop.f32.mrb[23].mxu1 }
 0xedf   : > { %v2916_v43 = vadd.f32 %v2915_v42, %v2861_v14  ;;  %v5482_v55 = vadd.f32 %v4437_v53, %v2912_v45 }
 0xee0   : > { %v2926_v44 = vmul.f32 0.01, %v5468_v40  ;;  %v5472_v47 = vadd.f32 %v4435_v46, %v2914_v41  ;;  %vm2922_vm1 = vcmp.gt.f32.partialorder %v5468_v40, 0.0 }
 0xee1   : > { %v5478_v51 = vadd.f32 %v4436_v49, %v2916_v43  ;;  %v2927_v12 = vmul.f32 0.01, %v5482_v55 }
 0xee2   : > { %vm2924_vm3 = vcmp.gt.f32.partialorder %v5472_v47, 0.0  ;;  %v2928_v48 = vmul.f32 0.01, %v5472_v47  ;;  %v2930_v52 = vsel %vm2922_vm1, %v5468_v40, %v2926_v44  ;;  %vm2923_vm1 = vcmp.gt.f32.partialorder %v5482_v55, 0.0 }
 0xee3   : > { %v2929_v15 = vmul.f32 0.01, %v5478_v51  ;;  %vm2925_vm4 = vcmp.gt.f32.partialorder %v5478_v51, 0.0  ;;  %v2931_v59 = vsel %vm2923_vm1, %v5482_v55, %v2927_v12  ;;  %vm6064_vm1 = vcmask 80896  }
 0xee4   : > { %v2932_v56 = vsel %vm2924_vm3, %v5472_v47, %v2928_v48  ;;  %vm6062_vm3 = vcmask 121856  }
 0xee5   : > { %v5485_v57 = vpack.c.bf16 %v2932_v56, %v2930_v52  ;;  %v2933_v58 = vsel %vm2925_vm4, %v5478_v51, %v2929_v15  ;;  %vm6063_vm4 = vmmov %vm6062_vm3 }
 0xee6   : > { %v5501_v60 = vpack.c.bf16 %v2933_v58, %v2931_v59 }
 0xee7   : > { %2964 = vrot.lane.b32.xlu0 %v5485_v57, %s6057_s18  ;;  %2946 = vrot.lane.b32.xlu1 %v5485_v57, %s6056_s15 }
 0xeeb   : > { %3000 = vrot.lane.b32.xlu0 %v5485_v57, %s6059_s17  ;;  %2982 = vrot.lane.b32.xlu1 %v5485_v57, %s6058_s8 }
 0xeef   : > { %2948 = vrot.lane.b32.xlu0 %v5501_v60, %s6056_s15  ;;  %3018 = vrot.lane.b32.xlu1 %v5485_v57, %s6031_s9 }
 0xef3   : > { %2998 = vrot.lane.b32.xlu0 %v5197_v50, %s6059_s17  ;;  %2966 = vrot.lane.b32.xlu1 %v5501_v60, %s6057_s18 }
 0xef7   : > { %2984 = vrot.lane.b32.xlu0 %v5501_v60, %s6058_s8  ;;  %3016 = vrot.lane.b32.xlu1 %v5197_v50, %s6031_s9  ;;  %v4418_v50 = vld [vmem:[%s5992_s5 + $0x24] ss:$8 sps:$4 sm:$0xff]  }
 0xef8   : > { %4273 = vmatprep.mubr.msk.bf16.mxu0 %vm369_vm8, %v4418_v50 }
 0xefb   : > { %3038 = vrot.lane.b32.xlu0 %v5485_v57, %s6029_s13  ;;  %3002 = vrot.lane.b32.xlu1 %v5501_v60, %s6059_s17 }
 0xeff   : > { %3020 = vrot.lane.b32.xlu0 %v5501_v60, %s6031_s9  ;;  %3042 = vrot.lane.b32.xlu1 %v5215_v23, %s6029_s13  ;;  %s6077_s9 = smov 2  }
 0xf03   : > { %3060 = vrot.lane.b32.xlu0 %v5215_v23, %s6060_s21  ;;  %3056 = vrot.lane.b32.xlu1 %v5485_v57, %s6060_s21 }
 0xf07   : > { %3040 = vrot.lane.b32.xlu0 %v5501_v60, %s6029_s13  ;;  %3078 = vrot.lane.b32.xlu1 %v5215_v23, %s6061_s16  ;;  %s6078_s13 = smov 126  }
 0xf0b   : > { %3074 = vrot.lane.b32.xlu0 %v5485_v57, %s6061_s16  ;;  %3058 = vrot.lane.b32.xlu1 %v5501_v60, %s6060_s21 }
 0xf0f   : > { %3076 = vrot.lane.b32.xlu0 %v5501_v60, %s6061_s16  ;;  %3092 = vrot.lane.b32.xlu1 %v5485_v57, %s6038_s20 }
 0xf13   : > { %3096 = vrot.lane.b32.xlu0 %v5215_v23, %s6038_s20  ;;  %3094 = vrot.lane.b32.xlu1 %v5501_v60, %s6038_s20  ;;  %s6079_s20 = smov 125  }
 0xf17   : > { %3112 = vrot.lane.b32.xlu0 %v5501_v60, %s6036_s23  ;;  %3114 = vrot.lane.b32.xlu1 %v5215_v23, %s6036_s23 }
 0xf1b   : > { %3110 = vrot.lane.b32.xlu0 %v5485_v57, %s6036_s23  ;;  %3152 = vperm.xlu1 %4399, %v4269_v61   ;;  %v4420_v61 = vld [vmem:[%s5992_s5 + $0x20] ss:$8 sps:$4 sm:$0xff]   ;;  %s6076_s23 = smov 3  }
 0xf1f   : > { %3157 = vperm.xlu0 %4398, %v4270_v62   ;;  %v5584_v62 = vld [vmem:[#allocation2] sm:$0xff] }
 0xf20   : > { %3237 = vrot.lane.b32.xlu1 %v5584_v62, %s6074_s14 }
 0xf23   : > { %3255 = vrot.lane.b32.xlu0 %v5584_v62, %s6075_s29 }
 0xf24   : > { %3273 = vrot.lane.b32.xlu1 %v5584_v62, %s6076_s23 }
 0xf59   : > { %v2965_v8 = vpop.permute.xlu0 %2964  ;;  %v2947_v10 = vpop.permute.xlu1 %2946 }
 0xf5a   : > { %v2950_v25 = vsel %vm6033_vm12, %v2945_v63, %v2947_v10  ;;  %v2968_v27 = vsel %vm6034_vm13, %v2963_v4, %v2965_v8 }
 0xf5d   : > { %v3001_v11 = vpop.permute.xlu0 %3000  ;;  %v2983_v23 = vpop.permute.xlu1 %2982 }
 0xf5e   : > { %v2986_v13 = vsel %vm6063_vm4, %v2981_v5, %v2983_v23  ;;  %vm6068_vm4 = vcmask 924672  }
 0xf61   : > { %v2949_v16 = vpop.permute.xlu0 %2948  ;;  %v3019_v17 = vpop.permute.xlu1 %3018 }
 0xf62   : > { %v2951_v3 = vsel %vm6033_vm12, %v2947_v10, %v2949_v16  ;;  %vm6065_vm12 = vmmov %vm6064_vm1 }
 0xf63   : > { %3172 = vmatprep.subr.bf16.mxu0 %v2951_v3 }
 0xf64   : > { %3173 = vmatpush1.bf16.msra.mxu0 %v2950_v25 }
 0xf65   : > { %v2999_v6 = vpop.permute.xlu0 %2998  ;;  %v2967_v26 = vpop.permute.xlu1 %2966 }
 0xf66   : > { %v2969_v54 = vsel %vm6034_vm13, %v2965_v8, %v2967_v26  ;;  %v3004_v2 = vsel %vm6065_vm12, %v2999_v6, %v3001_v11  ;;  %vm6066_vm12 = vcmask 965632   ;;  %vm6070_vm13 = vcmask 883712  }
 0xf67   : > { %3174 = vmatprep.subr.bf16.mxu0 %v2969_v54 }
 0xf68   : > { %3175 = vmatpush1.bf16.msra.mxu0 %v2968_v27 }
 0xf69   : > { %v2985_v28 = vpop.permute.xlu0 %2984  ;;  %v3017_v9 = vpop.permute.xlu1 %3016 }
 0xf6a   : > { %v2987_v33 = vsel %vm6062_vm3, %v2983_v23, %v2985_v28  ;;  %v3022_v19 = vsel %vm2426_vm10, %v3017_v9, %v3019_v17  ;;  %vm6067_vm3 = vmmov %vm6066_vm12 }
 0xf6b   : > { %3176 = vmatprep.subr.bf16.mxu0 %v2987_v33 }
 0xf6c   : > { %3177 = vmatpush1.bf16.msra.mxu0 %v2986_v13 }
 0xf6d   : > { %v3039_v20 = vpop.permute.xlu0 %3038  ;;  %v3003_v1 = vpop.permute.xlu1 %3002 }
 0xf6e   : > { %v3005_v18 = vsel %vm6064_vm1, %v3001_v11, %v3003_v1  ;;  %vm6069_vm1 = vmmov %vm6068_vm4  ;;  %v5620_v1 = vld [vmem:[#allocation2 + $0x18] sm:$0xff] }
 0xf6f   : > { %3178 = vmatprep.subr.bf16.mxu0 %v3005_v18  ;;  %v4421_v18 = vld [vmem:[%s5992_s5 + $0x34] ss:$8 sps:$4 sm:$0xff]  }
 0xf70   : > { %3179 = vmatpush1.bf16.msra.mxu0 %v3004_v2  ;;  %4280 = vmatprep.mubr.msk.bf16.mxu1 %vm369_vm8, %v4421_v18  ;;  %v4276_v2 = vld [vmem:[%s5993_s6 + $0x30] sm:$0xff] }
 0xf71   : > { %v3021_v21 = vpop.permute.xlu0 %3020  ;;  %v3043_v35 = vpop.permute.xlu1 %3042 }
 0xf72   : > { %v3023_v36 = vsel %vm2426_vm10, %v3019_v17, %v3021_v21  ;;  %v4277_v21 = vld [vmem:[%s5993_s6 + $0x38] sm:$0xff] }
 0xf73   : > { %3180 = vmatprep.subr.bf16.mxu0 %v3023_v36 }
 0xf74   : > { %3181 = vmatpush1.bf16.msra.mxu0 %v3022_v19 }
 0xf75   : > { %v3061_v37 = vpop.permute.xlu0 %3060  ;;  %3182 = vmatprep.subr.bf16.mxu0 %v5501_v60  ;;  %v3057_v22 = vpop.permute.xlu1 %3056 }
 0xf78   : > { %3183 = vmatpush1.bf16.msra.mxu0 %v5485_v57 }
 0xf79   : > { %v3041_v14 = vpop.permute.xlu0 %3040  ;;  %v3079_v38 = vpop.permute.xlu1 %3078 }
 0xf7a   : > { %v3045_v39 = vsel %vm6035_vm11, %v3041_v14, %v3043_v35  ;;  %v3044_v41 = vsel %vm6035_vm11, %v3039_v20, %v3041_v14  ;;  %vm6071_vm11 = vmmov %vm6070_vm13 }
 0xf7b   : > { %3184 = vmatprep.subr.bf16.mxu0 %v3045_v39 }
 0xf7c   : > { %3185 = vmatpush1.bf16.msra.mxu0 %v3044_v41 }
 0xf7d   : > { %v3075_v42 = vpop.permute.xlu0 %3074  ;;  %v3059_v43 = vpop.permute.xlu1 %3058 }
 0xf7e   : > { %v3063_v44 = vsel %vm6066_vm12, %v3059_v43, %v3061_v37  ;;  %v3062_v45 = vsel %vm6067_vm3, %v3057_v22, %v3059_v43  ;;  %vm6072_vm12 = vcmask 842752  }
 0xf7f   : > { %3186 = vmatprep.subr.bf16.mxu0 %v3063_v44  ;;  %vm6073_vm3 = vmmov %vm6072_vm12 }
 0xf80   : > { %3187 = vmatpush1.bf16.msra.mxu0 %v3062_v45 }
 0xf81   : > { %v3077_v46 = vpop.permute.xlu0 %3076  ;;  %v3093_v48 = vpop.permute.xlu1 %3092 }
 0xf82   : > { %v3081_v49 = vsel %vm6068_vm4, %v3077_v46, %v3079_v38  ;;  %v3080_v52 = vsel %vm6069_vm1, %v3075_v42, %v3077_v46 }
 0xf83   : > { %3188 = vmatprep.subr.bf16.mxu0 %v3081_v49 }
 0xf84   : > { %3189 = vmatpush1.bf16.msra.mxu0 %v3080_v52 }
 0xf85   : > { %v3097_v53 = vpop.permute.xlu0 %3096  ;;  %v3095_v56 = vpop.permute.xlu1 %3094 }
 0xf86   : > { %v3099_v57 = vsel %vm6070_vm13, %v3095_v56, %v3097_v53  ;;  %v3098_v15 = vsel %vm6071_vm11, %v3093_v48, %v3095_v56 }
 0xf87   : > { %3190 = vmatprep.subr.bf16.mxu0 %v3099_v57 }
 0xf88   : > { %3191 = vmatpush1.bf16.msra.mxu0 %v3098_v15 }
 0xf89   : > { %v3113_v12 = vpop.permute.xlu0 %3112  ;;  %v3115_v58 = vpop.permute.xlu1 %3114 }
 0xf8a   : > { %v3117_v59 = vsel %vm6072_vm12, %v3113_v12, %v3115_v58  ;;  %vm6082_vm12 = vcmask 1006592  }
 0xf8b   : > { %3192 = vmatprep.subr.bf16.mxu0 %v3117_v59 }
 0xf8d   : > { %v3111_v60 = vpop.permute.xlu0 %3110 }
 0xf8e   : > { %v3116_v50 = vsel %vm6073_vm3, %v3111_v60, %v3113_v12  ;;  %vm6083_vm3 = vmmov %vm6082_vm12 }
 0xf8f   : > { %3193 = vmatpush1.bf16.msra.mxu0 %v3116_v50 }
 0xf92   : > { %3205 = vmatmul.mubr.bf16.vlgmr.msra.gmra.mrb[28].mxu0 %v4420_v61 }
 0xf9a   : > { %v3153_v63 = vpop.permute.xlu1 %3152 }
 0xf9e   : > { %v3158_v10 = vpop.permute.xlu0 %3157  ;;  %v3238_v35 = vpop.permute.xlu1 %3237 }
 0xfa2   : > { %v3256_v36 = vpop.permute.xlu0 %3255  ;;  %v3274_v19 = vpop.permute.xlu1 %3273 }
0x1065   : > { %v3206_v4 = vpop.f32.mrb[28].mxu0 }
0x1066   : > { %v3207_v5 = vadd.f32 %v3206_v4, %v3153_v63  ;;  %v3208_v8 = vpop.f32.mrb[29].mxu0 }
0x1067   : > { %v3209_v11 = vadd.f32 %v3208_v8, %v3153_v63  ;;  %v3210_v23 = vpop.f32.mrb[30].mxu0 }
0x1068   : > { %v3219_v16 = vmul.f32 0.01, %v3207_v5  ;;  %v3211_v17 = vadd.f32 %v3210_v23, %v3158_v10  ;;  %v3212_v3 = vpop.f32.mrb[31].mxu0  ;;  %vm3215_vm13 = vcmp.gt.f32.partialorder %v3207_v5, 0.0 }
0x1069   : > { %v3220_v25 = vmul.f32 0.01, %v3209_v11  ;;  %v3213_v6 = vadd.f32 %v3212_v3, %v3158_v10  ;;  %vm3216_vm11 = vcmp.gt.f32.partialorder %v3209_v11, 0.0 }
0x106a   : > { %vm3217_vm4 = vcmp.gt.f32.partialorder %v3211_v17, 0.0  ;;  %v3221_v26 = vmul.f32 0.01, %v3211_v17  ;;  %v3223_v27 = vsel %vm3215_vm13, %v3207_v5, %v3219_v16 }
0x106b   : > { %vm3218_vm1 = vcmp.gt.f32.partialorder %v3213_v6, 0.0  ;;  %v3222_v54 = vmul.f32 0.01, %v3213_v6  ;;  %v3224_v9 = vsel %vm3216_vm11, %v3209_v11, %v3220_v25 }
0x106c   : > { %v3225_v28 = vsel %vm3217_vm4, %v3211_v17, %v3221_v26 }
0x106d   : > { %v5592_v33 = vpack.c.bf16 %v3225_v28, %v3223_v27  ;;  %v3226_v13 = vsel %vm3218_vm1, %v3213_v6, %v3222_v54 }
0x106e   : > { %v5594_v20 = vpack.c.bf16 %v3226_v13, %v3224_v9 }
0x106f   : > { %3257 = vrot.lane.b32.xlu0 %v5592_v33, %s6075_s29  ;;  %3239 = vrot.lane.b32.xlu1 %v5592_v33, %s6074_s14 }
0x1073   : > { %3293 = vrot.lane.b32.xlu0 %v5592_v33, %s6077_s9  ;;  %3275 = vrot.lane.b32.xlu1 %v5592_v33, %s6076_s23 }
0x1077   : > { %3241 = vrot.lane.b32.xlu0 %v5594_v20, %s6074_s14  ;;  %3311 = vrot.lane.b32.xlu1 %v5592_v33, %s6055_s19 }
0x107b   : > { %3291 = vrot.lane.b32.xlu0 %v5584_v62, %s6077_s9  ;;  %3259 = vrot.lane.b32.xlu1 %v5594_v20, %s6075_s29 }
0x107f   : > { %3277 = vrot.lane.b32.xlu0 %v5594_v20, %s6076_s23  ;;  %3309 = vrot.lane.b32.xlu1 %v5584_v62, %s6055_s19 }
0x1083   : > { %3331 = vrot.lane.b32.xlu0 %v5592_v33, %s6054_s22  ;;  %3295 = vrot.lane.b32.xlu1 %v5594_v20, %s6077_s9 }
0x1087   : > { %3313 = vrot.lane.b32.xlu0 %v5594_v20, %s6055_s19  ;;  %3335 = vrot.lane.b32.xlu1 %v5620_v1, %s6054_s22 }
0x108b   : > { %3353 = vrot.lane.b32.xlu0 %v5620_v1, %s6078_s13  ;;  %3349 = vrot.lane.b32.xlu1 %v5592_v33, %s6078_s13 }
0x108f   : > { %3333 = vrot.lane.b32.xlu0 %v5594_v20, %s6054_s22  ;;  %3371 = vrot.lane.b32.xlu1 %v5620_v1, %s6079_s20 }
0x1093   : > { %3367 = vrot.lane.b32.xlu0 %v5592_v33, %s6079_s20  ;;  %3351 = vrot.lane.b32.xlu1 %v5594_v20, %s6078_s13 }
0x1097   : > { %3369 = vrot.lane.b32.xlu0 %v5594_v20, %s6079_s20  ;;  %3385 = vrot.lane.b32.xlu1 %v5592_v33, %s6080_s0 }
0x109b   : > { %3389 = vrot.lane.b32.xlu0 %v5620_v1, %s6080_s0  ;;  %3387 = vrot.lane.b32.xlu1 %v5594_v20, %s6080_s0 }
0x109f   : > { %3405 = vrot.lane.b32.xlu0 %v5594_v20, %s6081_s10  ;;  %3407 = vrot.lane.b32.xlu1 %v5620_v1, %s6081_s10 }
0x10a3   : > { %3403 = vrot.lane.b32.xlu0 %v5592_v33, %s6081_s10  ;;  %3445 = vperm.xlu1 %4399, %v4276_v2  }
0x10a7   : > { %3450 = vperm.xlu0 %4398, %v4277_v21   ;;  %3534 = vrot.lane.b32.xlu1 %v5584_v62, %s6056_s15 }
0x10ab   : > { %3552 = vrot.lane.b32.xlu0 %v5584_v62, %s6057_s18  ;;  %3570 = vrot.lane.b32.xlu1 %v5584_v62, %s6058_s8 }
0x10e1   : > { %v3258_v37 = vpop.permute.xlu0 %3257  ;;  %v3240_v22 = vpop.permute.xlu1 %3239 }
0x10e2   : > { %v3243_v43 = vsel %vm2426_vm10, %v3238_v35, %v3240_v22  ;;  %v3261_v48 = vsel %vm2669_vm0, %v3256_v36, %v3258_v37  ;;  %v4423_v35 = vld [vmem:[%s5992_s5 + $0x30] ss:$8 sps:$4 sm:$0xff]  }
0x10e5   : > { %v3294_v14 = vpop.permute.xlu0 %3293  ;;  %v3276_v38 = vpop.permute.xlu1 %3275 }
0x10e6   : > { %v3279_v56 = vsel %vm1125_vm14, %v3274_v19, %v3276_v38 }
0x10e9   : > { %v3242_v39 = vpop.permute.xlu0 %3241  ;;  %v3312_v41 = vpop.permute.xlu1 %3311 }
0x10ea   : > { %v3244_v42 = vsel %vm2426_vm10, %v3240_v22, %v3242_v39 }
0x10eb   : > { %3465 = vmatprep.subr.bf16.mxu1 %v3244_v42 }
0x10ec   : > { %3466 = vmatpush1.bf16.msra.mxu1 %v3243_v43 }
0x10ed   : > { %v3292_v44 = vpop.permute.xlu0 %3291  ;;  %v3260_v45 = vpop.permute.xlu1 %3259 }
0x10ee   : > { %v3262_v46 = vsel %vm2669_vm0, %v3258_v37, %v3260_v45  ;;  %v3297_v58 = vsel %vm1319_vm5, %v3292_v44, %v3294_v14 }
0x10ef   : > { %3467 = vmatprep.subr.bf16.mxu1 %v3262_v46 }
0x10f0   : > { %3468 = vmatpush1.bf16.msra.mxu1 %v3261_v48 }
0x10f1   : > { %v3278_v49 = vpop.permute.xlu0 %3277  ;;  %v3310_v52 = vpop.permute.xlu1 %3309 }
0x10f2   : > { %v3280_v53 = vsel %vm1125_vm14, %v3276_v38, %v3278_v49  ;;  %v3315_v61 = vsel %vm314_vm6, %v3310_v52, %v3312_v41 }
0x10f3   : > { %3469 = vmatprep.subr.bf16.mxu1 %v3280_v53 }
0x10f4   : > { %3470 = vmatpush1.bf16.msra.mxu1 %v3279_v56 }
0x10f5   : > { %v3332_v57 = vpop.permute.xlu0 %3331  ;;  %v3296_v15 = vpop.permute.xlu1 %3295 }
0x10f6   : > { %v3298_v12 = vsel %vm1319_vm5, %v3294_v14, %v3296_v15 }
0x10f7   : > { %3471 = vmatprep.subr.bf16.mxu1 %v3298_v12  ;;  %v4424_v12 = vld [vmem:[%s5992_s5 + $0x44] ss:$8 sps:$4 sm:$0xff]  }
0x10f8   : > { %3472 = vmatpush1.bf16.msra.mxu1 %v3297_v58  ;;  %4287 = vmatprep.mubr.msk.bf16.mxu0 %vm369_vm8, %v4424_v12  ;;  %v4283_v58 = vld [vmem:[%s5993_s6 + $0x40] sm:$0xff] }
0x10f9   : > { %v3314_v59 = vpop.permute.xlu0 %3313  ;;  %v3336_v60 = vpop.permute.xlu1 %3335 }
0x10fa   : > { %v3316_v50 = vsel %vm314_vm6, %v3312_v41, %v3314_v59  ;;  %v4284_v59 = vld [vmem:[%s5993_s6 + $0x48] sm:$0xff] }
0x10fb   : > { %3473 = vmatprep.subr.bf16.mxu1 %v3316_v50 }
0x10fc   : > { %3474 = vmatpush1.bf16.msra.mxu1 %v3315_v61 }
0x10fd   : > { %v3354_v63 = vpop.permute.xlu0 %3353  ;;  %3475 = vmatprep.subr.bf16.mxu1 %v5594_v20  ;;  %v3350_v4 = vpop.permute.xlu1 %3349 }
0x1100   : > { %3476 = vmatpush1.bf16.msra.mxu1 %v5592_v33 }
0x1101   : > { %v3334_v5 = vpop.permute.xlu0 %3333  ;;  %v3372_v8 = vpop.permute.xlu1 %3371 }
0x1102   : > { %v3337_v10 = vsel %vm337_vm7, %v3332_v57, %v3334_v5  ;;  %v3338_v11 = vsel %vm337_vm7, %v3334_v5, %v3336_v60 }
0x1103   : > { %3477 = vmatprep.subr.bf16.mxu1 %v3338_v11 }
0x1104   : > { %3478 = vmatpush1.bf16.msra.mxu1 %v3337_v10 }
0x1105   : > { %v3368_v23 = vpop.permute.xlu0 %3367  ;;  %v3352_v16 = vpop.permute.xlu1 %3351 }
0x1106   : > { %v3355_v17 = vsel %vm1378_vm9, %v3350_v4, %v3352_v16  ;;  %v3356_v3 = vsel %vm1378_vm9, %v3352_v16, %v3354_v63 }
0x1107   : > { %3479 = vmatprep.subr.bf16.mxu1 %v3356_v3 }
0x1108   : > { %3480 = vmatpush1.bf16.msra.mxu1 %v3355_v17 }
0x1109   : > { %v3370_v25 = vpop.permute.xlu0 %3369  ;;  %v3386_v6 = vpop.permute.xlu1 %3385 }
0x110a   : > { %v3373_v26 = vsel %vm1148_vm15, %v3368_v23, %v3370_v25  ;;  %v3374_v54 = vsel %vm1148_vm15, %v3370_v25, %v3372_v8 }
0x110b   : > { %3481 = vmatprep.subr.bf16.mxu1 %v3374_v54 }
0x110c   : > { %3482 = vmatpush1.bf16.msra.mxu1 %v3373_v26 }
0x110d   : > { %v3390_v27 = vpop.permute.xlu0 %3389  ;;  %v3388_v28 = vpop.permute.xlu1 %3387 }
0x110e   : > { %v3391_v9 = vsel %vm2800_vm2, %v3386_v6, %v3388_v28  ;;  %v3392_v33 = vsel %vm2800_vm2, %v3388_v28, %v3390_v27 }
0x110f   : > { %3483 = vmatprep.subr.bf16.mxu1 %v3392_v33 }
0x1110   : > { %3484 = vmatpush1.bf16.msra.mxu1 %v3391_v9 }
0x1111   : > { %v3406_v13 = vpop.permute.xlu0 %3405  ;;  %v3408_v20 = vpop.permute.xlu1 %3407 }
0x1112   : > { %v3410_v18 = vsel %vm6082_vm12, %v3406_v13, %v3408_v20  ;;  %vm6086_vm12 = vcmask 203776  }
0x1113   : > { %3485 = vmatprep.subr.bf16.mxu1 %v3410_v18 }
0x1115   : > { %v3404_v2 = vpop.permute.xlu0 %3403 }
0x1116   : > { %v3409_v21 = vsel %vm6083_vm3, %v3404_v2, %v3406_v13  ;;  %vm6087_vm3 = vmmov %vm6086_vm12 }
0x1117   : > { %3486 = vmatpush1.bf16.msra.mxu1 %v3409_v21 }
0x111a   : > { %3498 = vmatmul.mubr.bf16.vlgmr.msra.gmra.mrb[24].mxu1 %v4423_v35 }
0x1122   : > { %v3446_v36 = vpop.permute.xlu1 %3445 }
0x1126   : > { %v3451_v14 = vpop.permute.xlu0 %3450  ;;  %v3535_v60 = vpop.permute.xlu1 %3534 }
0x112a   : > { %v3553_v50 = vpop.permute.xlu0 %3552  ;;  %v3571_v61 = vpop.permute.xlu1 %3570 }
0x11ed   : > { %v3499_v19 = vpop.f32.mrb[24].mxu1 }
0x11ee   : > { %v3500_v37 = vadd.f32 %v3499_v19, %v3446_v36  ;;  %v3501_v22 = vpop.f32.mrb[25].mxu1 }
0x11ef   : > { %v3503_v38 = vpop.f32.mrb[26].mxu1  ;;  %v3502_v45 = vadd.f32 %v3501_v22, %v3446_v36 }
0x11f0   : > { %v5694_v39 = vadd.f32 %v3500_v37, %v5468_v40  ;;  %v3504_v41 = vadd.f32 %v3503_v38, %v3451_v14  ;;  %v3505_v42 = vpop.f32.mrb[27].mxu1 }
0x11f1   : > { %v3506_v43 = vadd.f32 %v3505_v42, %v3451_v14  ;;  %v5708_v52 = vadd.f32 %v3502_v45, %v5482_v55 }
0x11f2   : > { %v3516_v44 = vmul.f32 0.01, %v5694_v39  ;;  %v5698_v46 = vadd.f32 %v3504_v41, %v5472_v47  ;;  %vm3512_vm13 = vcmp.gt.f32.partialorder %v5694_v39, 0.0 }
0x11f3   : > { %v5704_v49 = vadd.f32 %v3506_v43, %v5478_v51  ;;  %v3517_v51 = vmul.f32 0.01, %v5708_v52  ;;  %vm3513_vm1 = vcmp.gt.f32.partialorder %v5708_v52, 0.0 }
0x11f4   : > { %vm3514_vm11 = vcmp.gt.f32.partialorder %v5698_v46, 0.0  ;;  %v3518_v48 = vmul.f32 0.01, %v5698_v46  ;;  %v3520_v40 = vsel %vm3512_vm13, %v5694_v39, %v3516_v44  ;;  %vm6088_vm13 = vcmask 162816  }
0x11f5   : > { %v3519_v47 = vmul.f32 0.01, %v5704_v49  ;;  %vm3515_vm4 = vcmp.gt.f32.partialorder %v5704_v49, 0.0  ;;  %v3521_v57 = vsel %vm3513_vm1, %v5708_v52, %v3517_v51 }
0x11f6   : > { %v3522_v53 = vsel %vm3514_vm11, %v5698_v46, %v3518_v48  ;;  %vm6089_vm11 = vmmov %vm6088_vm13 }
0x11f7   : > { %v5711_v56 = vpack.c.bf16 %v3522_v53, %v3520_v40  ;;  %v3523_v55 = vsel %vm3515_vm4, %v5704_v49, %v3519_v47  ;;  %vm6090_vm4 = vcmask 121856  }
0x11f8   : > { %v5727_v15 = vpack.c.bf16 %v3523_v55, %v3521_v57  ;;  %vm6091_vm1 = vmmov %vm6090_vm4 }
0x11f9   : > { %3554 = vrot.lane.b32.xlu0 %v5711_v56, %s6057_s18  ;;  %3536 = vrot.lane.b32.xlu1 %v5711_v56, %s6056_s15 }
0x11fd   : > { %3590 = vrot.lane.b32.xlu0 %v5711_v56, %s6059_s17  ;;  %3572 = vrot.lane.b32.xlu1 %v5711_v56, %s6058_s8 }
0x1201   : > { %3538 = vrot.lane.b32.xlu0 %v5727_v15, %s6056_s15  ;;  %3608 = vrot.lane.b32.xlu1 %v5711_v56, %s6074_s14  ;;  %s6084_s15 = smov 108  }
0x1205   : > { %3588 = vrot.lane.b32.xlu0 %v5584_v62, %s6059_s17  ;;  %3556 = vrot.lane.b32.xlu1 %v5727_v15, %s6057_s18 }
0x1209   : > { %3574 = vrot.lane.b32.xlu0 %v5727_v15, %s6058_s8  ;;  %3606 = vrot.lane.b32.xlu1 %v5584_v62, %s6074_s14 }
0x120d   : > { %3628 = vrot.lane.b32.xlu0 %v5711_v56, %s6081_s10  ;;  %3592 = vrot.lane.b32.xlu1 %v5727_v15, %s6059_s17  ;;  %s6085_s17 = smov 103  }
0x1211   : > { %3610 = vrot.lane.b32.xlu0 %v5727_v15, %s6074_s14  ;;  %3632 = vrot.lane.b32.xlu1 %v5620_v1, %s6081_s10 }
0x1215   : > { %3650 = vrot.lane.b32.xlu0 %v5620_v1, %s6060_s21  ;;  %3646 = vrot.lane.b32.xlu1 %v5711_v56, %s6060_s21 }
0x1219   : > { %3630 = vrot.lane.b32.xlu0 %v5727_v15, %s6081_s10  ;;  %3668 = vrot.lane.b32.xlu1 %v5620_v1, %s6061_s16 }
0x121d   : > { %3664 = vrot.lane.b32.xlu0 %v5711_v56, %s6061_s16  ;;  %3648 = vrot.lane.b32.xlu1 %v5727_v15, %s6060_s21 }
0x1221   : > { %3666 = vrot.lane.b32.xlu0 %v5727_v15, %s6061_s16  ;;  %3682 = vrot.lane.b32.xlu1 %v5711_v56, %s6084_s15 }
0x1225   : > { %3686 = vrot.lane.b32.xlu0 %v5620_v1, %s6084_s15  ;;  %3684 = vrot.lane.b32.xlu1 %v5727_v15, %s6084_s15 }
0x1229   : > { %3702 = vrot.lane.b32.xlu0 %v5727_v15, %s6085_s17  ;;  %3704 = vrot.lane.b32.xlu1 %v5620_v1, %s6085_s17 }
0x122d   : > { %3700 = vrot.lane.b32.xlu0 %v5711_v56, %s6085_s17  ;;  %3742 = vperm.xlu1 %4399, %v4283_v58  }
0x1231   : > { %3747 = vperm.xlu0 %4398, %v4284_v59   ;;  %3827 = vrot.lane.b32.xlu1 %v5584_v62, %s6074_s14 }
0x1235   : > { %3845 = vrot.lane.b32.xlu0 %v5584_v62, %s6075_s29  ;;  %3863 = vrot.lane.b32.xlu1 %v5584_v62, %s6076_s23 }
0x126b   : > { %v3555_v63 = vpop.permute.xlu0 %3554  ;;  %v3537_v4 = vpop.permute.xlu1 %3536 }
0x126c   : > { %v3540_v16 = vsel %vm6087_vm3, %v3535_v60, %v3537_v4  ;;  %v3558_v6 = vsel %vm6089_vm11, %v3553_v50, %v3555_v63  ;;  %v4426_v60 = vld [vmem:[%s5992_s5 + $0x40] ss:$8 sps:$4 sm:$0xff]  }
0x126f   : > { %v3591_v5 = vpop.permute.xlu0 %3590  ;;  %v3573_v8 = vpop.permute.xlu1 %3572 }
0x1270   : > { %v3576_v28 = vsel %vm6091_vm1, %v3571_v61, %v3573_v8 }
0x1273   : > { %v3539_v10 = vpop.permute.xlu0 %3538  ;;  %v3609_v11 = vpop.permute.xlu1 %3608 }
0x1274   : > { %v3541_v23 = vsel %vm6086_vm12, %v3537_v4, %v3539_v10  ;;  %vm6092_vm12 = vcmask 80896  }
0x1275   : > { %3762 = vmatprep.subr.bf16.mxu0 %v3541_v23  ;;  %vm6093_vm3 = vmmov %vm6092_vm12 }
0x1276   : > { %3763 = vmatpush1.bf16.msra.mxu0 %v3540_v16 }
0x1277   : > { %v3589_v17 = vpop.permute.xlu0 %3588  ;;  %v3557_v3 = vpop.permute.xlu1 %3556 }
0x1278   : > { %v3559_v25 = vsel %vm6088_vm13, %v3555_v63, %v3557_v3  ;;  %v3594_v20 = vsel %vm6093_vm3, %v3589_v17, %v3591_v5  ;;  %vm6094_vm13 = vcmask 1006592  }
0x1279   : > { %3764 = vmatprep.subr.bf16.mxu0 %v3559_v25  ;;  %vm6095_vm11 = vmmov %vm6094_vm13 }
0x127a   : > { %3765 = vmatpush1.bf16.msra.mxu0 %v3558_v6 }
0x127b   : > { %v3575_v26 = vpop.permute.xlu0 %3574  ;;  %v3607_v54 = vpop.permute.xlu1 %3606 }
0x127c   : > { %v3577_v27 = vsel %vm6090_vm4, %v3573_v8, %v3575_v26  ;;  %v3612_v35 = vsel %vm2426_vm10, %v3607_v54, %v3609_v11  ;;  %vm6096_vm4 = vcmask 965632  }
0x127d   : > { %3766 = vmatprep.subr.bf16.mxu0 %v3577_v27  ;;  %vm6097_vm1 = vmmov %vm6096_vm4 }
0x127e   : > { %3767 = vmatpush1.bf16.msra.mxu0 %v3576_v28 }
0x127f   : > { %v3629_v9 = vpop.permute.xlu0 %3628  ;;  %v3593_v33 = vpop.permute.xlu1 %3592 }
0x1280   : > { %v3595_v13 = vsel %vm6092_vm12, %v3591_v5, %v3593_v33  ;;  %vm6098_vm12 = vcmask 924672  }
0x1281   : > { %3768 = vmatprep.subr.bf16.mxu0 %v3595_v13  ;;  %vm6099_vm3 = vmmov %vm6098_vm12  ;;  %v4221_v13 = vld [vmem:[%s5989_s2 + $0x50] sm:$0xff] }
0x1282   : > { %3769 = vmatpush1.bf16.msra.mxu0 %v3594_v20  ;;  %v4222_v20 = vld [vmem:[%s5989_s2 + $0x58] sm:$0xff] }
0x1283   : > { %v3611_v18 = vpop.permute.xlu0 %3610  ;;  %v3633_v2 = vpop.permute.xlu1 %3632 }
0x1284   : > { %v3613_v21 = vsel %vm2426_vm10, %v3609_v11, %v3611_v18  ;;  %v4253_v18 = vld [vmem:[%s5991_s4 + $0x50] sm:$0xff] }
0x1285   : > { %3770 = vmatprep.subr.bf16.mxu0 %v3613_v21  ;;  %v4291_v21 = vld [vmem:[%s5993_s6 + $0x58] sm:$0xff] }
0x1286   : > { %3771 = vmatpush1.bf16.msra.mxu0 %v3612_v35 }
0x1287   : > { %v3651_v36 = vpop.permute.xlu0 %3650  ;;  %3772 = vmatprep.subr.bf16.mxu0 %v5727_v15  ;;  %v3647_v19 = vpop.permute.xlu1 %3646 }
0x128a   : > { %3773 = vmatpush1.bf16.msra.mxu0 %v5711_v56 }
0x128b   : > { %v3631_v37 = vpop.permute.xlu0 %3630  ;;  %v3669_v22 = vpop.permute.xlu1 %3668 }
0x128c   : > { %v3634_v14 = vsel %vm6094_vm13, %v3629_v9, %v3631_v37  ;;  %v3635_v38 = vsel %vm6095_vm11, %v3631_v37, %v3633_v2  ;;  %vm6100_vm13 = vcmask 883712   ;;  %v4290_v2 = vld [vmem:[%s5993_s6 + $0x50] sm:$0xff] }
0x128d   : > { %3774 = vmatprep.subr.bf16.mxu0 %v3635_v38  ;;  %vm6101_vm11 = vmmov %vm6100_vm13 }
0x128e   : > { %3775 = vmatpush1.bf16.msra.mxu0 %v3634_v14 }
0x128f   : > { %v3665_v41 = vpop.permute.xlu0 %3664  ;;  %v3649_v42 = vpop.permute.xlu1 %3648 }
0x1290   : > { %v3652_v43 = vsel %vm6096_vm4, %v3647_v19, %v3649_v42  ;;  %v3653_v44 = vsel %vm6097_vm1, %v3649_v42, %v3651_v36  ;;  %vm6102_vm4 = vcmask 842752  }
0x1291   : > { %3776 = vmatprep.subr.bf16.mxu0 %v3653_v44  ;;  %vm6103_vm1 = vmmov %vm6102_vm4 }
0x1292   : > { %3777 = vmatpush1.bf16.msra.mxu0 %v3652_v43 }
0x1293   : > { %v3667_v45 = vpop.permute.xlu0 %3666  ;;  %v3683_v48 = vpop.permute.xlu1 %3682 }
0x1294   : > { %v3670_v40 = vsel %vm6098_vm12, %v3665_v41, %v3667_v45  ;;  %v3671_v53 = vsel %vm6099_vm3, %v3667_v45, %v3669_v22 }
0x1295   : > { %3778 = vmatprep.subr.bf16.mxu0 %v3671_v53 }
0x1296   : > { %3779 = vmatpush1.bf16.msra.mxu0 %v3670_v40 }
0x1297   : > { %v3687_v56 = vpop.permute.xlu0 %3686  ;;  %v3685_v47 = vpop.permute.xlu1 %3684 }
0x1298   : > { %v3688_v51 = vsel %vm6100_vm13, %v3683_v48, %v3685_v47  ;;  %v3689_v55 = vsel %vm6101_vm11, %v3685_v47, %v3687_v56 }
0x1299   : > { %3780 = vmatprep.subr.bf16.mxu0 %v3689_v55 }
0x129a   : > { %3781 = vmatpush1.bf16.msra.mxu0 %v3688_v51 }
0x129b   : > { %v3703_v57 = vpop.permute.xlu0 %3702  ;;  %v3705_v15 = vpop.permute.xlu1 %3704 }
0x129c   : > { %v3707_v12 = vsel %vm6102_vm4, %v3703_v57, %v3705_v15 }
0x129d   : > { %3782 = vmatprep.subr.bf16.mxu0 %v3707_v12 }
0x129f   : > { %v3701_v58 = vpop.permute.xlu0 %3700 }
0x12a0   : > { %v3706_v59 = vsel %vm6103_vm1, %v3701_v58, %v3703_v57 }
0x12a1   : > { %3783 = vmatpush1.bf16.msra.mxu0 %v3706_v59 }
0x12a4   : > { %3795 = vmatmul.mubr.bf16.vlgmr.msra.gmra.mrb[32].mxu0 %v4426_v60 }
0x12ac   : > { %v3743_v50 = vpop.permute.xlu1 %3742 }
0x12b0   : > { %v3748_v5 = vpop.permute.xlu0 %3747  ;;  %v3828_v35 = vpop.permute.xlu1 %3827 }
0x12b4   : > { %v3846_v36 = vpop.permute.xlu0 %3845  ;;  %v3864_v19 = vpop.permute.xlu1 %3863 }
0x1377   : > { %v3796_v61 = vpop.f32.mrb[32].mxu0 }
0x1378   : > { %v3797_v63 = vadd.f32 %v3796_v61, %v3743_v50  ;;  %v3798_v4 = vpop.f32.mrb[33].mxu0 }
0x1379   : > { %v3799_v8 = vadd.f32 %v3798_v4, %v3743_v50  ;;  %v3800_v10 = vpop.f32.mrb[34].mxu0 }
0x137a   : > { %v3809_v11 = vmul.f32 0.01, %v3797_v63  ;;  %v3801_v23 = vadd.f32 %v3800_v10, %v3748_v5  ;;  %v3802_v16 = vpop.f32.mrb[35].mxu0  ;;  %vm3805_vm12 = vcmp.gt.f32.partialorder %v3797_v63, 0.0 }
0x137b   : > { %v3810_v17 = vmul.f32 0.01, %v3799_v8  ;;  %v3803_v3 = vadd.f32 %v3802_v16, %v3748_v5  ;;  %vm3806_vm3 = vcmp.gt.f32.partialorder %v3799_v8, 0.0 }
0x137c   : > { %vm3807_vm13 = vcmp.gt.f32.partialorder %v3801_v23, 0.0  ;;  %v3811_v25 = vmul.f32 0.01, %v3801_v23  ;;  %v3813_v26 = vsel %vm3805_vm12, %v3797_v63, %v3809_v11 }
0x137d   : > { %vm3808_vm11 = vcmp.gt.f32.partialorder %v3803_v3, 0.0  ;;  %v3812_v6 = vmul.f32 0.01, %v3803_v3  ;;  %v3814_v27 = vsel %vm3806_vm3, %v3799_v8, %v3810_v17 }
0x137e   : > { %v3815_v54 = vsel %vm3807_vm13, %v3801_v23, %v3811_v25 }
0x137f   : > { %v5816_v28 = vpack.c.bf16 %v3815_v54, %v3813_v26  ;;  %v3816_v9 = vsel %vm3808_vm11, %v3803_v3, %v3812_v6 }
0x1380   : > { %v5818_v33 = vpack.c.bf16 %v3816_v9, %v3814_v27 }
0x1381   : > { %3847 = vrot.lane.b32.xlu0 %v5816_v28, %s6075_s29  ;;  %3829 = vrot.lane.b32.xlu1 %v5816_v28, %s6074_s14 }
0x1385   : > { %3883 = vrot.lane.b32.xlu0 %v5816_v28, %s6077_s9  ;;  %3865 = vrot.lane.b32.xlu1 %v5816_v28, %s6076_s23 }
0x1389   : > { %3831 = vrot.lane.b32.xlu0 %v5818_v33, %s6074_s14  ;;  %3901 = vrot.lane.b32.xlu1 %v5816_v28, %s6055_s19  ;;  %s4438_s14 = scalar_lea.vmem %s5937_s30, 512 }
0x138a   : > { %p4439_p11 = scmp.ne.s32.totalorder %s5937_s30, %s4438_s14 }
0x138c   : > { %p4440_p12 = pnand %p4439_p11, %p4606_p5 }
0x138d   : > { %3881 = vrot.lane.b32.xlu0 %v5584_v62, %s6077_s9  ;;  %3849 = vrot.lane.b32.xlu1 %v5818_v33, %s6075_s29  ;;  %s4525_s29 = smov [#allocation4]  }
0x138e   : > { %p4441_p13 = pneg %p4440_p12 }
0x1391   : > { %3867 = vrot.lane.b32.xlu0 %v5818_v33, %s6076_s23  ;;  %3899 = vrot.lane.b32.xlu1 %v5584_v62, %s6055_s19  ;;  %v4427_v62 = vld [vmem:[%s5992_s5 + $0x54] ss:$8 sps:$4 sm:$0xff]   ;;  %s4301_s23 = sshll.u32 %s4589_s28, 9  ;;  %s5946_s28 = scalar_lea.sflag [#allocation5], %s269_s1 }
0x1392   : > { %4294 = vmatprep.mubr.msk.bf16.mxu1 %vm369_vm8, %v4427_v62 }
0x1395   : > { %3921 = vrot.lane.b32.xlu0 %v5816_v28, %s6054_s22  ;;  %3885 = vrot.lane.b32.xlu1 %v5818_v33, %s6077_s9  ;;  %s4442_s9 = sshll.u32 %s4525_s29, 4  ;;  %s4443_s9 = int_to_ptr.vmem [resolvable:$false] %s4442_s9 }
0x1396   : > { %p4445_p0 = scmp.lt.s32.totalorder %s5937_s30, %s4443_s9 }
0x1399   : > { %3903 = vrot.lane.b32.xlu0 %v5818_v33, %s6055_s19  ;;  %3925 = vrot.lane.b32.xlu1 %v5620_v1, %s6054_s22 }
0x139d   : > { %3943 = vrot.lane.b32.xlu0 %v5620_v1, %s6078_s13  ;;  %3939 = vrot.lane.b32.xlu1 %v5816_v28, %s6078_s13 }
0x13a1   : > { %3923 = vrot.lane.b32.xlu0 %v5818_v33, %s6054_s22  ;;  %3961 = vrot.lane.b32.xlu1 %v5620_v1, %s6079_s20 }
0x13a5   : > { %3957 = vrot.lane.b32.xlu0 %v5816_v28, %s6079_s20  ;;  %3941 = vrot.lane.b32.xlu1 %v5818_v33, %s6078_s13 }
0x13a9   : > { %3959 = vrot.lane.b32.xlu0 %v5818_v33, %s6079_s20  ;;  %3975 = vrot.lane.b32.xlu1 %v5816_v28, %s6080_s0  ;;  %s5942_s20 = scalar_lea.hbm %s5994_s7, %s4301_s23 }
0x13ad   : > { %3979 = vrot.lane.b32.xlu0 %v5620_v1, %s6080_s0  ;;  %3977 = vrot.lane.b32.xlu1 %v5818_v33, %s6080_s0  ;;  %s4444_s0 = scalar_lea.vmem %s4443_s9, 1024 }
0x13ae   : > { %p4446_p1 = scmp.lt.s32.totalorder %s4444_s0, %s4438_s14 }
0x13b0   : > { %p4447_p2 = por %p4446_p1, %p4445_p0 }
0x13b1   : > { %3995 = vrot.lane.b32.xlu0 %v5818_v33, %s6081_s10  ;;  %3997 = vrot.lane.b32.xlu1 %v5620_v1, %s6081_s10  ;;  %v4254_v1 = vld [vmem:[%s5991_s4 + $0x58] sm:$0xff] }
0x13b2   : > { %p4448_p3 = pnand %p4447_p2, %p4441_p13 }
0x13b5   : > { %3993 = vrot.lane.b32.xlu0 %v5816_v28, %s6081_s10  ;;  %1010 = vperm.xlu1 %4399, %v4221_v13  }
0x13b9   : > { %1015 = vperm.xlu0 %4398, %v4222_v20   ;;  %2269 = vperm.xlu1 %4399, %v4253_v18  }
0x13bd   : > { %2274 = vperm.xlu0 %4398, %v4254_v1   ;;  %4035 = vperm.xlu1 %4399, %v4290_v2   ;;  %v4429_v2 = vld [vmem:[%s5992_s5 + $0x50] ss:$8 sps:$4 sm:$0xff]  }
0x13c1   : > { %4040 = vperm.xlu0 %4398, %v4291_v21  }
0x13f3   : > { %v3848_v37 = vpop.permute.xlu0 %3847  ;;  %v3830_v22 = vpop.permute.xlu1 %3829 }
0x13f4   : > { %v3833_v44 = vsel %vm2426_vm10, %v3828_v35, %v3830_v22  ;;  %v3851_v53 = vsel %vm2669_vm0, %v3846_v36, %v3848_v37 }
0x13f7   : > { %v3884_v14 = vpop.permute.xlu0 %3883  ;;  %v3866_v38 = vpop.permute.xlu1 %3865 }
0x13f8   : > { %v3869_v55 = vsel %vm1125_vm14, %v3864_v19, %v3866_v38 }
0x13fb   : > { %v3832_v41 = vpop.permute.xlu0 %3831  ;;  %v3902_v42 = vpop.permute.xlu1 %3901 }
0x13fc   : > { %v3834_v43 = vsel %vm2426_vm10, %v3830_v22, %v3832_v41 }
0x13fd   : > { %4055 = vmatprep.subr.bf16.mxu1 %v3834_v43 }
0x13fe   : > { %4056 = vmatpush1.bf16.msra.mxu1 %v3833_v44 }
0x13ff   : > { %v3882_v45 = vpop.permute.xlu0 %3881  ;;  %v3850_v48 = vpop.permute.xlu1 %3849 }
0x1400   : > { %v3852_v40 = vsel %vm2669_vm0, %v3848_v37, %v3850_v48  ;;  %v3887_v58 = vsel %vm1319_vm5, %v3882_v45, %v3884_v14 }
0x1401   : > { %4057 = vmatprep.subr.bf16.mxu1 %v3852_v40 }
0x1402   : > { %4058 = vmatpush1.bf16.msra.mxu1 %v3851_v53 }
0x1403   : > { %v3868_v56 = vpop.permute.xlu0 %3867  ;;  %v3900_v47 = vpop.permute.xlu1 %3899 }
0x1404   : > { %v3870_v51 = vsel %vm1125_vm14, %v3866_v38, %v3868_v56  ;;  %v3905_v61 = vsel %vm314_vm6, %v3900_v47, %v3902_v42 }
0x1405   : > { %4059 = vmatprep.subr.bf16.mxu1 %v3870_v51 }
0x1406   : > { %4060 = vmatpush1.bf16.msra.mxu1 %v3869_v55 }
0x1407   : > { %v3922_v57 = vpop.permute.xlu0 %3921  ;;  %v3886_v15 = vpop.permute.xlu1 %3885 }
0x1408   : > { %v3888_v12 = vsel %vm1319_vm5, %v3884_v14, %v3886_v15 }
0x1409   : > { %4061 = vmatprep.subr.bf16.mxu1 %v3888_v12 }
0x140a   : > { %4062 = vmatpush1.bf16.msra.mxu1 %v3887_v58 }
0x140b   : > { %v3904_v59 = vpop.permute.xlu0 %3903  ;;  %v3926_v60 = vpop.permute.xlu1 %3925 }
0x140c   : > { %v3906_v50 = vsel %vm314_vm6, %v3902_v42, %v3904_v59  ;;  %vm6104_vm6 = vcmask 1006592  }
0x140d   : > { %4063 = vmatprep.subr.bf16.mxu1 %v3906_v50 }
0x140e   : > { %4064 = vmatpush1.bf16.msra.mxu1 %v3905_v61 }
0x140f   : > { %v3944_v63 = vpop.permute.xlu0 %3943  ;;  %4065 = vmatprep.subr.bf16.mxu1 %v5818_v33  ;;  %v3940_v4 = vpop.permute.xlu1 %3939 }
0x1412   : > { %4066 = vmatpush1.bf16.msra.mxu1 %v5816_v28 }
0x1413   : > { %v3924_v5 = vpop.permute.xlu0 %3923  ;;  %v3962_v8 = vpop.permute.xlu1 %3961 }
0x1414   : > { %v3927_v10 = vsel %vm337_vm7, %v3922_v57, %v3924_v5  ;;  %v3928_v11 = vsel %vm337_vm7, %v3924_v5, %v3926_v60  ;;  %vm6105_vm7 = vmmov %vm6104_vm6 }
0x1415   : > { %4067 = vmatprep.subr.bf16.mxu1 %v3928_v11 }
0x1416   : > { %4068 = vmatpush1.bf16.msra.mxu1 %v3927_v10 }
0x1417   : > { %v3958_v23 = vpop.permute.xlu0 %3957  ;;  %v3942_v16 = vpop.permute.xlu1 %3941 }
0x1418   : > { %v3945_v17 = vsel %vm1378_vm9, %v3940_v4, %v3942_v16  ;;  %v3946_v3 = vsel %vm1378_vm9, %v3942_v16, %v3944_v63 }
0x1419   : > { %4069 = vmatprep.subr.bf16.mxu1 %v3946_v3 }
0x141a   : > { %4070 = vmatpush1.bf16.msra.mxu1 %v3945_v17 }
0x141b   : > { %v3960_v25 = vpop.permute.xlu0 %3959  ;;  %v3976_v6 = vpop.permute.xlu1 %3975 }
0x141c   : > { %v3963_v26 = vsel %vm1148_vm15, %v3958_v23, %v3960_v25  ;;  %v3964_v54 = vsel %vm1148_vm15, %v3960_v25, %v3962_v8 }
0x141d   : > { %4071 = vmatprep.subr.bf16.mxu1 %v3964_v54 }
0x141e   : > { %4072 = vmatpush1.bf16.msra.mxu1 %v3963_v26 }
0x141f   : > { %v3980_v27 = vpop.permute.xlu0 %3979  ;;  %v3978_v28 = vpop.permute.xlu1 %3977 }
0x1420   : > { %v3981_v9 = vsel %vm2800_vm2, %v3976_v6, %v3978_v28  ;;  %v3982_v33 = vsel %vm2800_vm2, %v3978_v28, %v3980_v27 }
0x1421   : > { %4073 = vmatprep.subr.bf16.mxu1 %v3982_v33 }
0x1422   : > { %4074 = vmatpush1.bf16.msra.mxu1 %v3981_v9 }
0x1423   : > { %v3996_v62 = vpop.permute.xlu0 %3995  ;;  %v3998_v13 = vpop.permute.xlu1 %3997 }
0x1424   : > { %v4000_v20 = vsel %vm6104_vm6, %v3996_v62, %v3998_v13 }
0x1425   : > { %4075 = vmatprep.subr.bf16.mxu1 %v4000_v20 }
0x1427   : > { %v3994_v18 = vpop.permute.xlu0 %3993 }
0x1428   : > { %v3999_v1 = vsel %vm6105_vm7, %v3994_v18, %v3996_v62 }
0x1429   : > { %4076 = vmatpush1.bf16.msra.mxu1 %v3999_v1 }
0x142c   : > { %4088 = vmatmul.mubr.bf16.vlgmr.msra.gmra.mrb[8].mxu1 %v4429_v2 }
0x1434   : > { %v1011_v21 = vpop.permute.xlu1 %1010 }
0x1435   : > { %v4302_v36 = vadd.f32 %v1011_v21, %v4784_v7  ;;  %v4308_v19 = vadd.f32 %v1011_v21, %v4787_v29 }
0x1437   : > { %v4303_v14 = vadd.f32 %v4302_v36, %v5112_v24  ;;  %v4309_v38 = vadd.f32 %v4308_v19, %v5116_v30 }
0x1438   : > { %v1016_v35 = vpop.permute.xlu0 %1015  ;;  %v2270_v41 = vpop.permute.xlu1 %2269 }
0x1439   : > { %v4314_v37 = vadd.f32 %v1016_v35, %v4791_v32  ;;  %v4320_v22 = vadd.f32 %v1016_v35, %v4796_v34  ;;  %v4304_v45 = vadd.f32 %v4303_v14, %v2270_v41  ;;  %v4310_v48 = vadd.f32 %v4309_v38, %v2270_v41 }
0x143b   : > { %v4315_v42 = vadd.f32 %v4314_v37, %v5119_v0  ;;  %v4321_v43 = vadd.f32 %v4320_v22, %v5123_v31  ;;  %v4305_v32 = vadd.f32 %v4304_v45, %v5694_v39  ;;  %v4311_v34 = vadd.f32 %v4310_v48, %v5708_v52 }
0x143c   : > { %v2275_v44 = vpop.permute.xlu0 %2274  ;;  %v4036_v40 = vpop.permute.xlu1 %4035 }
0x143d   : > { %v4316_v7 = vadd.f32 %v4315_v42, %v2275_v44  ;;  %v4322_v29 = vadd.f32 %v4321_v43, %v2275_v44  ;;  %v4306_v31 = vadd.f32 %v4305_v32, %v4036_v40  ;;  %v4312_v53 = vadd.f32 %v4311_v34, %v4036_v40 }
0x143f   : > { %v4317_v24 = vadd.f32 %v4316_v7, %v5698_v46  ;;  %v4323_v30 = vadd.f32 %v4322_v29, %v5704_v49 }
0x1440   : > { %v4041_v0 = vpop.permute.xlu0 %4040 }
0x1441   : > { %v4318_v47 = vadd.f32 %v4317_v24, %v4041_v0  ;;  %v4324_v39 = vadd.f32 %v4323_v30, %v4041_v0 }
0x14ff   : > { %v4089_v56 = vpop.f32.mrb[8].mxu1 }
0x1500   : > { %v4307_v51 = vadd.f32 %v4306_v31, %v4089_v56  ;;  %v4091_v55 = vpop.f32.mrb[9].mxu1 }
0x1501   : > { %v4313_v52 = vadd.f32 %v4312_v53, %v4091_v55  ;;  %v4093_v57 = vpop.f32.mrb[10].mxu1 }
0x1502   : > { %4106 = vst [vmem:[%s271_s26] sm:$0xff] %v4307_v51  ;;  %v4319_v46 = vadd.f32 %v4318_v47, %v4093_v57  ;;  %v4095_v49 = vpop.f32.mrb[11].mxu1 }
0x1503   : > { %4107 = vst [vmem:[%s271_s26 + $0x8] sm:$0xff] %v4313_v52  ;;  %v4325_v15 = vadd.f32 %v4324_v39, %v4095_v49 }
0x1504   : > { %4108 = vst [vmem:[%s271_s26 + $0x10] sm:$0xff] %v4319_v46 }
0x1505   : > { %4109 = vst [vmem:[%s271_s26 + $0x18] sm:$0xff] %v4325_v15 }
0x1506   : > { %4451 = shalt.err (!%p4448_p3)
}
0x1507   : > { %s4452_s13 = scalar_lea.hbm %s5942_s20, 512  ;;  %s4456_s8 = scalar_lea.hbm %s5994_s7, 1024 }
0x1508   : > { %p4453_p4 = scmp.ne.s32.totalorder %s5942_s20, %s4452_s13  ;;  %p4457_p9 = scmp.lt.u32.totalorder %s5942_s20, %s5994_s7 }
0x1509   : > { %p4458_p10 = scmp.lt.u32.totalorder %s4456_s8, %s4452_s13  ;;  %p4460_p12 = scmp.lt.u32.totalorder %s4452_s13, %s5942_s20 }
0x150a   : > { %p4454_p7 = pnand %p4453_p4, %p4606_p5 }
0x150b   : > { %p4459_p11 = por %p4458_p10, %p4457_p9 }
0x150c   : > { %p4455_p8 = pneg %p4454_p7 }
0x150d   : > { %p4461_p13 = por %p4460_p12, %p4459_p11 }
0x150f   : > { %p4462_p0 = pnand %p4461_p13, %p4455_p8 }
0x1511   : > { %4465 = shalt.err (!%p4462_p0)
}
0x1512   : > { %s4526_s21 = smov 256   ;;  %s4527_s16 = smov 16  }
0x1513   : > { %4334 = dma.vmem_to_hbm [thread:$0]  (%p4606_p5), %s5937_s30, 512, %s5942_s20, %s5946_s28, %s4526_s21, %s4526_s21, %s4527_s16  }
0x1514 PF: > { %p4340_p1 = scmp.ge.s32.totalorder %s4500_s27, 2  ;;  %s4139_s1 = sand.u32 1, %s4488_s24  }
0x1515   : > { %s4140_s3 = scalar_lea.sflag [#allocation5], %s4139_s1 }
0x1516   : > { %p4337_p2 = pnand %p4340_p1, %p4610_p6 }
0x1518   : > { %4483 = dma.done.wait (!%p4337_p2), %s4140_s3, 512  }
0x1519   : > { %4485 = vsyncadd (!%p4337_p2), %s4140_s3, 4294966784  ;;  %s6106_s27 = sld [smem:[#allocation8_spill]]  ;;  %s6107_s26 = sld [smem:[#allocation7_spill]] }
0x151a   : > { %s6108_s23 = sld [smem:[#allocation9_spill]]  ;;  %s6109_s24 = smov %s4492_s25 }
0x151f   : > { %p17_p3 = scmp.ge.s32.totalorder %s6106_s27, 4   ;;  %s6110_s25 = smov %s6107_s26 }
0x1520   : > { %s6111_s26 = smov %s6108_s23 }
0x1521   :  { %19 = sbr.rel (!%p17_p3) target bundleno = 7 (0x7), region = 113 }
0x1528   :  { %4145 = vsyncpa [#allocation5], 1 }
0x1529   :  { %4147 = vsyncpa [#allocation5 + $0x1], 1 }

</bundles_post_ra>
